<compile_context>
chip_gen: v6e
topology: v6e:2x2x1
jax: 0.10.0
libtpu: 0.0.40
codegen_flags: <defaults>
</compile_context>

<pallas_src>
import functools
import math

import jax
import jax.numpy as jnp
from jax import lax
from jax.experimental import pallas as pl
from jax.experimental.pallas import tpu as pltpu

_VMEM_LIMIT = 48 * 1024 * 1024   # safe on v5e/v6e (128 MiB) and v7x (64 MiB)
_DS_ROW_TILE = 512               # downsampler row tile (bf16 operands)


# ---------------------------------------------------------------------------
# Pallas kernels
# ---------------------------------------------------------------------------

def _nb1d_kernel(x_ref, w1_ref, b1_ref, w2_ref, b2_ref, w3_ref, b3_ref,
                 w4_ref, b4_ref, o_ref, *, H, W, d):
    """Fused ERFNet non_bottleneck_1d block for ONE image (HW, C) in VMEM.

    conv3x1_1 -> relu -> conv1x3_1(+bn1 folded) -> relu ->
    conv3x1_2(dil d) -> relu -> conv1x3_2(dil d, +bn2 folded) ->
    (dropout: eval identity) -> +input -> relu
    """
    HW = H * W
    row = lax.broadcasted_iota(jnp.int32, (HW, 1), 0)
    # w-coordinate of every flattened row (W is static; prefer bit-and when pow2)
    col = (row & (W - 1)) if (W & (W - 1)) == 0 else (row % W)

    def shift_rows(a, k):
        """s[r] = a[r + k] for 0 <= r + k < HW, else 0 (k static, != 0)."""
        c = a.shape[-1]
        zeros = jnp.zeros((abs(k), c), a.dtype)
        if k > 0:
            return jnp.concatenate([a[k:, :], zeros], axis=0)
        return jnp.concatenate([zeros, a[:k, :]], axis=0)

    def conv3(a_f32, w_ref, b_ref, dil, along_h):
        """3-tap 1-D conv (dilation `dil`) along H (row stride W) or W."""
        acc = jnp.dot(a_f32.astype(jnp.bfloat16), w_ref[1],
                      preferred_element_type=jnp.float32)
        extent = H if along_h else W
        if dil < extent:                       # taps fully out of range -> skip
            k = dil * W if along_h else dil
            am = shift_rows(a_f32, -k)         # tap at offset -dil
            ap = shift_rows(a_f32, +k)         # tap at offset +dil
            if not along_h:
                # zero taps that wrap across an image row (W boundary)
                am = jnp.where(col >= dil, am, 0.0)
                ap = jnp.where(col < W - dil, ap, 0.0)
            acc = acc + jnp.dot(am.astype(jnp.bfloat16), w_ref[0],
                                preferred_element_type=jnp.float32)
            acc = acc + jnp.dot(ap.astype(jnp.bfloat16), w_ref[2],
                                preferred_element_type=jnp.float32)
        return acc + b_ref[...]

    x_f32 = x_ref[...].astype(jnp.float32)
    y = jnp.maximum(conv3(x_f32, w1_ref, b1_ref, 1, True), 0.0)
    y = jnp.maximum(conv3(y, w2_ref, b2_ref, 1, False), 0.0)
    y = jnp.maximum(conv3(y, w3_ref, b3_ref, d, True), 0.0)
    # TODO(synk): training-mode Dropout2d (stochastic per-channel mask via
    #             pltpu.prng_seed / pltpu.prng_random_bits) not implemented;
    #             eval mode is the identity.
    y = conv3(y, w4_ref, b4_ref, d, False) + x_f32
    o_ref[...] = jnp.maximum(y, 0.0).astype(o_ref.dtype)


def _downsampler_kernel(p_ref, w_ref, bc_ref, scp_ref, shp_ref, o_ref,
                        *, cin, cc):
    """Fused DownsamplerBlock tile.

    p_ref : (TM, 9*cin) im2col patches of the 3x3/stride-2 conv (bf16).
    Conv channels use BN folded into w/bias; the 2x2 maxpool is computed from
    the patch columns (dh,dw) in {1,2}x{1,2}; one lane-dense (TM, cc+cin)
    output: [conv | pool], relu applied to both.
    """
    p = p_ref[...]
    conv = jnp.dot(p, w_ref[...], preferred_element_type=jnp.float32)
    conv = jnp.maximum(conv + bc_ref[...], 0.0)

    q01 = jnp.maximum(p[:, 4 * cin:5 * cin], p[:, 5 * cin:6 * cin])
    q23 = jnp.maximum(p[:, 7 * cin:8 * cin], p[:, 8 * cin:9 * cin])
    pool = jnp.maximum(q01, q23).astype(jnp.float32)
    pool = jnp.maximum(pool * scp_ref[...] + shp_ref[...], 0.0)

    o_ref[...] = jnp.concatenate([conv, pool], axis=-1).astype(o_ref.dtype)


# ---------------------------------------------------------------------------
# Block wrappers
# ---------------------------------------------------------------------------

def downsampler_block(x, params):
    """x: (N, H, W, Cin) bf16 -> (N, H//2, W//2, Cout) bf16.  Assumes even H, W."""
    N, H, W, Cin = x.shape
    Ho, Wo = H // 2, W // 2
    M = N * Ho * Wo
    wf = params["w"]                       # (9*Cin, Cc) bf16, BN folded
    Cc = wf.shape[1]
    Cout = Cc + Cin

    # im2col for 3x3 / stride 2 / padding 1 (column blocks ordered dh, dw).
    # TODO(synk): build the patches (and pool max) in-kernel from a haloed x
    #             tile to avoid the 9x HBM expansion of the input.
    xp = jnp.pad(x, ((0, 0), (1, 1), (1, 1), (0, 0)))
    patches = jnp.concatenate(
        [xp[:, dh:dh + 2 * Ho:2, dw:dw + 2 * Wo:2, :]
         for dh in range(3) for dw in range(3)], axis=-1).reshape(M, 9 * Cin)

    tm = M if M <= _DS_ROW_TILE else _DS_ROW_TILE
    grid = (pl.cdiv(M, tm),)
    kern = functools.partial(_downsampler_kernel, cin=Cin, cc=Cc)

    out = pl.pallas_call(
        kern,
        grid=grid,
        in_specs=[pl.BlockSpec((tm, 9 * Cin), lambda i: (i, 0)),
                  pl.BlockSpec((9 * Cin, Cc), lambda i: (0, 0)),
                  pl.BlockSpec((1, Cc), lambda i: (0, 0)),
                  pl.BlockSpec((1, Cin), lambda i: (0, 0)),
                  pl.BlockSpec((1, Cin), lambda i: (0, 0))],
        out_specs=pl.BlockSpec((tm, Cout), lambda i: (i, 0)),
        out_shape=jax.ShapeDtypeStruct((M, Cout), jnp.bfloat16),
        compiler_params=pltpu.CompilerParams(
            dimension_semantics=("parallel",),
            vmem_limit_bytes=_VMEM_LIMIT),
    )(patches, wf, params["bc"], params["scale_pool"], params["shift_pool"])

    return out.reshape(N, Ho, Wo, Cout)


def non_bottleneck_1d(x, p):
    """x: (N, H, W, C) bf16 -> same shape, bf16.  One pallas_call per block."""
    N, H, W, C = x.shape
    HW = H * W
    kern = functools.partial(_nb1d_kernel, H=H, W=W, d=p["dilation"])

    xspec = pl.BlockSpec((None, HW, C), lambda i: (i, 0, 0))
    wspec = pl.BlockSpec((3, C, C), lambda i: (0, 0, 0))
    bspec = pl.BlockSpec((1, C), lambda i: (0, 0))

    # TODO(synk): for very large images, tile H with a dilation-sized halo
    #             (manual DMA) instead of one image per grid step.
    out = pl.pallas_call(
        kern,
        grid=(N,),
        in_specs=[xspec, wspec, bspec, wspec, bspec, wspec, bspec, wspec, bspec],
        out_specs=xspec,
        out_shape=jax.ShapeDtypeStruct((N, HW, C), jnp.bfloat16),
        compiler_params=pltpu.CompilerParams(
            dimension_semantics=("parallel",),
            vmem_limit_bytes=_VMEM_LIMIT),
    )(x.reshape(N, HW, C),
      p["w1"], p["b1"], p["w2"], p["b2"], p["w3"], p["b3"], p["w4"], p["b4"])

    return out.reshape(N, H, W, C)


# ---------------------------------------------------------------------------
# Deterministic parameter init (BN folded, bf16 weights / f32 biases)
# ---------------------------------------------------------------------------

def _bn_affine(key, c):
    k1, k2, k3, k4 = jax.random.split(key, 4)
    gamma = 1.0 + 0.1 * jax.random.normal(k1, (c,), jnp.float32)
    beta = 0.1 * jax.random.normal(k2, (c,), jnp.float32)
    mean = 0.1 * jax.random.normal(k3, (c,), jnp.float32)
    var = jnp.abs(1.0 + 0.1 * jax.random.normal(k4, (c,), jnp.float32))
    scale = gamma * jax.lax.rsqrt(var + 1e-3)   # ERFNet BN eps = 1e-3
    shift = beta - mean * scale
    return scale, shift


def init_downsampler(key, cin, cout):
    k1, k2, k3 = jax.random.split(key, 3)
    cc = cout - cin
    w = jax.random.normal(k1, (3, 3, cin, cc), jnp.float32) * math.sqrt(2.0 / (9 * cin))
    b = 0.01 * jax.random.normal(k2, (cc,), jnp.float32)
    scale, shift = _bn_affine(k3, cout)
    sc_c, sh_c = scale[:cc], shift[:cc]
    wf = (w * sc_c[None, None, None, :]).reshape(9 * cin, cc).astype(jnp.bfloat16)
    bc = (b * sc_c + sh_c).reshape(1, cc).astype(jnp.float32)
    return dict(w=wf, bc=bc,
                scale_pool=scale[cc:].reshape(1, cin).astype(jnp.float32),
                shift_pool=shift[cc:].reshape(1, cin).astype(jnp.float32))


def init_nb1d(key, c, dilation):
    ks = jax.random.split(key, 10)
    wgen = lambda k: jax.random.normal(k, (3, c, c), jnp.float32) * math.sqrt(2.0 / (3 * c))
    bgen = lambda k: 0.01 * jax.random.normal(k, (c,), jnp.float32)
    w1, b1 = wgen(ks[0]), bgen(ks[1])
    w2, b2 = wgen(ks[2]), bgen(ks[3])
    w3, b3 = wgen(ks[4]), bgen(ks[5])
    w4, b4 = wgen(ks[6]), bgen(ks[7])
    s1, sh1 = _bn_affine(ks[8], c)
    s2, sh2 = _bn_affine(ks[9], c)
    w2 = w2 * s1[None, None, :]; b2 = b2 * s1 + sh1   # fold bn1 into conv1x3_1
    w4 = w4 * s2[None, None, :]; b4 = b4 * s2 + sh2   # fold bn2 into conv1x3_2
    bf = lambda w: w.astype(jnp.bfloat16)
    rb = lambda b: b.reshape(1, c).astype(jnp.float32)
    return dict(dilation=dilation,
                w1=bf(w1), b1=rb(b1), w2=bf(w2), b2=rb(b2),
                w3=bf(w3), b3=rb(b3), w4=bf(w4), b4=rb(b4))


def init_encoder(key, in_channels, dropout_prob=0.3, epistemic_version="standard"):
    # Dropout2d is the identity in eval mode, so the per-stage dropout probs
    # (standard/center/... variants) do not affect this inference forward pass.
    del dropout_prob, epistemic_version
    keys = jax.random.split(key, 32)
    params = {"initial": init_downsampler(keys[0], in_channels, 16)}
    layers = []
    i = 1
    layers.append(("down", init_downsampler(keys[i], 16, 64))); i += 1
    for _ in range(5):
        layers.append(("nb", init_nb1d(keys[i], 64, 1))); i += 1
    layers.append(("down", init_downsampler(keys[i], 64, 128))); i += 1
    for _ in range(2):
        for d in (2, 4, 8, 16):
            layers.append(("nb", init_nb1d(keys[i], 128, d))); i += 1
    params["layers"] = layers
    return params


def dropout_erfnet_encoder(x_nchw, params):
    """Forward pass.  x_nchw: (N, C, H, W) f32 -> (N, 128, H/8, W/8) f32 (NCHW)."""
    x = jnp.transpose(x_nchw, (0, 2, 3, 1)).astype(jnp.bfloat16)   # -> NHWC bf16
    x = downsampler_block(x, params["initial"])
    for kind, p in params["layers"]:
        x = downsampler_block(x, p) if kind == "down" else non_bottleneck_1d(x, p)
    return jnp.transpose(x.astype(jnp.float32), (0, 3, 1, 2))      # back to NCHW


# ---------------------------------------------------------------------------

if __name__ == "__main__":
    key = jax.random.PRNGKey(0)
    kp, kx = jax.random.split(key)
    in_channels = 4
    params = init_encoder(kp, in_channels)
    x = jax.random.normal(kx, (2, in_channels, 16, 16), jnp.float32)   # NCHW

    fwd = jax.jit(lambda inp: dropout_erfnet_encoder(inp, params))
    out = jax.block_until_ready(fwd(x))

    assert out.shape == (2, 128, 2, 2), out.shape
    assert out.dtype == jnp.float32
    assert bool(jnp.all(jnp.isfinite(out)))
    print("KERNEL_OK")
</pallas_src>

<mosaic_0001>
module attributes {stable_mosaic.version = 11 : i64} {
  func.func @_downsampler_kernel(%arg0: i32, %arg1: memref<128x36xbf16, #tpu.memory_space<vmem>>, %arg2: memref<36x12xbf16, #tpu.memory_space<vmem>>, %arg3: memref<1x12xf32, #tpu.memory_space<vmem>>, %arg4: memref<1x4xf32, #tpu.memory_space<vmem>>, %arg5: memref<1x4xf32, #tpu.memory_space<vmem>>, %arg6: memref<128x16xbf16, #tpu.memory_space<vmem>>) attributes {dimension_semantics = [#tpu.dimension_semantics<parallel>], iteration_bounds = array<i64: 1>, scalar_prefetch = 0 : i64, scratch_operands = 0 : i64, tpu.core_type = #tpu.core_type<tc>, window_params = [{transform_indices = @transform_0, window_bounds = array<i64: 128, 36>}, {pipeline_mode = #tpu.pipeline_mode<synchronous>, transform_indices = @transform_1, window_bounds = array<i64: 36, 12>}, {pipeline_mode = #tpu.pipeline_mode<synchronous>, transform_indices = @transform_2, window_bounds = array<i64: 1, 12>}, {pipeline_mode = #tpu.pipeline_mode<synchronous>, transform_indices = @transform_3, window_bounds = array<i64: 1, 4>}, {pipeline_mode = #tpu.pipeline_mode<synchronous>, transform_indices = @transform_4, window_bounds = array<i64: 1, 4>}, {transform_indices = @transform_5, window_bounds = array<i64: 128, 16>}]} {
    %c0 = arith.constant 0 : index
    %c0_0 = arith.constant 0 : index
    %0 = vector.load %arg1[%c0, %c0_0] : memref<128x36xbf16, #tpu.memory_space<vmem>>, vector<128x36xbf16>
    %c0_1 = arith.constant 0 : index
    %c0_2 = arith.constant 0 : index
    %1 = vector.load %arg2[%c0_1, %c0_2] : memref<36x12xbf16, #tpu.memory_space<vmem>>, vector<36x12xbf16>
    %cst = arith.constant dense<0.000000e+00> : vector<128x12xf32>
    %2 = tpu.matmul %0, %1, %cst {dimension_numbers = #tpu.dot_dimension_numbers<[1], [0], [0], [1], [0, 0, 1, 1], [], []>} : vector<128x36xbf16>, vector<36x12xbf16>, vector<128x12xf32> -> vector<128x12xf32>
    %c0_3 = arith.constant 0 : index
    %c0_4 = arith.constant 0 : index
    %3 = vector.load %arg3[%c0_3, %c0_4] : memref<1x12xf32, #tpu.memory_space<vmem>>, vector<1x12xf32>
    %4 = vector.broadcast %3 : vector<1x12xf32> to vector<128x12xf32>
    %5 = arith.addf %2, %4 : vector<128x12xf32>
    %cst_5 = arith.constant 0.000000e+00 : f32
    %6 = vector.broadcast %cst_5 : f32 to vector<128x12xf32>
    %7 = arith.maximumf %5, %6 : vector<128x12xf32>
    %8 = vector.extract_strided_slice %0 {offsets = [0, 16], sizes = [128, 4], strides = [1, 1]} : vector<128x36xbf16> to vector<128x4xbf16>
    %9 = vector.extract_strided_slice %0 {offsets = [0, 20], sizes = [128, 4], strides = [1, 1]} : vector<128x36xbf16> to vector<128x4xbf16>
    %10 = arith.maximumf %8, %9 : vector<128x4xbf16>
    %11 = vector.extract_strided_slice %0 {offsets = [0, 28], sizes = [128, 4], strides = [1, 1]} : vector<128x36xbf16> to vector<128x4xbf16>
    %12 = vector.extract_strided_slice %0 {offsets = [0, 32], sizes = [128, 4], strides = [1, 1]} : vector<128x36xbf16> to vector<128x4xbf16>
    %13 = arith.maximumf %11, %12 : vector<128x4xbf16>
    %14 = arith.maximumf %10, %13 : vector<128x4xbf16>
    %15 = arith.extf %14 : vector<128x4xbf16> to vector<128x4xf32>
    %c0_6 = arith.constant 0 : index
    %c0_7 = arith.constant 0 : index
    %16 = vector.load %arg4[%c0_6, %c0_7] : memref<1x4xf32, #tpu.memory_space<vmem>>, vector<1x4xf32>
    %17 = vector.broadcast %16 : vector<1x4xf32> to vector<128x4xf32>
    %18 = arith.mulf %15, %17 : vector<128x4xf32>
    %c0_8 = arith.constant 0 : index
    %c0_9 = arith.constant 0 : index
    %19 = vector.load %arg5[%c0_8, %c0_9] : memref<1x4xf32, #tpu.memory_space<vmem>>, vector<1x4xf32>
    %20 = vector.broadcast %19 : vector<1x4xf32> to vector<128x4xf32>
    %21 = arith.addf %18, %20 : vector<128x4xf32>
    %cst_10 = arith.constant 0.000000e+00 : f32
    %22 = vector.broadcast %cst_10 : f32 to vector<128x4xf32>
    %23 = arith.maximumf %21, %22 : vector<128x4xf32>
    %24 = tpu.concatenate %7, %23 in 1 : vector<128x12xf32>, vector<128x4xf32> -> vector<128x16xf32>
    %25 = arith.truncf %24 : vector<128x16xf32> to vector<128x16xbf16>
    %c0_11 = arith.constant 0 : index
    %c0_12 = arith.constant 0 : index
    %26 = vector.load %arg6[%c0_11, %c0_12] : memref<128x16xbf16, #tpu.memory_space<vmem>>, vector<128x16xbf16>
    tpu.vector_store %arg6[%c0_11, %c0_12], %25 {strides = array<i32>} : memref<128x16xbf16, #tpu.memory_space<vmem>>, vector<128x16xbf16>,
    return
  }
  func.func @transform_0(%arg0: i32) -> (i32, i32) {
    %c0_i32 = arith.constant 0 : i32
    %c0_i32_0 = arith.constant 0 : i32
    return %arg0, %c0_i32 : i32, i32
  }
  func.func @transform_1(%arg0: i32) -> (i32, i32) {
    %c0_i32 = arith.constant 0 : i32
    %c0_i32_0 = arith.constant 0 : i32
    %c0_i32_1 = arith.constant 0 : i32
    return %c0_i32, %c0_i32_0 : i32, i32
  }
  func.func @transform_2(%arg0: i32) -> (i32, i32) {
    %c0_i32 = arith.constant 0 : i32
    %c0_i32_0 = arith.constant 0 : i32
    %c0_i32_1 = arith.constant 0 : i32
    return %c0_i32, %c0_i32_0 : i32, i32
  }
  func.func @transform_3(%arg0: i32) -> (i32, i32) {
    %c0_i32 = arith.constant 0 : i32
    %c0_i32_0 = arith.constant 0 : i32
    %c0_i32_1 = arith.constant 0 : i32
    return %c0_i32, %c0_i32_0 : i32, i32
  }
  func.func @transform_4(%arg0: i32) -> (i32, i32) {
    %c0_i32 = arith.constant 0 : i32
    %c0_i32_0 = arith.constant 0 : i32
    %c0_i32_1 = arith.constant 0 : i32
    return %c0_i32, %c0_i32_0 : i32, i32
  }
  func.func @transform_5(%arg0: i32) -> (i32, i32) {
    %c0_i32 = arith.constant 0 : i32
    %c0_i32_0 = arith.constant 0 : i32
    return %arg0, %c0_i32 : i32, i32
  }
}

module attributes {stable_mosaic.version = 11 : i64} {
  func.func @_nb1d_kernel(%arg0: i32, %arg1: memref<1x16x64xbf16, #tpu.memory_space<vmem>>, %arg2: memref<3x64x64xbf16, #tpu.memory_space<vmem>>, %arg3: memref<1x64xf32, #tpu.memory_space<vmem>>, %arg4: memref<3x64x64xbf16, #tpu.memory_space<vmem>>, %arg5: memref<1x64xf32, #tpu.memory_space<vmem>>, %arg6: memref<3x64x64xbf16, #tpu.memory_space<vmem>>, %arg7: memref<1x64xf32, #tpu.memory_space<vmem>>, %arg8: memref<3x64x64xbf16, #tpu.memory_space<vmem>>, %arg9: memref<1x64xf32, #tpu.memory_space<vmem>>, %arg10: memref<1x16x64xbf16, #tpu.memory_space<vmem>>) attributes {dimension_semantics = [#tpu.dimension_semantics<parallel>], iteration_bounds = array<i64: 2>, scalar_prefetch = 0 : i64, scratch_operands = 0 : i64, tpu.core_type = #tpu.core_type<tc>, window_params = [{transform_indices = @transform_0, window_bounds = array<i64: 1, 16, 64>}, {pipeline_mode = #tpu.pipeline_mode<synchronous>, transform_indices = @transform_1, window_bounds = array<i64: 3, 64, 64>}, {pipeline_mode = #tpu.pipeline_mode<synchronous>, transform_indices = @transform_2, window_bounds = array<i64: 1, 64>}, {pipeline_mode = #tpu.pipeline_mode<synchronous>, transform_indices = @transform_3, window_bounds = array<i64: 3, 64, 64>}, {pipeline_mode = #tpu.pipeline_mode<synchronous>, transform_indices = @transform_4, window_bounds = array<i64: 1, 64>}, {pipeline_mode = #tpu.pipeline_mode<synchronous>, transform_indices = @transform_5, window_bounds = array<i64: 3, 64, 64>}, {pipeline_mode = #tpu.pipeline_mode<synchronous>, transform_indices = @transform_6, window_bounds = array<i64: 1, 64>}, {pipeline_mode = #tpu.pipeline_mode<synchronous>, transform_indices = @transform_7, window_bounds = array<i64: 3, 64, 64>}, {pipeline_mode = #tpu.pipeline_mode<synchronous>, transform_indices = @transform_8, window_bounds = array<i64: 1, 64>}, {transform_indices = @transform_9, window_bounds = array<i64: 1, 16, 64>}]} {
    %0 = tpu.iota {dimensions = array<i32: 0>} : vector<16x1xi32>
    %c3_i32 = arith.constant 3 : i32
    %1 = vector.broadcast %c3_i32 : i32 to vector<16x1xi32>
    %2 = arith.andi %0, %1 : vector<16x1xi32>
    %c0 = arith.constant 0 : index
    %c0_0 = arith.constant 0 : index
    %c0_1 = arith.constant 0 : index
    %3 = vector.load %arg1[%c0, %c0_0, %c0_1] : memref<1x16x64xbf16, #tpu.memory_space<vmem>>, vector<1x16x64xbf16>
    %4 = vector.shape_cast %3 : vector<1x16x64xbf16> to vector<16x64xbf16>
    %5 = arith.extf %4 : vector<16x64xbf16> to vector<16x64xf32>
    %6 = arith.truncf %5 : vector<16x64xf32> to vector<16x64xbf16>
    %c1 = arith.constant 1 : index
    %c0_2 = arith.constant 0 : index
    %c0_3 = arith.constant 0 : index
    %7 = vector.load %arg2[%c1, %c0_2, %c0_3] : memref<3x64x64xbf16, #tpu.memory_space<vmem>>, vector<1x64x64xbf16>
    %8 = vector.shape_cast %7 : vector<1x64x64xbf16> to vector<64x64xbf16>
    %cst = arith.constant dense<0.000000e+00> : vector<16x64xf32>
    %9 = tpu.matmul %6, %8, %cst {dimension_numbers = #tpu.dot_dimension_numbers<[1], [0], [0], [1], [0, 0, 1, 1], [], []>} : vector<16x64xbf16>, vector<64x64xbf16>, vector<16x64xf32> -> vector<16x64xf32>
    %cst_4 = arith.constant 0.000000e+00 : f32
    %10 = vector.broadcast %cst_4 : f32 to vector<4x64xf32>
    %11 = vector.extract_strided_slice %5 {offsets = [0, 0], sizes = [12, 64], strides = [1, 1]} : vector<16x64xf32> to vector<12x64xf32>
    %12 = tpu.concatenate %10, %11 in 0 : vector<4x64xf32>, vector<12x64xf32> -> vector<16x64xf32>
    %cst_5 = arith.constant 0.000000e+00 : f32
    %13 = vector.broadcast %cst_5 : f32 to vector<4x64xf32>
    %14 = vector.extract_strided_slice %5 {offsets = [4, 0], sizes = [12, 64], strides = [1, 1]} : vector<16x64xf32> to vector<12x64xf32>
    %15 = tpu.concatenate %14, %13 in 0 : vector<12x64xf32>, vector<4x64xf32> -> vector<16x64xf32>
    %16 = arith.truncf %12 : vector<16x64xf32> to vector<16x64xbf16>
    %c0_6 = arith.constant 0 : index
    %c0_7 = arith.constant 0 : index
    %c0_8 = arith.constant 0 : index
    %17 = vector.load %arg2[%c0_6, %c0_7, %c0_8] : memref<3x64x64xbf16, #tpu.memory_space<vmem>>, vector<1x64x64xbf16>
    %18 = vector.shape_cast %17 : vector<1x64x64xbf16> to vector<64x64xbf16>
    %cst_9 = arith.constant dense<0.000000e+00> : vector<16x64xf32>
    %19 = tpu.matmul %16, %18, %cst_9 {dimension_numbers = #tpu.dot_dimension_numbers<[1], [0], [0], [1], [0, 0, 1, 1], [], []>} : vector<16x64xbf16>, vector<64x64xbf16>, vector<16x64xf32> -> vector<16x64xf32>
    %20 = arith.addf %9, %19 : vector<16x64xf32>
    %21 = arith.truncf %15 : vector<16x64xf32> to vector<16x64xbf16>
    %c2 = arith.constant 2 : index
    %c0_10 = arith.constant 0 : index
    %c0_11 = arith.constant 0 : index
    %22 = vector.load %arg2[%c2, %c0_10, %c0_11] : memref<3x64x64xbf16, #tpu.memory_space<vmem>>, vector<1x64x64xbf16>
    %23 = vector.shape_cast %22 : vector<1x64x64xbf16> to vector<64x64xbf16>
    %cst_12 = arith.constant dense<0.000000e+00> : vector<16x64xf32>
    %24 = tpu.matmul %21, %23, %cst_12 {dimension_numbers = #tpu.dot_dimension_numbers<[1], [0], [0], [1], [0, 0, 1, 1], [], []>} : vector<16x64xbf16>, vector<64x64xbf16>, vector<16x64xf32> -> vector<16x64xf32>
    %25 = arith.addf %20, %24 : vector<16x64xf32>
    %c0_13 = arith.constant 0 : index
    %c0_14 = arith.constant 0 : index
    %26 = vector.load %arg3[%c0_13, %c0_14] : memref<1x64xf32, #tpu.memory_space<vmem>>, vector<1x64xf32>
    %27 = vector.broadcast %26 : vector<1x64xf32> to vector<16x64xf32>
    %28 = arith.addf %25, %27 : vector<16x64xf32>
    %cst_15 = arith.constant 0.000000e+00 : f32
    %29 = vector.broadcast %cst_15 : f32 to vector<16x64xf32>
    %30 = arith.maximumf %28, %29 : vector<16x64xf32>
    %31 = arith.truncf %30 : vector<16x64xf32> to vector<16x64xbf16>
    %c1_16 = arith.constant 1 : index
    %c0_17 = arith.constant 0 : index
    %c0_18 = arith.constant 0 : index
    %32 = vector.load %arg4[%c1_16, %c0_17, %c0_18] : memref<3x64x64xbf16, #tpu.memory_space<vmem>>, vector<1x64x64xbf16>
    %33 = vector.shape_cast %32 : vector<1x64x64xbf16> to vector<64x64xbf16>
    %cst_19 = arith.constant dense<0.000000e+00> : vector<16x64xf32>
    %34 = tpu.matmul %31, %33, %cst_19 {dimension_numbers = #tpu.dot_dimension_numbers<[1], [0], [0], [1], [0, 0, 1, 1], [], []>} : vector<16x64xbf16>, vector<64x64xbf16>, vector<16x64xf32> -> vector<16x64xf32>
    %cst_20 = arith.constant 0.000000e+00 : f32
    %35 = vector.broadcast %cst_20 : f32 to vector<1x64xf32>
    %36 = vector.extract_strided_slice %30 {offsets = [0, 0], sizes = [15, 64], strides = [1, 1]} : vector<16x64xf32> to vector<15x64xf32>
    %37 = tpu.concatenate %35, %36 in 0 : vector<1x64xf32>, vector<15x64xf32> -> vector<16x64xf32>
    %cst_21 = arith.constant 0.000000e+00 : f32
    %38 = vector.broadcast %cst_21 : f32 to vector<1x64xf32>
    %39 = vector.extract_strided_slice %30 {offsets = [1, 0], sizes = [15, 64], strides = [1, 1]} : vector<16x64xf32> to vector<15x64xf32>
    %40 = tpu.concatenate %39, %38 in 0 : vector<15x64xf32>, vector<1x64xf32> -> vector<16x64xf32>
    %c1_i32 = arith.constant 1 : i32
    %41 = vector.broadcast %c1_i32 : i32 to vector<16x1xi32>
    %42 = arith.cmpi sge, %2, %41 : vector<16x1xi32>
    %cst_22 = arith.constant 0.000000e+00 : f32
    %43 = vector.shape_cast %42 : vector<16x1xi1> to vector<16x1xi1>
    %44 = vector.broadcast %43 : vector<16x1xi1> to vector<16x64xi1>
    %45 = vector.broadcast %cst_22 : f32 to vector<16x64xf32>
    %46 = arith.select %44, %37, %45 : vector<16x64xi1>, vector<16x64xf32>
    %c3_i32_23 = arith.constant 3 : i32
    %47 = vector.broadcast %c3_i32_23 : i32 to vector<16x1xi32>
    %48 = arith.cmpi slt, %2, %47 : vector<16x1xi32>
    %cst_24 = arith.constant 0.000000e+00 : f32
    %49 = vector.shape_cast %48 : vector<16x1xi1> to vector<16x1xi1>
    %50 = vector.broadcast %49 : vector<16x1xi1> to vector<16x64xi1>
    %51 = vector.broadcast %cst_24 : f32 to vector<16x64xf32>
    %52 = arith.select %50, %40, %51 : vector<16x64xi1>, vector<16x64xf32>
    %53 = arith.truncf %46 : vector<16x64xf32> to vector<16x64xbf16>
    %c0_25 = arith.constant 0 : index
    %c0_26 = arith.constant 0 : index
    %c0_27 = arith.constant 0 : index
    %54 = vector.load %arg4[%c0_25, %c0_26, %c0_27] : memref<3x64x64xbf16, #tpu.memory_space<vmem>>, vector<1x64x64xbf16>
    %55 = vector.shape_cast %54 : vector<1x64x64xbf16> to vector<64x64xbf16>
    %cst_28 = arith.constant dense<0.000000e+00> : vector<16x64xf32>
    %56 = tpu.matmul %53, %55, %cst_28 {dimension_numbers = #tpu.dot_dimension_numbers<[1], [0], [0], [1], [0, 0, 1, 1], [], []>} : vector<16x64xbf16>, vector<64x64xbf16>, vector<16x64xf32> -> vector<16x64xf32>
    %57 = arith.addf %34, %56 : vector<16x64xf32>
    %58 = arith.truncf %52 : vector<16x64xf32> to vector<16x64xbf16>
    %c2_29 = arith.constant 2 : index
    %c0_30 = arith.constant 0 : index
    %c0_31 = arith.constant 0 : index
    %59 = vector.load %arg4[%c2_29, %c0_30, %c0_31] : memref<3x64x64xbf16, #tpu.memory_space<vmem>>, vector<1x64x64xbf16>
    %60 = vector.shape_cast %59 : vector<1x64x64xbf16> to vector<64x64xbf16>
    %cst_32 = arith.constant dense<0.000000e+00> : vector<16x64xf32>
    %61 = tpu.matmul %58, %60, %cst_32 {dimension_numbers = #tpu.dot_dimension_numbers<[1], [0], [0], [1], [0, 0, 1, 1], [], []>} : vector<16x64xbf16>, vector<64x64xbf16>, vector<16x64xf32> -> vector<16x64xf32>
    %62 = arith.addf %57, %61 : vector<16x64xf32>
    %c0_33 = arith.constant 0 : index
    %c0_34 = arith.constant 0 : index
    %63 = vector.load %arg5[%c0_33, %c0_34] : memref<1x64xf32, #tpu.memory_space<vmem>>, vector<1x64xf32>
    %64 = vector.broadcast %63 : vector<1x64xf32> to vector<16x64xf32>
    %65 = arith.addf %62, %64 : vector<16x64xf32>
    %cst_35 = arith.constant 0.000000e+00 : f32
    %66 = vector.broadcast %cst_35 : f32 to vector<16x64xf32>
    %67 = arith.maximumf %65, %66 : vector<16x64xf32>
    %68 = arith.truncf %67 : vector<16x64xf32> to vector<16x64xbf16>
    %c1_36 = arith.constant 1 : index
    %c0_37 = arith.constant 0 : index
    %c0_38 = arith.constant 0 : index
    %69 = vector.load %arg6[%c1_36, %c0_37, %c0_38] : memref<3x64x64xbf16, #tpu.memory_space<vmem>>, vector<1x64x64xbf16>
    %70 = vector.shape_cast %69 : vector<1x64x64xbf16> to vector<64x64xbf16>
    %cst_39 = arith.constant dense<0.000000e+00> : vector<16x64xf32>
    %71 = tpu.matmul %68, %70, %cst_39 {dimension_numbers = #tpu.dot_dimension_numbers<[1], [0], [0], [1], [0, 0, 1, 1], [], []>} : vector<16x64xbf16>, vector<64x64xbf16>, vector<16x64xf32> -> vector<16x64xf32>
    %cst_40 = arith.constant 0.000000e+00 : f32
    %72 = vector.broadcast %cst_40 : f32 to vector<4x64xf32>
    %73 = vector.extract_strided_slice %67 {offsets = [0, 0], sizes = [12, 64], strides = [1, 1]} : vector<16x64xf32> to vector<12x64xf32>
    %74 = tpu.concatenate %72, %73 in 0 : vector<4x64xf32>, vector<12x64xf32> -> vector<16x64xf32>
    %cst_41 = arith.constant 0.000000e+00 : f32
    %75 = vector.broadcast %cst_41 : f32 to vector<4x64xf32>
    %76 = vector.extract_strided_slice %67 {offsets = [4, 0], sizes = [12, 64], strides = [1, 1]} : vector<16x64xf32> to vector<12x64xf32>
    %77 = tpu.concatenate %76, %75 in 0 : vector<12x64xf32>, vector<4x64xf32> -> vector<16x64xf32>
    %78 = arith.truncf %74 : vector<16x64xf32> to vector<16x64xbf16>
    %c0_42 = arith.constant 0 : index
    %c0_43 = arith.constant 0 : index
    %c0_44 = arith.constant 0 : index
    %79 = vector.load %arg6[%c0_42, %c0_43, %c0_44] : memref<3x64x64xbf16, #tpu.memory_space<vmem>>, vector<1x64x64xbf16>
    %80 = vector.shape_cast %79 : vector<1x64x64xbf16> to vector<64x64xbf16>
    %cst_45 = arith.constant dense<0.000000e+00> : vector<16x64xf32>
    %81 = tpu.matmul %78, %80, %cst_45 {dimension_numbers = #tpu.dot_dimension_numbers<[1], [0], [0], [1], [0, 0, 1, 1], [], []>} : vector<16x64xbf16>, vector<64x64xbf16>, vector<16x64xf32> -> vector<16x64xf32>
    %82 = arith.addf %71, %81 : vector<16x64xf32>
    %83 = arith.truncf %77 : vector<16x64xf32> to vector<16x64xbf16>
    %c2_46 = arith.constant 2 : index
    %c0_47 = arith.constant 0 : index
    %c0_48 = arith.constant 0 : index
    %84 = vector.load %arg6[%c2_46, %c0_47, %c0_48] : memref<3x64x64xbf16, #tpu.memory_space<vmem>>, vector<1x64x64xbf16>
    %85 = vector.shape_cast %84 : vector<1x64x64xbf16> to vector<64x64xbf16>
    %cst_49 = arith.constant dense<0.000000e+00> : vector<16x64xf32>
    %86 = tpu.matmul %83, %85, %cst_49 {dimension_numbers = #tpu.dot_dimension_numbers<[1], [0], [0], [1], [0, 0, 1, 1], [], []>} : vector<16x64xbf16>, vector<64x64xbf16>, vector<16x64xf32> -> vector<16x64xf32>
    %87 = arith.addf %82, %86 : vector<16x64xf32>
    %c0_50 = arith.constant 0 : index
    %c0_51 = arith.constant 0 : index
    %88 = vector.load %arg7[%c0_50, %c0_51] : memref<1x64xf32, #tpu.memory_space<vmem>>, vector<1x64xf32>
    %89 = vector.broadcast %88 : vector<1x64xf32> to vector<16x64xf32>
    %90 = arith.addf %87, %89 : vector<16x64xf32>
    %cst_52 = arith.constant 0.000000e+00 : f32
    %91 = vector.broadcast %cst_52 : f32 to vector<16x64xf32>
    %92 = arith.maximumf %90, %91 : vector<16x64xf32>
    %93 = arith.truncf %92 : vector<16x64xf32> to vector<16x64xbf16>
    %c1_53 = arith.constant 1 : index
    %c0_54 = arith.constant 0 : index
    %c0_55 = arith.constant 0 : index
    %94 = vector.load %arg8[%c1_53, %c0_54, %c0_55] : memref<3x64x64xbf16, #tpu.memory_space<vmem>>, vector<1x64x64xbf16>
    %95 = vector.shape_cast %94 : vector<1x64x64xbf16> to vector<64x64xbf16>
    %cst_56 = arith.constant dense<0.000000e+00> : vector<16x64xf32>
    %96 = tpu.matmul %93, %95, %cst_56 {dimension_numbers = #tpu.dot_dimension_numbers<[1], [0], [0], [1], [0, 0, 1, 1], [], []>} : vector<16x64xbf16>, vector<64x64xbf16>, vector<16x64xf32> -> vector<16x64xf32>
    %cst_57 = arith.constant 0.000000e+00 : f32
    %97 = vector.broadcast %cst_57 : f32 to vector<1x64xf32>
    %98 = vector.extract_strided_slice %92 {offsets = [0, 0], sizes = [15, 64], strides = [1, 1]} : vector<16x64xf32> to vector<15x64xf32>
    %99 = tpu.concatenate %97, %98 in 0 : vector<1x64xf32>, vector<15x64xf32> -> vector<16x64xf32>
    %cst_58 = arith.constant 0.000000e+00 : f32
    %100 = vector.broadcast %cst_58 : f32 to vector<1x64xf32>
    %101 = vector.extract_strided_slice %92 {offsets = [1, 0], sizes = [15, 64], strides = [1, 1]} : vector<16x64xf32> to vector<15x64xf32>
    %102 = tpu.concatenate %101, %100 in 0 : vector<15x64xf32>, vector<1x64xf32> -> vector<16x64xf32>
    %c1_i32_59 = arith.constant 1 : i32
    %103 = vector.broadcast %c1_i32_59 : i32 to vector<16x1xi32>
    %104 = arith.cmpi sge, %2, %103 : vector<16x1xi32>
    %cst_60 = arith.constant 0.000000e+00 : f32
    %105 = vector.shape_cast %104 : vector<16x1xi1> to vector<16x1xi1>
    %106 = vector.broadcast %105 : vector<16x1xi1> to vector<16x64xi1>
    %107 = vector.broadcast %cst_60 : f32 to vector<16x64xf32>
    %108 = arith.select %106, %99, %107 : vector<16x64xi1>, vector<16x64xf32>
    %c3_i32_61 = arith.constant 3 : i32
    %109 = vector.broadcast %c3_i32_61 : i32 to vector<16x1xi32>
    %110 = arith.cmpi slt, %2, %109 : vector<16x1xi32>
    %cst_62 = arith.constant 0.000000e+00 : f32
    %111 = vector.shape_cast %110 : vector<16x1xi1> to vector<16x1xi1>
    %112 = vector.broadcast %111 : vector<16x1xi1> to vector<16x64xi1>
    %113 = vector.broadcast %cst_62 : f32 to vector<16x64xf32>
    %114 = arith.select %112, %102, %113 : vector<16x64xi1>, vector<16x64xf32>
    %115 = arith.truncf %108 : vector<16x64xf32> to vector<16x64xbf16>
    %c0_63 = arith.constant 0 : index
    %c0_64 = arith.constant 0 : index
    %c0_65 = arith.constant 0 : index
    %116 = vector.load %arg8[%c0_63, %c0_64, %c0_65] : memref<3x64x64xbf16, #tpu.memory_space<vmem>>, vector<1x64x64xbf16>
    %117 = vector.shape_cast %116 : vector<1x64x64xbf16> to vector<64x64xbf16>
    %cst_66 = arith.constant dense<0.000000e+00> : vector<16x64xf32>
    %118 = tpu.matmul %115, %117, %cst_66 {dimension_numbers = #tpu.dot_dimension_numbers<[1], [0], [0], [1], [0, 0, 1, 1], [], []>} : vector<16x64xbf16>, vector<64x64xbf16>, vector<16x64xf32> -> vector<16x64xf32>
    %119 = arith.addf %96, %118 : vector<16x64xf32>
    %120 = arith.truncf %114 : vector<16x64xf32> to vector<16x64xbf16>
    %c2_67 = arith.constant 2 : index
    %c0_68 = arith.constant 0 : index
    %c0_69 = arith.constant 0 : index
    %121 = vector.load %arg8[%c2_67, %c0_68, %c0_69] : memref<3x64x64xbf16, #tpu.memory_space<vmem>>, vector<1x64x64xbf16>
    %122 = vector.shape_cast %121 : vector<1x64x64xbf16> to vector<64x64xbf16>
    %cst_70 = arith.constant dense<0.000000e+00> : vector<16x64xf32>
    %123 = tpu.matmul %120, %122, %cst_70 {dimension_numbers = #tpu.dot_dimension_numbers<[1], [0], [0], [1], [0, 0, 1, 1], [], []>} : vector<16x64xbf16>, vector<64x64xbf16>, vector<16x64xf32> -> vector<16x64xf32>
    %124 = arith.addf %119, %123 : vector<16x64xf32>
    %c0_71 = arith.constant 0 : index
    %c0_72 = arith.constant 0 : index
    %125 = vector.load %arg9[%c0_71, %c0_72] : memref<1x64xf32, #tpu.memory_space<vmem>>, vector<1x64xf32>
    %126 = vector.broadcast %125 : vector<1x64xf32> to vector<16x64xf32>
    %127 = arith.addf %124, %126 : vector<16x64xf32>
    %128 = arith.addf %127, %5 : vector<16x64xf32>
    %cst_73 = arith.constant 0.000000e+00 : f32
    %129 = vector.broadcast %cst_73 : f32 to vector<16x64xf32>
    %130 = arith.maximumf %128, %129 : vector<16x64xf32>
    %131 = arith.truncf %130 : vector<16x64xf32> to vector<16x64xbf16>
    %c0_74 = arith.constant 0 : index
    %c0_75 = arith.constant 0 : index
    %c0_76 = arith.constant 0 : index
    %132 = vector.load %arg10[%c0_74, %c0_75, %c0_76] : memref<1x16x64xbf16, #tpu.memory_space<vmem>>, vector<1x16x64xbf16>
    %133 = vector.shape_cast %132 : vector<1x16x64xbf16> to vector<16x64xbf16>
    %134 = vector.shape_cast %131 : vector<16x64xbf16> to vector<1x16x64xbf16>
    tpu.vector_store %arg10[%c0_74, %c0_75, %c0_76], %134 {strides = array<i32>} : memref<1x16x64xbf16, #tpu.memory_space<vmem>>, vector<1x16x64xbf16>,
    return
  }
  func.func @transform_0(%arg0: i32) -> (i32, i32, i32) {
    %c0_i32 = arith.constant 0 : i32
    %c0_i32_0 = arith.constant 0 : i32
    %c0_i32_1 = arith.constant 0 : i32
    return %arg0, %c0_i32, %c0_i32_0 : i32, i32, i32
  }
  func.func @transform_1(%arg0: i32) -> (i32, i32, i32) {
    %c0_i32 = arith.constant 0 : i32
    %c0_i32_0 = arith.constant 0 : i32
    %c0_i32_1 = arith.constant 0 : i32
    %c0_i32_2 = arith.constant 0 : i32
    return %c0_i32, %c0_i32_0, %c0_i32_1 : i32, i32, i32
  }
  func.func @transform_2(%arg0: i32) -> (i32, i32) {
    %c0_i32 = arith.constant 0 : i32
    %c0_i32_0 = arith.constant 0 : i32
    %c0_i32_1 = arith.constant 0 : i32
    return %c0_i32, %c0_i32_0 : i32, i32
  }
  func.func @transform_3(%arg0: i32) -> (i32, i32, i32) {
    %c0_i32 = arith.constant 0 : i32
    %c0_i32_0 = arith.constant 0 : i32
    %c0_i32_1 = arith.constant 0 : i32
    %c0_i32_2 = arith.constant 0 : i32
    return %c0_i32, %c0_i32_0, %c0_i32_1 : i32, i32, i32
  }
  func.func @transform_4(%arg0: i32) -> (i32, i32) {
    %c0_i32 = arith.constant 0 : i32
    %c0_i32_0 = arith.constant 0 : i32
    %c0_i32_1 = arith.constant 0 : i32
    return %c0_i32, %c0_i32_0 : i32, i32
  }
  func.func @transform_5(%arg0: i32) -> (i32, i32, i32) {
    %c0_i32 = arith.constant 0 : i32
    %c0_i32_0 = arith.constant 0 : i32
    %c0_i32_1 = arith.constant 0 : i32
    %c0_i32_2 = arith.constant 0 : i32
    return %c0_i32, %c0_i32_0, %c0_i32_1 : i32, i32, i32
  }
  func.func @transform_6(%arg0: i32) -> (i32, i32) {
    %c0_i32 = arith.constant 0 : i32
    %c0_i32_0 = arith.constant 0 : i32
    %c0_i32_1 = arith.constant 0 : i32
    return %c0_i32, %c0_i32_0 : i32, i32
  }
  func.func @transform_7(%arg0: i32) -> (i32, i32, i32) {
    %c0_i32 = arith.constant 0 : i32
    %c0_i32_0 = arith.constant 0 : i32
    %c0_i32_1 = arith.constant 0 : i32
    %c0_i32_2 = arith.constant 0 : i32
    return %c0_i32, %c0_i32_0, %c0_i32_1 : i32, i32, i32
  }
  func.func @transform_8(%arg0: i32) -> (i32, i32) {
    %c0_i32 = arith.constant 0 : i32
    %c0_i32_0 = arith.constant 0 : i32
    %c0_i32_1 = arith.constant 0 : i32
    return %c0_i32, %c0_i32_0 : i32, i32
  }
  func.func @transform_9(%arg0: i32) -> (i32, i32, i32) {
    %c0_i32 = arith.constant 0 : i32
    %c0_i32_0 = arith.constant 0 : i32
    %c0_i32_1 = arith.constant 0 : i32
    return %arg0, %c0_i32, %c0_i32_0 : i32, i32, i32
  }
}

module attributes {stable_mosaic.version = 11 : i64} {
  func.func @_downsampler_kernel(%arg0: i32, %arg1: memref<32x144xbf16, #tpu.memory_space<vmem>>, %arg2: memref<144x48xbf16, #tpu.memory_space<vmem>>, %arg3: memref<1x48xf32, #tpu.memory_space<vmem>>, %arg4: memref<1x16xf32, #tpu.memory_space<vmem>>, %arg5: memref<1x16xf32, #tpu.memory_space<vmem>>, %arg6: memref<32x64xbf16, #tpu.memory_space<vmem>>) attributes {dimension_semantics = [#tpu.dimension_semantics<parallel>], iteration_bounds = array<i64: 1>, scalar_prefetch = 0 : i64, scratch_operands = 0 : i64, tpu.core_type = #tpu.core_type<tc>, window_params = [{transform_indices = @transform_0, window_bounds = array<i64: 32, 144>}, {pipeline_mode = #tpu.pipeline_mode<synchronous>, transform_indices = @transform_1, window_bounds = array<i64: 144, 48>}, {pipeline_mode = #tpu.pipeline_mode<synchronous>, transform_indices = @transform_2, window_bounds = array<i64: 1, 48>}, {pipeline_mode = #tpu.pipeline_mode<synchronous>, transform_indices = @transform_3, window_bounds = array<i64: 1, 16>}, {pipeline_mode = #tpu.pipeline_mode<synchronous>, transform_indices = @transform_4, window_bounds = array<i64: 1, 16>}, {transform_indices = @transform_5, window_bounds = array<i64: 32, 64>}]} {
    %c0 = arith.constant 0 : index
    %c0_0 = arith.constant 0 : index
    %0 = vector.load %arg1[%c0, %c0_0] : memref<32x144xbf16, #tpu.memory_space<vmem>>, vector<32x144xbf16>
    %c0_1 = arith.constant 0 : index
    %c0_2 = arith.constant 0 : index
    %1 = vector.load %arg2[%c0_1, %c0_2] : memref<144x48xbf16, #tpu.memory_space<vmem>>, vector<144x48xbf16>
    %cst = arith.constant dense<0.000000e+00> : vector<32x48xf32>
    %2 = tpu.matmul %0, %1, %cst {dimension_numbers = #tpu.dot_dimension_numbers<[1], [0], [0], [1], [0, 0, 1, 1], [], []>} : vector<32x144xbf16>, vector<144x48xbf16>, vector<32x48xf32> -> vector<32x48xf32>
    %c0_3 = arith.constant 0 : index
    %c0_4 = arith.constant 0 : index
    %3 = vector.load %arg3[%c0_3, %c0_4] : memref<1x48xf32, #tpu.memory_space<vmem>>, vector<1x48xf32>
    %4 = vector.broadcast %3 : vector<1x48xf32> to vector<32x48xf32>
    %5 = arith.addf %2, %4 : vector<32x48xf32>
    %cst_5 = arith.constant 0.000000e+00 : f32
    %6 = vector.broadcast %cst_5 : f32 to vector<32x48xf32>
    %7 = arith.maximumf %5, %6 : vector<32x48xf32>
    %8 = vector.extract_strided_slice %0 {offsets = [0, 64], sizes = [32, 16], strides = [1, 1]} : vector<32x144xbf16> to vector<32x16xbf16>
    %9 = vector.extract_strided_slice %0 {offsets = [0, 80], sizes = [32, 16], strides = [1, 1]} : vector<32x144xbf16> to vector<32x16xbf16>
    %10 = arith.maximumf %8, %9 : vector<32x16xbf16>
    %11 = vector.extract_strided_slice %0 {offsets = [0, 112], sizes = [32, 16], strides = [1, 1]} : vector<32x144xbf16> to vector<32x16xbf16>
    %12 = vector.extract_strided_slice %0 {offsets = [0, 128], sizes = [32, 16], strides = [1, 1]} : vector<32x144xbf16> to vector<32x16xbf16>
    %13 = arith.maximumf %11, %12 : vector<32x16xbf16>
    %14 = arith.maximumf %10, %13 : vector<32x16xbf16>
    %15 = arith.extf %14 : vector<32x16xbf16> to vector<32x16xf32>
    %c0_6 = arith.constant 0 : index
    %c0_7 = arith.constant 0 : index
    %16 = vector.load %arg4[%c0_6, %c0_7] : memref<1x16xf32, #tpu.memory_space<vmem>>, vector<1x16xf32>
    %17 = vector.broadcast %16 : vector<1x16xf32> to vector<32x16xf32>
    %18 = arith.mulf %15, %17 : vector<32x16xf32>
    %c0_8 = arith.constant 0 : index
    %c0_9 = arith.constant 0 : index
    %19 = vector.load %arg5[%c0_8, %c0_9] : memref<1x16xf32, #tpu.memory_space<vmem>>, vector<1x16xf32>
    %20 = vector.broadcast %19 : vector<1x16xf32> to vector<32x16xf32>
    %21 = arith.addf %18, %20 : vector<32x16xf32>
    %cst_10 = arith.constant 0.000000e+00 : f32
    %22 = vector.broadcast %cst_10 : f32 to vector<32x16xf32>
    %23 = arith.maximumf %21, %22 : vector<32x16xf32>
    %24 = tpu.concatenate %7, %23 in 1 : vector<32x48xf32>, vector<32x16xf32> -> vector<32x64xf32>
    %25 = arith.truncf %24 : vector<32x64xf32> to vector<32x64xbf16>
    %c0_11 = arith.constant 0 : index
    %c0_12 = arith.constant 0 : index
    %26 = vector.load %arg6[%c0_11, %c0_12] : memref<32x64xbf16, #tpu.memory_space<vmem>>, vector<32x64xbf16>
    tpu.vector_store %arg6[%c0_11, %c0_12], %25 {strides = array<i32>} : memref<32x64xbf16, #tpu.memory_space<vmem>>, vector<32x64xbf16>,
    return
  }
  func.func @transform_0(%arg0: i32) -> (i32, i32) {
    %c0_i32 = arith.constant 0 : i32
    %c0_i32_0 = arith.constant 0 : i32
    return %arg0, %c0_i32 : i32, i32
  }
  func.func @transform_1(%arg0: i32) -> (i32, i32) {
    %c0_i32 = arith.constant 0 : i32
    %c0_i32_0 = arith.constant 0 : i32
    %c0_i32_1 = arith.constant 0 : i32
    return %c0_i32, %c0_i32_0 : i32, i32
  }
  func.func @transform_2(%arg0: i32) -> (i32, i32) {
    %c0_i32 = arith.constant 0 : i32
    %c0_i32_0 = arith.constant 0 : i32
    %c0_i32_1 = arith.constant 0 : i32
    return %c0_i32, %c0_i32_0 : i32, i32
  }
  func.func @transform_3(%arg0: i32) -> (i32, i32) {
    %c0_i32 = arith.constant 0 : i32
    %c0_i32_0 = arith.constant 0 : i32
    %c0_i32_1 = arith.constant 0 : i32
    return %c0_i32, %c0_i32_0 : i32, i32
  }
  func.func @transform_4(%arg0: i32) -> (i32, i32) {
    %c0_i32 = arith.constant 0 : i32
    %c0_i32_0 = arith.constant 0 : i32
    %c0_i32_1 = arith.constant 0 : i32
    return %c0_i32, %c0_i32_0 : i32, i32
  }
  func.func @transform_5(%arg0: i32) -> (i32, i32) {
    %c0_i32 = arith.constant 0 : i32
    %c0_i32_0 = arith.constant 0 : i32
    return %arg0, %c0_i32 : i32, i32
  }
}

module attributes {stable_mosaic.version = 11 : i64} {
  func.func @_downsampler_kernel(%arg0: i32, %arg1: memref<8x576xbf16, #tpu.memory_space<vmem>>, %arg2: memref<576x64xbf16, #tpu.memory_space<vmem>>, %arg3: memref<1x64xf32, #tpu.memory_space<vmem>>, %arg4: memref<1x64xf32, #tpu.memory_space<vmem>>, %arg5: memref<1x64xf32, #tpu.memory_space<vmem>>, %arg6: memref<8x128xbf16, #tpu.memory_space<vmem>>) attributes {dimension_semantics = [#tpu.dimension_semantics<parallel>], iteration_bounds = array<i64: 1>, scalar_prefetch = 0 : i64, scratch_operands = 0 : i64, tpu.core_type = #tpu.core_type<tc>, window_params = [{transform_indices = @transform_0, window_bounds = array<i64: 8, 576>}, {pipeline_mode = #tpu.pipeline_mode<synchronous>, transform_indices = @transform_1, window_bounds = array<i64: 576, 64>}, {pipeline_mode = #tpu.pipeline_mode<synchronous>, transform_indices = @transform_2, window_bounds = array<i64: 1, 64>}, {pipeline_mode = #tpu.pipeline_mode<synchronous>, transform_indices = @transform_3, window_bounds = array<i64: 1, 64>}, {pipeline_mode = #tpu.pipeline_mode<synchronous>, transform_indices = @transform_4, window_bounds = array<i64: 1, 64>}, {transform_indices = @transform_5, window_bounds = array<i64: 8, 128>}]} {
    %c0 = arith.constant 0 : index
    %c0_0 = arith.constant 0 : index
    %0 = vector.load %arg1[%c0, %c0_0] : memref<8x576xbf16, #tpu.memory_space<vmem>>, vector<8x576xbf16>
    %c0_1 = arith.constant 0 : index
    %c0_2 = arith.constant 0 : index
    %1 = vector.load %arg2[%c0_1, %c0_2] : memref<576x64xbf16, #tpu.memory_space<vmem>>, vector<576x64xbf16>
    %cst = arith.constant dense<0.000000e+00> : vector<8x64xf32>
    %2 = tpu.matmul %0, %1, %cst {dimension_numbers = #tpu.dot_dimension_numbers<[1], [0], [0], [1], [0, 0, 1, 1], [], []>} : vector<8x576xbf16>, vector<576x64xbf16>, vector<8x64xf32> -> vector<8x64xf32>
    %c0_3 = arith.constant 0 : index
    %c0_4 = arith.constant 0 : index
    %3 = vector.load %arg3[%c0_3, %c0_4] : memref<1x64xf32, #tpu.memory_space<vmem>>, vector<1x64xf32>
    %4 = vector.broadcast %3 : vector<1x64xf32> to vector<8x64xf32>
    %5 = arith.addf %2, %4 : vector<8x64xf32>
    %cst_5 = arith.constant 0.000000e+00 : f32
    %6 = vector.broadcast %cst_5 : f32 to vector<8x64xf32>
    %7 = arith.maximumf %5, %6 : vector<8x64xf32>
    %8 = vector.extract_strided_slice %0 {offsets = [0, 256], sizes = [8, 64], strides = [1, 1]} : vector<8x576xbf16> to vector<8x64xbf16>
    %9 = vector.extract_strided_slice %0 {offsets = [0, 320], sizes = [8, 64], strides = [1, 1]} : vector<8x576xbf16> to vector<8x64xbf16>
    %10 = arith.maximumf %8, %9 : vector<8x64xbf16>
    %11 = vector.extract_strided_slice %0 {offsets = [0, 448], sizes = [8, 64], strides = [1, 1]} : vector<8x576xbf16> to vector<8x64xbf16>
    %12 = vector.extract_strided_slice %0 {offsets = [0, 512], sizes = [8, 64], strides = [1, 1]} : vector<8x576xbf16> to vector<8x64xbf16>
    %13 = arith.maximumf %11, %12 : vector<8x64xbf16>
    %14 = arith.maximumf %10, %13 : vector<8x64xbf16>
    %15 = arith.extf %14 : vector<8x64xbf16> to vector<8x64xf32>
    %c0_6 = arith.constant 0 : index
    %c0_7 = arith.constant 0 : index
    %16 = vector.load %arg4[%c0_6, %c0_7] : memref<1x64xf32, #tpu.memory_space<vmem>>, vector<1x64xf32>
    %17 = vector.broadcast %16 : vector<1x64xf32> to vector<8x64xf32>
    %18 = arith.mulf %15, %17 : vector<8x64xf32>
    %c0_8 = arith.constant 0 : index
    %c0_9 = arith.constant 0 : index
    %19 = vector.load %arg5[%c0_8, %c0_9] : memref<1x64xf32, #tpu.memory_space<vmem>>, vector<1x64xf32>
    %20 = vector.broadcast %19 : vector<1x64xf32> to vector<8x64xf32>
    %21 = arith.addf %18, %20 : vector<8x64xf32>
    %cst_10 = arith.constant 0.000000e+00 : f32
    %22 = vector.broadcast %cst_10 : f32 to vector<8x64xf32>
    %23 = arith.maximumf %21, %22 : vector<8x64xf32>
    %24 = tpu.concatenate %7, %23 in 1 : vector<8x64xf32>, vector<8x64xf32> -> vector<8x128xf32>
    %25 = arith.truncf %24 : vector<8x128xf32> to vector<8x128xbf16>
    %c0_11 = arith.constant 0 : index
    %c0_12 = arith.constant 0 : index
    %26 = vector.load %arg6[%c0_11, %c0_12] : memref<8x128xbf16, #tpu.memory_space<vmem>>, vector<8x128xbf16>
    tpu.vector_store %arg6[%c0_11, %c0_12], %25 {strides = array<i32>} : memref<8x128xbf16, #tpu.memory_space<vmem>>, vector<8x128xbf16>,
    return
  }
  func.func @transform_0(%arg0: i32) -> (i32, i32) {
    %c0_i32 = arith.constant 0 : i32
    %c0_i32_0 = arith.constant 0 : i32
    return %arg0, %c0_i32 : i32, i32
  }
  func.func @transform_1(%arg0: i32) -> (i32, i32) {
    %c0_i32 = arith.constant 0 : i32
    %c0_i32_0 = arith.constant 0 : i32
    %c0_i32_1 = arith.constant 0 : i32
    return %c0_i32, %c0_i32_0 : i32, i32
  }
  func.func @transform_2(%arg0: i32) -> (i32, i32) {
    %c0_i32 = arith.constant 0 : i32
    %c0_i32_0 = arith.constant 0 : i32
    %c0_i32_1 = arith.constant 0 : i32
    return %c0_i32, %c0_i32_0 : i32, i32
  }
  func.func @transform_3(%arg0: i32) -> (i32, i32) {
    %c0_i32 = arith.constant 0 : i32
    %c0_i32_0 = arith.constant 0 : i32
    %c0_i32_1 = arith.constant 0 : i32
    return %c0_i32, %c0_i32_0 : i32, i32
  }
  func.func @transform_4(%arg0: i32) -> (i32, i32) {
    %c0_i32 = arith.constant 0 : i32
    %c0_i32_0 = arith.constant 0 : i32
    %c0_i32_1 = arith.constant 0 : i32
    return %c0_i32, %c0_i32_0 : i32, i32
  }
  func.func @transform_5(%arg0: i32) -> (i32, i32) {
    %c0_i32 = arith.constant 0 : i32
    %c0_i32_0 = arith.constant 0 : i32
    return %arg0, %c0_i32 : i32, i32
  }
}

module attributes {stable_mosaic.version = 11 : i64} {
  func.func @_nb1d_kernel(%arg0: i32, %arg1: memref<1x4x128xbf16, #tpu.memory_space<vmem>>, %arg2: memref<3x128x128xbf16, #tpu.memory_space<vmem>>, %arg3: memref<1x128xf32, #tpu.memory_space<vmem>>, %arg4: memref<3x128x128xbf16, #tpu.memory_space<vmem>>, %arg5: memref<1x128xf32, #tpu.memory_space<vmem>>, %arg6: memref<3x128x128xbf16, #tpu.memory_space<vmem>>, %arg7: memref<1x128xf32, #tpu.memory_space<vmem>>, %arg8: memref<3x128x128xbf16, #tpu.memory_space<vmem>>, %arg9: memref<1x128xf32, #tpu.memory_space<vmem>>, %arg10: memref<1x4x128xbf16, #tpu.memory_space<vmem>>) attributes {dimension_semantics = [#tpu.dimension_semantics<parallel>], iteration_bounds = array<i64: 2>, scalar_prefetch = 0 : i64, scratch_operands = 0 : i64, tpu.core_type = #tpu.core_type<tc>, window_params = [{transform_indices = @transform_0, window_bounds = array<i64: 1, 4, 128>}, {pipeline_mode = #tpu.pipeline_mode<synchronous>, transform_indices = @transform_1, window_bounds = array<i64: 3, 128, 128>}, {pipeline_mode = #tpu.pipeline_mode<synchronous>, transform_indices = @transform_2, window_bounds = array<i64: 1, 128>}, {pipeline_mode = #tpu.pipeline_mode<synchronous>, transform_indices = @transform_3, window_bounds = array<i64: 3, 128, 128>}, {pipeline_mode = #tpu.pipeline_mode<synchronous>, transform_indices = @transform_4, window_bounds = array<i64: 1, 128>}, {pipeline_mode = #tpu.pipeline_mode<synchronous>, transform_indices = @transform_5, window_bounds = array<i64: 3, 128, 128>}, {pipeline_mode = #tpu.pipeline_mode<synchronous>, transform_indices = @transform_6, window_bounds = array<i64: 1, 128>}, {pipeline_mode = #tpu.pipeline_mode<synchronous>, transform_indices = @transform_7, window_bounds = array<i64: 3, 128, 128>}, {pipeline_mode = #tpu.pipeline_mode<synchronous>, transform_indices = @transform_8, window_bounds = array<i64: 1, 128>}, {transform_indices = @transform_9, window_bounds = array<i64: 1, 4, 128>}]} {
    %0 = tpu.iota {dimensions = array<i32: 0>} : vector<4x1xi32>
    %c1_i32 = arith.constant 1 : i32
    %1 = vector.broadcast %c1_i32 : i32 to vector<4x1xi32>
    %2 = arith.andi %0, %1 : vector<4x1xi32>
    %c0 = arith.constant 0 : index
    %c0_0 = arith.constant 0 : index
    %c0_1 = arith.constant 0 : index
    %3 = vector.load %arg1[%c0, %c0_0, %c0_1] : memref<1x4x128xbf16, #tpu.memory_space<vmem>>, vector<1x4x128xbf16>
    %4 = vector.shape_cast %3 : vector<1x4x128xbf16> to vector<4x128xbf16>
    %5 = arith.extf %4 : vector<4x128xbf16> to vector<4x128xf32>
    %6 = arith.truncf %5 : vector<4x128xf32> to vector<4x128xbf16>
    %c1 = arith.constant 1 : index
    %c0_2 = arith.constant 0 : index
    %c0_3 = arith.constant 0 : index
    %7 = vector.load %arg2[%c1, %c0_2, %c0_3] : memref<3x128x128xbf16, #tpu.memory_space<vmem>>, vector<1x128x128xbf16>
    %8 = vector.shape_cast %7 : vector<1x128x128xbf16> to vector<128x128xbf16>
    %cst = arith.constant dense<0.000000e+00> : vector<4x128xf32>
    %9 = tpu.matmul %6, %8, %cst {dimension_numbers = #tpu.dot_dimension_numbers<[1], [0], [0], [1], [0, 0, 1, 1], [], []>} : vector<4x128xbf16>, vector<128x128xbf16>, vector<4x128xf32> -> vector<4x128xf32>
    %cst_4 = arith.constant 0.000000e+00 : f32
    %10 = vector.broadcast %cst_4 : f32 to vector<2x128xf32>
    %11 = vector.extract_strided_slice %5 {offsets = [0, 0], sizes = [2, 128], strides = [1, 1]} : vector<4x128xf32> to vector<2x128xf32>
    %12 = tpu.concatenate %10, %11 in 0 : vector<2x128xf32>, vector<2x128xf32> -> vector<4x128xf32>
    %cst_5 = arith.constant 0.000000e+00 : f32
    %13 = vector.broadcast %cst_5 : f32 to vector<2x128xf32>
    %14 = vector.extract_strided_slice %5 {offsets = [2, 0], sizes = [2, 128], strides = [1, 1]} : vector<4x128xf32> to vector<2x128xf32>
    %15 = tpu.concatenate %14, %13 in 0 : vector<2x128xf32>, vector<2x128xf32> -> vector<4x128xf32>
    %16 = arith.truncf %12 : vector<4x128xf32> to vector<4x128xbf16>
    %c0_6 = arith.constant 0 : index
    %c0_7 = arith.constant 0 : index
    %c0_8 = arith.constant 0 : index
    %17 = vector.load %arg2[%c0_6, %c0_7, %c0_8] : memref<3x128x128xbf16, #tpu.memory_space<vmem>>, vector<1x128x128xbf16>
    %18 = vector.shape_cast %17 : vector<1x128x128xbf16> to vector<128x128xbf16>
    %cst_9 = arith.constant dense<0.000000e+00> : vector<4x128xf32>
    %19 = tpu.matmul %16, %18, %cst_9 {dimension_numbers = #tpu.dot_dimension_numbers<[1], [0], [0], [1], [0, 0, 1, 1], [], []>} : vector<4x128xbf16>, vector<128x128xbf16>, vector<4x128xf32> -> vector<4x128xf32>
    %20 = arith.addf %9, %19 : vector<4x128xf32>
    %21 = arith.truncf %15 : vector<4x128xf32> to vector<4x128xbf16>
    %c2 = arith.constant 2 : index
    %c0_10 = arith.constant 0 : index
    %c0_11 = arith.constant 0 : index
    %22 = vector.load %arg2[%c2, %c0_10, %c0_11] : memref<3x128x128xbf16, #tpu.memory_space<vmem>>, vector<1x128x128xbf16>
    %23 = vector.shape_cast %22 : vector<1x128x128xbf16> to vector<128x128xbf16>
    %cst_12 = arith.constant dense<0.000000e+00> : vector<4x128xf32>
    %24 = tpu.matmul %21, %23, %cst_12 {dimension_numbers = #tpu.dot_dimension_numbers<[1], [0], [0], [1], [0, 0, 1, 1], [], []>} : vector<4x128xbf16>, vector<128x128xbf16>, vector<4x128xf32> -> vector<4x128xf32>
    %25 = arith.addf %20, %24 : vector<4x128xf32>
    %c0_13 = arith.constant 0 : index
    %c0_14 = arith.constant 0 : index
    %26 = vector.load %arg3[%c0_13, %c0_14] : memref<1x128xf32, #tpu.memory_space<vmem>>, vector<1x128xf32>
    %27 = vector.broadcast %26 : vector<1x128xf32> to vector<4x128xf32>
    %28 = arith.addf %25, %27 : vector<4x128xf32>
    %cst_15 = arith.constant 0.000000e+00 : f32
    %29 = vector.broadcast %cst_15 : f32 to vector<4x128xf32>
    %30 = arith.maximumf %28, %29 : vector<4x128xf32>
    %31 = arith.truncf %30 : vector<4x128xf32> to vector<4x128xbf16>
    %c1_16 = arith.constant 1 : index
    %c0_17 = arith.constant 0 : index
    %c0_18 = arith.constant 0 : index
    %32 = vector.load %arg4[%c1_16, %c0_17, %c0_18] : memref<3x128x128xbf16, #tpu.memory_space<vmem>>, vector<1x128x128xbf16>
    %33 = vector.shape_cast %32 : vector<1x128x128xbf16> to vector<128x128xbf16>
    %cst_19 = arith.constant dense<0.000000e+00> : vector<4x128xf32>
    %34 = tpu.matmul %31, %33, %cst_19 {dimension_numbers = #tpu.dot_dimension_numbers<[1], [0], [0], [1], [0, 0, 1, 1], [], []>} : vector<4x128xbf16>, vector<128x128xbf16>, vector<4x128xf32> -> vector<4x128xf32>
    %cst_20 = arith.constant 0.000000e+00 : f32
    %35 = vector.broadcast %cst_20 : f32 to vector<1x128xf32>
    %36 = vector.extract_strided_slice %30 {offsets = [0, 0], sizes = [3, 128], strides = [1, 1]} : vector<4x128xf32> to vector<3x128xf32>
    %37 = tpu.concatenate %35, %36 in 0 : vector<1x128xf32>, vector<3x128xf32> -> vector<4x128xf32>
    %cst_21 = arith.constant 0.000000e+00 : f32
    %38 = vector.broadcast %cst_21 : f32 to vector<1x128xf32>
    %39 = vector.extract_strided_slice %30 {offsets = [1, 0], sizes = [3, 128], strides = [1, 1]} : vector<4x128xf32> to vector<3x128xf32>
    %40 = tpu.concatenate %39, %38 in 0 : vector<3x128xf32>, vector<1x128xf32> -> vector<4x128xf32>
    %c1_i32_22 = arith.constant 1 : i32
    %41 = vector.broadcast %c1_i32_22 : i32 to vector<4x1xi32>
    %42 = arith.cmpi sge, %2, %41 : vector<4x1xi32>
    %cst_23 = arith.constant 0.000000e+00 : f32
    %43 = vector.shape_cast %42 : vector<4x1xi1> to vector<4x1xi1>
    %44 = vector.broadcast %43 : vector<4x1xi1> to vector<4x128xi1>
    %45 = vector.broadcast %cst_23 : f32 to vector<4x128xf32>
    %46 = arith.select %44, %37, %45 : vector<4x128xi1>, vector<4x128xf32>
    %c1_i32_24 = arith.constant 1 : i32
    %47 = vector.broadcast %c1_i32_24 : i32 to vector<4x1xi32>
    %48 = arith.cmpi slt, %2, %47 : vector<4x1xi32>
    %cst_25 = arith.constant 0.000000e+00 : f32
    %49 = vector.shape_cast %48 : vector<4x1xi1> to vector<4x1xi1>
    %50 = vector.broadcast %49 : vector<4x1xi1> to vector<4x128xi1>
    %51 = vector.broadcast %cst_25 : f32 to vector<4x128xf32>
    %52 = arith.select %50, %40, %51 : vector<4x128xi1>, vector<4x128xf32>
    %53 = arith.truncf %46 : vector<4x128xf32> to vector<4x128xbf16>
    %c0_26 = arith.constant 0 : index
    %c0_27 = arith.constant 0 : index
    %c0_28 = arith.constant 0 : index
    %54 = vector.load %arg4[%c0_26, %c0_27, %c0_28] : memref<3x128x128xbf16, #tpu.memory_space<vmem>>, vector<1x128x128xbf16>
    %55 = vector.shape_cast %54 : vector<1x128x128xbf16> to vector<128x128xbf16>
    %cst_29 = arith.constant dense<0.000000e+00> : vector<4x128xf32>
    %56 = tpu.matmul %53, %55, %cst_29 {dimension_numbers = #tpu.dot_dimension_numbers<[1], [0], [0], [1], [0, 0, 1, 1], [], []>} : vector<4x128xbf16>, vector<128x128xbf16>, vector<4x128xf32> -> vector<4x128xf32>
    %57 = arith.addf %34, %56 : vector<4x128xf32>
    %58 = arith.truncf %52 : vector<4x128xf32> to vector<4x128xbf16>
    %c2_30 = arith.constant 2 : index
    %c0_31 = arith.constant 0 : index
    %c0_32 = arith.constant 0 : index
    %59 = vector.load %arg4[%c2_30, %c0_31, %c0_32] : memref<3x128x128xbf16, #tpu.memory_space<vmem>>, vector<1x128x128xbf16>
    %60 = vector.shape_cast %59 : vector<1x128x128xbf16> to vector<128x128xbf16>
    %cst_33 = arith.constant dense<0.000000e+00> : vector<4x128xf32>
    %61 = tpu.matmul %58, %60, %cst_33 {dimension_numbers = #tpu.dot_dimension_numbers<[1], [0], [0], [1], [0, 0, 1, 1], [], []>} : vector<4x128xbf16>, vector<128x128xbf16>, vector<4x128xf32> -> vector<4x128xf32>
    %62 = arith.addf %57, %61 : vector<4x128xf32>
    %c0_34 = arith.constant 0 : index
    %c0_35 = arith.constant 0 : index
    %63 = vector.load %arg5[%c0_34, %c0_35] : memref<1x128xf32, #tpu.memory_space<vmem>>, vector<1x128xf32>
    %64 = vector.broadcast %63 : vector<1x128xf32> to vector<4x128xf32>
    %65 = arith.addf %62, %64 : vector<4x128xf32>
    %cst_36 = arith.constant 0.000000e+00 : f32
    %66 = vector.broadcast %cst_36 : f32 to vector<4x128xf32>
    %67 = arith.maximumf %65, %66 : vector<4x128xf32>
    %68 = arith.truncf %67 : vector<4x128xf32> to vector<4x128xbf16>
    %c1_37 = arith.constant 1 : index
    %c0_38 = arith.constant 0 : index
    %c0_39 = arith.constant 0 : index
    %69 = vector.load %arg6[%c1_37, %c0_38, %c0_39] : memref<3x128x128xbf16, #tpu.memory_space<vmem>>, vector<1x128x128xbf16>
    %70 = vector.shape_cast %69 : vector<1x128x128xbf16> to vector<128x128xbf16>
    %cst_40 = arith.constant dense<0.000000e+00> : vector<4x128xf32>
    %71 = tpu.matmul %68, %70, %cst_40 {dimension_numbers = #tpu.dot_dimension_numbers<[1], [0], [0], [1], [0, 0, 1, 1], [], []>} : vector<4x128xbf16>, vector<128x128xbf16>, vector<4x128xf32> -> vector<4x128xf32>
    %c0_41 = arith.constant 0 : index
    %c0_42 = arith.constant 0 : index
    %72 = vector.load %arg7[%c0_41, %c0_42] : memref<1x128xf32, #tpu.memory_space<vmem>>, vector<1x128xf32>
    %73 = vector.broadcast %72 : vector<1x128xf32> to vector<4x128xf32>
    %74 = arith.addf %71, %73 : vector<4x128xf32>
    %cst_43 = arith.constant 0.000000e+00 : f32
    %75 = vector.broadcast %cst_43 : f32 to vector<4x128xf32>
    %76 = arith.maximumf %74, %75 : vector<4x128xf32>
    %77 = arith.truncf %76 : vector<4x128xf32> to vector<4x128xbf16>
    %c1_44 = arith.constant 1 : index
    %c0_45 = arith.constant 0 : index
    %c0_46 = arith.constant 0 : index
    %78 = vector.load %arg8[%c1_44, %c0_45, %c0_46] : memref<3x128x128xbf16, #tpu.memory_space<vmem>>, vector<1x128x128xbf16>
    %79 = vector.shape_cast %78 : vector<1x128x128xbf16> to vector<128x128xbf16>
    %cst_47 = arith.constant dense<0.000000e+00> : vector<4x128xf32>
    %80 = tpu.matmul %77, %79, %cst_47 {dimension_numbers = #tpu.dot_dimension_numbers<[1], [0], [0], [1], [0, 0, 1, 1], [], []>} : vector<4x128xbf16>, vector<128x128xbf16>, vector<4x128xf32> -> vector<4x128xf32>
    %c0_48 = arith.constant 0 : index
    %c0_49 = arith.constant 0 : index
    %81 = vector.load %arg9[%c0_48, %c0_49] : memref<1x128xf32, #tpu.memory_space<vmem>>, vector<1x128xf32>
    %82 = vector.broadcast %81 : vector<1x128xf32> to vector<4x128xf32>
    %83 = arith.addf %80, %82 : vector<4x128xf32>
    %84 = arith.addf %83, %5 : vector<4x128xf32>
    %cst_50 = arith.constant 0.000000e+00 : f32
    %85 = vector.broadcast %cst_50 : f32 to vector<4x128xf32>
    %86 = arith.maximumf %84, %85 : vector<4x128xf32>
    %87 = arith.truncf %86 : vector<4x128xf32> to vector<4x128xbf16>
    %c0_51 = arith.constant 0 : index
    %c0_52 = arith.constant 0 : index
    %c0_53 = arith.constant 0 : index
    %88 = vector.load %arg10[%c0_51, %c0_52, %c0_53] : memref<1x4x128xbf16, #tpu.memory_space<vmem>>, vector<1x4x128xbf16>
    %89 = vector.shape_cast %88 : vector<1x4x128xbf16> to vector<4x128xbf16>
    %90 = vector.shape_cast %87 : vector<4x128xbf16> to vector<1x4x128xbf16>
    tpu.vector_store %arg10[%c0_51, %c0_52, %c0_53], %90 {strides = array<i32>} : memref<1x4x128xbf16, #tpu.memory_space<vmem>>, vector<1x4x128xbf16>,
    return
  }
  func.func @transform_0(%arg0: i32) -> (i32, i32, i32) {
    %c0_i32 = arith.constant 0 : i32
    %c0_i32_0 = arith.constant 0 : i32
    %c0_i32_1 = arith.constant 0 : i32
    return %arg0, %c0_i32, %c0_i32_0 : i32, i32, i32
  }
  func.func @transform_1(%arg0: i32) -> (i32, i32, i32) {
    %c0_i32 = arith.constant 0 : i32
    %c0_i32_0 = arith.constant 0 : i32
    %c0_i32_1 = arith.constant 0 : i32
    %c0_i32_2 = arith.constant 0 : i32
    return %c0_i32, %c0_i32_0, %c0_i32_1 : i32, i32, i32
  }
  func.func @transform_2(%arg0: i32) -> (i32, i32) {
    %c0_i32 = arith.constant 0 : i32
    %c0_i32_0 = arith.constant 0 : i32
    %c0_i32_1 = arith.constant 0 : i32
    return %c0_i32, %c0_i32_0 : i32, i32
  }
  func.func @transform_3(%arg0: i32) -> (i32, i32, i32) {
    %c0_i32 = arith.constant 0 : i32
    %c0_i32_0 = arith.constant 0 : i32
    %c0_i32_1 = arith.constant 0 : i32
    %c0_i32_2 = arith.constant 0 : i32
    return %c0_i32, %c0_i32_0, %c0_i32_1 : i32, i32, i32
  }
  func.func @transform_4(%arg0: i32) -> (i32, i32) {
    %c0_i32 = arith.constant 0 : i32
    %c0_i32_0 = arith.constant 0 : i32
    %c0_i32_1 = arith.constant 0 : i32
    return %c0_i32, %c0_i32_0 : i32, i32
  }
  func.func @transform_5(%arg0: i32) -> (i32, i32, i32) {
    %c0_i32 = arith.constant 0 : i32
    %c0_i32_0 = arith.constant 0 : i32
    %c0_i32_1 = arith.constant 0 : i32
    %c0_i32_2 = arith.constant 0 : i32
    return %c0_i32, %c0_i32_0, %c0_i32_1 : i32, i32, i32
  }
  func.func @transform_6(%arg0: i32) -> (i32, i32) {
    %c0_i32 = arith.constant 0 : i32
    %c0_i32_0 = arith.constant 0 : i32
    %c0_i32_1 = arith.constant 0 : i32
    return %c0_i32, %c0_i32_0 : i32, i32
  }
  func.func @transform_7(%arg0: i32) -> (i32, i32, i32) {
    %c0_i32 = arith.constant 0 : i32
    %c0_i32_0 = arith.constant 0 : i32
    %c0_i32_1 = arith.constant 0 : i32
    %c0_i32_2 = arith.constant 0 : i32
    return %c0_i32, %c0_i32_0, %c0_i32_1 : i32, i32, i32
  }
  func.func @transform_8(%arg0: i32) -> (i32, i32) {
    %c0_i32 = arith.constant 0 : i32
    %c0_i32_0 = arith.constant 0 : i32
    %c0_i32_1 = arith.constant 0 : i32
    return %c0_i32, %c0_i32_0 : i32, i32
  }
  func.func @transform_9(%arg0: i32) -> (i32, i32, i32) {
    %c0_i32 = arith.constant 0 : i32
    %c0_i32_0 = arith.constant 0 : i32
    %c0_i32_1 = arith.constant 0 : i32
    return %arg0, %c0_i32, %c0_i32_0 : i32, i32, i32
  }
}

</mosaic_0001>

<bundles_post_ra>
// kernel: _lambda_.16
= control target key start
LH: loop header
LB: loop body
LE: loop exit
PB: predicated region body
PF: predicated region fallthrough
CT: control target
= control target key end

     0   :  { %s787_s22 = smov 124   ;;  %vm129_vm0 = vcmask 1041408   ;;  %vm104_vm1 = vcmask 293888   ;;  %s789_s9 = smov 16   ;;  %vm536_vm2 = vcmask 97280   ;;  %vm617_vm3 = vcmask 125952   ;;  %s1154_s0 = inlined_call_operand.vmem [shape: bf16[128,36], index: 0, kind: input, shape index: {}]   ;;  %s1155_s1 = inlined_call_operand.vmem [shape: bf16[36,12], index: 1, kind: input, shape index: {}]   ;;  %s1156_s3 = inlined_call_operand.vmem [shape: f32[1,4], index: 3, kind: input, shape index: {}]   ;;  %s1157_s4 = inlined_call_operand.vmem [shape: f32[1,4], index: 4, kind: input, shape index: {}]   ;;  %s1158_s2 = inlined_call_operand.vmem [shape: f32[1,12], index: 2, kind: input, shape index: {}]   ;;  %s1159_s5 = inlined_call_operand.vmem [shape: bf16[128,16], index: 5, kind: output, shape index: {}]  }
   0x1   :  { %v823_v0 = vld [vmem:[%s1154_s0] sm:$0xf]  ;;  %v828_v1 = vld [vmem:[%s1154_s0 + $0x8] sm:$0xf]  ;;  %v837_v2 = vld [vmem:[%s1154_s0 + $0x4] sm:$0xf] }
   0x2   :  { %246 = vrot.lane.b32.xlu0 %v823_v0, %s787_s22  ;;  %250 = vrot.lane.b32.xlu1 %v828_v1, %s787_s22  ;;  %v842_v3 = vld [vmem:[%s1154_s0 + $0xc] sm:$0xf]  ;;  %v851_v4 = vld [vmem:[%s1154_s0 + $0x10] sm:$0xf]  ;;  %v639_v16 = vcombine.low %v823_v0, %v837_v2 }
   0x3   :  { %v856_v5 = vld [vmem:[%s1154_s0 + $0x14] sm:$0xf]  ;;  %v865_v6 = vld [vmem:[%s1154_s0 + $0x18] sm:$0xf]  ;;  %v870_v7 = vld [vmem:[%s1154_s0 + $0x1c] sm:$0xf]  ;;  %v640_v22 = vcombine.low %v828_v1, %v842_v3 }
   0x4   :  { %v879_v8 = vld [vmem:[%s1154_s0 + $0x20] sm:$0xf]  ;;  %v884_v9 = vld [vmem:[%s1154_s0 + $0x24] sm:$0xf]  ;;  %v893_v10 = vld [vmem:[%s1154_s0 + $0x28] sm:$0xf]  ;;  %709 = vmatprep.mubr.msk.bf16.mxu0 %vm104_vm1, %v639_v16  ;;  %v641_v24 = vcombine.low %v851_v4, %v856_v5  ;;  %v642_v26 = vcombine.low %v865_v6, %v870_v7 }
   0x5   :  { %v898_v11 = vld [vmem:[%s1154_s0 + $0x2c] sm:$0xf]  ;;  %v907_v12 = vld [vmem:[%s1154_s0 + $0x30] sm:$0xf]  ;;  %v912_v13 = vld [vmem:[%s1154_s0 + $0x34] sm:$0xf]  ;;  %v643_v17 = vcombine.low %v879_v8, %v884_v9 }
   0x6   :  { %248 = vrot.lane.b32.xlu0 %v837_v2, %s787_s22  ;;  %252 = vrot.lane.b32.xlu1 %v842_v3, %s787_s22  ;;  %v921_v14 = vld [vmem:[%s1154_s0 + $0x38] sm:$0xf]  ;;  %v926_v15 = vld [vmem:[%s1154_s0 + $0x3c] sm:$0xf]  ;;  %v644_v23 = vcombine.low %v893_v10, %v898_v11  ;;  %v645_v25 = vcombine.low %v907_v12, %v912_v13 }
   0x7   :  { %v782_v18 = vld [vmem:[%s1155_s1 + $0x10] ss:$0 sps:$4 sm:$0x33]   ;;  %v783_v19 = vld [vmem:[%s1155_s1 + $0x8] sm:$0xff]   ;;  %717 = vmatprep.mubr.msk.bf16.mxu1 %vm104_vm1, %v643_v17  ;;  %v784_v21 = vld [vmem:[%s1155_s1] sm:$0xff]   ;;  %v646_v27 = vcombine.low %v921_v14, %v926_v15  ;;  %s788_s1 = smov 116  }
   0x8   :  { %v131_v20 = vsel %vm129_vm0, %v782_v18, 0  ;;  %731 = vmatprep.subr.msk.bf16.mxu0 %vm129_vm0, %v782_v18  ;;  %732 = vmatprep.subr.msk.bf16.mxu1 %vm129_vm0, %v782_v18  ;;  %v658_v60 = vld [vmem:[%s1156_s3] ss:$0 sm:$0xff] }
   0x9   :  { %704 = vmatpush3.bf16.msra.mxu0 %v131_v20  ;;  %728 = vmatpush3.bf16.msra.mxu1 %v131_v20  ;;  %v659_v61 = vld [vmem:[%s1157_s4] ss:$0 sm:$0xff] }
   0xa   :  { %254 = vrot.lane.b32.xlu0 %v851_v4, %s787_s22  ;;  %256 = vrot.lane.b32.xlu1 %v856_v5, %s787_s22 }
   0xb   :  { %705 = vmatprep.subr.bf16.mxu0 %v783_v19  ;;  %726 = vmatprep.subr.bf16.mxu1 %v783_v19 }
   0xd   :  { %706 = vmatpush3.bf16.msra.mxu0 %v783_v19  ;;  %729 = vmatpush3.bf16.msra.mxu1 %v783_v19 }
   0xe   :  { %258 = vrot.lane.b32.xlu0 %v865_v6, %s787_s22  ;;  %260 = vrot.lane.b32.xlu1 %v870_v7, %s787_s22 }
   0xf   :  { %707 = vmatprep.subr.bf16.mxu0 %v784_v21  ;;  %727 = vmatprep.subr.bf16.mxu1 %v784_v21 }
  0x11   :  { %708 = vmatpush3.bf16.msra.mxu0 %v784_v21  ;;  %730 = vmatpush3.bf16.msra.mxu1 %v784_v21 }
  0x12   :  { %262 = vrot.lane.b32.xlu0 %v879_v8, %s787_s22  ;;  %264 = vrot.lane.b32.xlu1 %v884_v9, %s787_s22 }
  0x14   :  { %710 = vmatmul.mubr.msk.bf16.vlgmr.msra.gmra.mxu0 %vm104_vm1, %v640_v22  ;;  %718 = vmatmul.mubr.msk.bf16.vlgmr.msra.gmra.mxu1 %vm104_vm1, %v644_v23 }
  0x15   :  { %713 = vmatprep.mubr.msk.bf16.mxu0 %vm104_vm1, %v641_v24  ;;  %721 = vmatprep.mubr.msk.bf16.mxu1 %vm104_vm1, %v645_v25 }
  0x16   :  { %266 = vrot.lane.b32.xlu0 %v893_v10, %s787_s22  ;;  %268 = vrot.lane.b32.xlu1 %v898_v11, %s787_s22 }
  0x1a   :  { %270 = vrot.lane.b32.xlu0 %v907_v12, %s787_s22  ;;  %272 = vrot.lane.b32.xlu1 %v912_v13, %s787_s22 }
  0x1c   :  { %714 = vmatmul.mubr.msk.bf16.gmra.mxu0 %vm104_vm1, %v642_v26  ;;  %722 = vmatmul.mubr.msk.bf16.gmra.mxu1 %vm104_vm1, %v646_v27 }
  0x1e   :  { %274 = vrot.lane.b32.xlu0 %v921_v14, %s787_s22  ;;  %276 = vrot.lane.b32.xlu1 %v926_v15, %s787_s22 }
  0x74   :  { %v247_v28 = vpop.permute.xlu0 %246  ;;  %v251_v29 = vpop.permute.xlu1 %250 }
  0x75   :  { %v966_v30 = vmax.bf16 %v247_v28, %v823_v0  ;;  %v971_v31 = vmax.bf16 %v251_v29, %v828_v1 }
  0x77   :  { %326 = vrot.lane.b32.xlu0 %v966_v30, %s788_s1 }
  0x78   :  { %v249_v32 = vpop.permute.xlu0 %248  ;;  %v253_v33 = vpop.permute.xlu1 %252 }
  0x79   :  { %v974_v34 = vmax.bf16 %v249_v32, %v837_v2  ;;  %v981_v35 = vmax.bf16 %v253_v33, %v842_v3 }
  0x7b   :  { %330 = vrot.lane.b32.xlu0 %v971_v31, %s788_s1  ;;  %328 = vrot.lane.b32.xlu1 %v974_v34, %s788_s1 }
  0x7c   :  { %v255_v36 = vpop.permute.xlu0 %254  ;;  %v257_v37 = vpop.permute.xlu1 %256 }
  0x7d   :  { %v984_v38 = vmax.bf16 %v255_v36, %v851_v4  ;;  %v991_v39 = vmax.bf16 %v257_v37, %v856_v5 }
  0x7f   :  { %332 = vrot.lane.b32.xlu1 %v981_v35, %s788_s1  ;;  %334 = vrot.lane.b32.xlu0 %v984_v38, %s788_s1 }
  0x80   :  { %v259_v40 = vpop.permute.xlu0 %258  ;;  %v261_v41 = vpop.permute.xlu1 %260 }
  0x81   :  { %v994_v42 = vmax.bf16 %v259_v40, %v865_v6  ;;  %v1001_v43 = vmax.bf16 %v261_v41, %v870_v7 }
  0x83   :  { %336 = vrot.lane.b32.xlu1 %v991_v39, %s788_s1  ;;  %338 = vrot.lane.b32.xlu0 %v994_v42, %s788_s1 }
  0x84   :  { %v263_v44 = vpop.permute.xlu0 %262  ;;  %v265_v45 = vpop.permute.xlu1 %264 }
  0x85   :  { %v1004_v46 = vmax.bf16 %v263_v44, %v879_v8  ;;  %v1011_v47 = vmax.bf16 %v265_v45, %v884_v9 }
  0x87   :  { %340 = vrot.lane.b32.xlu1 %v1001_v43, %s788_s1  ;;  %342 = vrot.lane.b32.xlu0 %v1004_v46, %s788_s1 }
  0x88   :  { %v267_v48 = vpop.permute.xlu0 %266  ;;  %v269_v49 = vpop.permute.xlu1 %268 }
  0x89   :  { %v1014_v50 = vmax.bf16 %v267_v48, %v893_v10  ;;  %v305_v51 = vmax.bf16 %v269_v49, %v898_v11 }
  0x8b   :  { %344 = vrot.lane.b32.xlu1 %v1011_v47, %s788_s1  ;;  %346 = vrot.lane.b32.xlu0 %v1014_v50, %s788_s1 }
  0x8c   :  { %v271_v52 = vpop.permute.xlu0 %270  ;;  %v273_v53 = vpop.permute.xlu1 %272 }
  0x8d   :  { %v306_v54 = vmax.bf16 %v271_v52, %v907_v12  ;;  %v307_v55 = vmax.bf16 %v273_v53, %v912_v13 }
  0x8f   :  { %348 = vrot.lane.b32.xlu1 %v305_v51, %s788_s1  ;;  %350 = vrot.lane.b32.xlu0 %v306_v54, %s788_s1 }
  0x90   :  { %v275_v56 = vpop.permute.xlu0 %274  ;;  %v277_v57 = vpop.permute.xlu1 %276 }
  0x91   :  { %v308_v58 = vmax.bf16 %v275_v56, %v921_v14  ;;  %v309_v59 = vmax.bf16 %v277_v57, %v926_v15 }
  0x93   :  { %352 = vrot.lane.b32.xlu1 %v307_v55, %s788_s1  ;;  %354 = vrot.lane.b32.xlu0 %v308_v58, %s788_s1 }
  0x97   :  { %356 = vrot.lane.b32.xlu1 %v309_v59, %s788_s1  ;;  %412 = vrot.lane.b32.xlu0 %v658_v60, %s789_s9 }
  0x9b   :  { %437 = vrot.lane.b32.xlu1 %v659_v61, %s789_s9 }
  0xe9   :  { %v327_v62 = vpop.permute.xlu0 %326 }
  0xea   :  { %v374_v11 = vmax.bf16 %v327_v62, %v966_v30 }
  0xec   :  { %v390_v26 = vunpack.c.l.bf16 %v374_v11 }
  0xed   :  { %v329_v63 = vpop.permute.xlu1 %328  ;;  %v331_v0 = vpop.permute.xlu0 %330 }
  0xee   :  { %v375_v12 = vmax.bf16 %v329_v63, %v974_v34  ;;  %v376_v13 = vmax.bf16 %v331_v0, %v971_v31 }
  0xf0   :  { %v391_v29 = vunpack.c.l.bf16 %v375_v12  ;;  %v392_v30 = vunpack.c.l.bf16 %v376_v13 }
  0xf1   :  { %v333_v1 = vpop.permute.xlu1 %332  ;;  %v335_v2 = vpop.permute.xlu0 %334 }
  0xf2   :  { %v377_v14 = vmax.bf16 %v333_v1, %v981_v35  ;;  %v378_v15 = vmax.bf16 %v335_v2, %v984_v38 }
  0xf4   :  { %v393_v31 = vunpack.c.l.bf16 %v377_v14  ;;  %v394_v32 = vunpack.c.l.bf16 %v378_v15 }
  0xf5   :  { %v337_v3 = vpop.permute.xlu1 %336  ;;  %v339_v4 = vpop.permute.xlu0 %338 }
  0xf6   :  { %v379_v16 = vmax.bf16 %v337_v3, %v991_v39  ;;  %v380_v17 = vmax.bf16 %v339_v4, %v994_v42 }
  0xf8   :  { %v395_v33 = vunpack.c.l.bf16 %v379_v16  ;;  %v396_v34 = vunpack.c.l.bf16 %v380_v17 }
  0xf9   :  { %v341_v5 = vpop.permute.xlu1 %340  ;;  %v343_v6 = vpop.permute.xlu0 %342 }
  0xfa   :  { %v381_v18 = vmax.bf16 %v341_v5, %v1001_v43  ;;  %v382_v19 = vmax.bf16 %v343_v6, %v1004_v46 }
  0xfc   :  { %v397_v35 = vunpack.c.l.bf16 %v381_v18  ;;  %v398_v36 = vunpack.c.l.bf16 %v382_v19 }
  0xfd   :  { %v345_v7 = vpop.permute.xlu1 %344  ;;  %v347_v8 = vpop.permute.xlu0 %346 }
  0xfe   :  { %v383_v20 = vmax.bf16 %v345_v7, %v1011_v47  ;;  %v384_v21 = vmax.bf16 %v347_v8, %v1014_v50 }
 0x100   :  { %v399_v37 = vunpack.c.l.bf16 %v383_v20  ;;  %v400_v38 = vunpack.c.l.bf16 %v384_v21 }
 0x101   :  { %v349_v9 = vpop.permute.xlu1 %348  ;;  %v351_v10 = vpop.permute.xlu0 %350 }
 0x102   :  { %v385_v22 = vmax.bf16 %v349_v9, %v305_v51  ;;  %v386_v23 = vmax.bf16 %v351_v10, %v306_v54 }
 0x104   :  { %v401_v39 = vunpack.c.l.bf16 %v385_v22  ;;  %v402_v40 = vunpack.c.l.bf16 %v386_v23 }
 0x105   :  { %v353_v24 = vpop.permute.xlu1 %352  ;;  %v355_v25 = vpop.permute.xlu0 %354 }
 0x106   :  { %v387_v27 = vmax.bf16 %v353_v24, %v307_v55  ;;  %v388_v28 = vmax.bf16 %v355_v25, %v308_v58 }
 0x108   :  { %v403_v43 = vunpack.c.l.bf16 %v387_v27  ;;  %v404_v44 = vunpack.c.l.bf16 %v388_v28 }
 0x109   :  { %v357_v41 = vpop.permute.xlu1 %356  ;;  %v413_v42 = vpop.permute.xlu0 %412 }
 0x10a   :  { %v389_v45 = vmax.bf16 %v357_v41, %v309_v59  ;;  %v417_v46 = vmul.f32 %v413_v42, %v392_v30  ;;  %v418_v47 = vmul.f32 %v413_v42, %v393_v31  ;;  %v415_v48 = vmul.f32 %v413_v42, %v390_v26 }
 0x10b   :  { %v416_v49 = vmul.f32 %v413_v42, %v391_v29  ;;  %v421_v50 = vmul.f32 %v413_v42, %v396_v34  ;;  %v422_v52 = vmul.f32 %v413_v42, %v397_v35  ;;  %v419_v53 = vmul.f32 %v413_v42, %v394_v32 }
 0x10c   :  { %v405_v51 = vunpack.c.l.bf16 %v389_v45  ;;  %v420_v54 = vmul.f32 %v413_v42, %v395_v33  ;;  %v425_v56 = vmul.f32 %v413_v42, %v400_v38  ;;  %v426_v57 = vmul.f32 %v413_v42, %v401_v39 }
 0x10d   :  { %v438_v55 = vpop.permute.xlu1 %437  ;;  %v423_v58 = vmul.f32 %v413_v42, %v398_v36  ;;  %v424_v60 = vmul.f32 %v413_v42, %v399_v37  ;;  %v429_v18 = vmul.f32 %v413_v42, %v404_v44  ;;  %v427_v21 = vmul.f32 %v413_v42, %v402_v40  ;;  %v711_v40 = vpop.f32.mrf.mxu0 }
 0x10e   :  { %v442_v61 = vadd.f32 %v438_v55, %v417_v46  ;;  %v443_v62 = vadd.f32 %v438_v55, %v418_v47  ;;  %v440_v63 = vadd.f32 %v438_v55, %v415_v48  ;;  %v441_v0 = vadd.f32 %v438_v55, %v416_v49 }
 0x10f   :  { %v446_v1 = vadd.f32 %v438_v55, %v421_v50  ;;  %v447_v59 = vadd.f32 %v438_v55, %v422_v52  ;;  %v444_v2 = vadd.f32 %v438_v55, %v419_v53  ;;  %v445_v3 = vadd.f32 %v438_v55, %v420_v54  ;;  %v167_v41 = vpop.f32.mrf.mxu0  ;;  %v638_v52 = vld [vmem:[%s1158_s2] ss:$0 sm:$0xff] }
 0x110   :  { %v458_v4 = vmax.f32 %v442_v61, 0.0  ;;  %v459_v5 = vmax.f32 %v443_v62, 0.0  ;;  %v456_v6 = vmax.f32 %v440_v63, 0.0  ;;  %v457_v7 = vmax.f32 %v441_v0, 0.0 }
 0x111   :  { %v462_v8 = vmax.f32 %v446_v1, 0.0  ;;  %v463_v9 = vmax.f32 %v447_v59, 0.0  ;;  %v460_v10 = vmax.f32 %v444_v2, 0.0  ;;  %v461_v11 = vmax.f32 %v445_v3, 0.0 }
 0x112   :  { %v741_v12 = vpack.i.bf16 %v459_v5, %v458_v4  ;;  %v736_v13 = vpack.i.bf16 %v457_v7, %v456_v6  ;;  %v450_v14 = vadd.f32 %v438_v55, %v425_v56  ;;  %v451_v15 = vadd.f32 %v438_v55, %v426_v57 }
 0x113   :  { %v448_v16 = vadd.f32 %v438_v55, %v423_v58  ;;  %v449_v17 = vadd.f32 %v438_v55, %v424_v60  ;;  %v751_v19 = vpack.i.bf16 %v463_v9, %v462_v8  ;;  %v430_v20 = vmul.f32 %v413_v42, %v405_v51 }
 0x114   :  { %742 = vrot.lane.b32.xlu1 %v741_v12, %s787_s22  ;;  %737 = vrot.lane.b32.xlu0 %v736_v13, %s787_s22  ;;  %v746_v22 = vpack.i.bf16 %v461_v11, %v460_v10  ;;  %v466_v23 = vmax.f32 %v450_v14, 0.0  ;;  %v467_v24 = vmax.f32 %v451_v15, 0.0  ;;  %v428_v25 = vmul.f32 %v413_v42, %v403_v43  ;;  %v719_v42 = vpop.f32.mrf.mxu1  ;;  %v712_v43 = vpop.f32.mrf.mxu0 }
 0x115   :  { %v464_v26 = vmax.f32 %v448_v16, 0.0  ;;  %v465_v27 = vmax.f32 %v449_v17, 0.0  ;;  %v455_v28 = vadd.f32 %v438_v55, %v430_v20  ;;  %v452_v29 = vadd.f32 %v438_v55, %v427_v21 }
 0x116   :  { %v453_v30 = vadd.f32 %v438_v55, %v428_v25  ;;  %v454_v31 = vadd.f32 %v438_v55, %v429_v18  ;;  %v761_v32 = vpack.i.bf16 %v467_v24, %v466_v23  ;;  %v199_v44 = vpop.f32.mrf.mxu1  ;;  %v170_v45 = vpop.f32.mrf.mxu0  ;;  %v176_v53 = vadd.f32 %v711_v40, %v638_v52 }
 0x117   :  { %v756_v33 = vpack.i.bf16 %v465_v27, %v464_v26  ;;  %v471_v34 = vmax.f32 %v455_v28, 0.0  ;;  %v468_v35 = vmax.f32 %v452_v29, 0.0  ;;  %v168_v54 = vadd.f32 %v638_v52, %v167_v41 }
 0x118   :  { %752 = vrot.lane.b32.xlu1 %v751_v19, %s787_s22  ;;  %747 = vrot.lane.b32.xlu0 %v746_v22, %s787_s22  ;;  %v469_v36 = vmax.f32 %v453_v30, 0.0  ;;  %v470_v37 = vmax.f32 %v454_v31, 0.0  ;;  %v720_v46 = vpop.f32.mrf.mxu1  ;;  %v715_v47 = vpop.f32.mrf.mxu0  ;;  %v1058_v55 = vadd.f32 %v719_v42, %v638_v52  ;;  %v1060_v56 = vadd.f32 %v638_v52, %v199_v44 }
 0x119   :  { %v179_v60 = vadd.f32 %v712_v43, %v638_v52  ;;  %v171_v61 = vadd.f32 %v638_v52, %v170_v45  ;;  %v1062_v62 = vadd.f32 %v720_v46, %v638_v52  ;;  %v192_v0 = vadd.f32 %v715_v47, %v638_v52 }
 0x11a   :  { %v771_v38 = vpack.i.bf16 %v471_v34, %v470_v37  ;;  %v766_v39 = vpack.i.bf16 %v469_v36, %v468_v35  ;;  %v202_v48 = vpop.f32.mrf.mxu1  ;;  %v183_v49 = vpop.f32.mrf.mxu0  ;;  %v232_v3 = vmax.f32 %v176_v53, 0.0  ;;  %v230_v4 = vmax.f32 %v168_v54, 0.0 }
 0x11b   :  { %v1064_v63 = vadd.f32 %v638_v52, %v202_v48  ;;  %v184_v1 = vadd.f32 %v638_v52, %v183_v49  ;;  %v240_v5 = vmax.f32 %v1058_v55, 0.0  ;;  %v238_v6 = vmax.f32 %v1060_v56, 0.0 }
 0x11c   :  { %762 = vrot.lane.b32.xlu1 %v761_v32, %s787_s22  ;;  %757 = vrot.lane.b32.xlu0 %v756_v33, %s787_s22  ;;  %v723_v50 = vpop.f32.mrf.mxu1  ;;  %v716_v51 = vpop.f32.mrf.mxu0  ;;  %v233_v8 = vmax.f32 %v179_v60, 0.0  ;;  %v231_v9 = vmax.f32 %v171_v61, 0.0  ;;  %v241_v10 = vmax.f32 %v1062_v62, 0.0  ;;  %v236_v18 = vmax.f32 %v192_v0, 0.0 }
 0x11d   :  { %v195_v59 = vadd.f32 %v716_v51, %v638_v52  ;;  %v239_v11 = vmax.f32 %v1064_v63, 0.0  ;;  %v234_v19 = vmax.f32 %v184_v1, 0.0  ;;  %v224_v37 = vadd.f32 %v723_v50, %v638_v52 }
 0x11e   :  { %v215_v57 = vpop.f32.mrf.mxu1  ;;  %v186_v58 = vpop.f32.mrf.mxu0 }
 0x11f   :  { %v187_v2 = vadd.f32 %v638_v52, %v186_v58  ;;  %v237_v20 = vmax.f32 %v195_v59, 0.0  ;;  %v244_v58 = vmax.f32 %v224_v37, 0.0 }
 0x120   :  { %772 = vrot.lane.b32.xlu1 %v771_v38, %s787_s22  ;;  %767 = vrot.lane.b32.xlu0 %v766_v39, %s787_s22  ;;  %v724_v7 = vpop.f32.mrf.mxu1  ;;  %v216_v38 = vadd.f32 %v638_v52, %v215_v57 }
 0x121   :  { %v235_v21 = vmax.f32 %v187_v2, 0.0  ;;  %v227_v39 = vadd.f32 %v724_v7, %v638_v52 }
 0x122   :  { %v218_v26 = vpop.f32.mrf.mxu1 }
 0x123   :  { %v219_v40 = vadd.f32 %v638_v52, %v218_v26  ;;  %v242_v52 = vmax.f32 %v216_v38, 0.0  ;;  %v245_v60 = vmax.f32 %v227_v39, 0.0 }
 0x125   :  { %v243_v61 = vmax.f32 %v219_v40, 0.0 }
 0x186   :  { %v743_v12 = vpop.permute.xlu1 %742  ;;  %v738_v13 = vpop.permute.xlu0 %737 }
 0x187   :  { %v745_v14 = vunpack.i.h.bf16 %v743_v12  ;;  %v744_v15 = vunpack.i.l.bf16 %v743_v12  ;;  %v740_v16 = vunpack.i.h.bf16 %v738_v13  ;;  %v739_v17 = vunpack.i.l.bf16 %v738_v13 }
 0x189   :  { %v539_v22 = vsel %vm536_vm2, %v232_v3, %v744_v15  ;;  %v540_v23 = vsel %vm536_vm2, %v233_v8, %v745_v14  ;;  %v537_v24 = vsel %vm536_vm2, %v230_v4, %v739_v17  ;;  %v538_v25 = vsel %vm536_vm2, %v231_v9, %v740_v16 }
 0x18a   :  { %v678_v27 = vpack.c.bf16 %v539_v22, %v539_v22  ;;  %v679_v28 = vpack.c.bf16 %v540_v23, %v540_v23  ;;  %v676_v29 = vpack.c.bf16 %v537_v24, %v537_v24  ;;  %v677_v30 = vpack.c.bf16 %v538_v25, %v538_v25  ;;  %v753_v31 = vpop.permute.xlu1 %752  ;;  %v748_v32 = vpop.permute.xlu0 %747 }
 0x18b   :  { %v755_v33 = vunpack.i.h.bf16 %v753_v31  ;;  %v754_v34 = vunpack.i.l.bf16 %v753_v31  ;;  %v750_v35 = vunpack.i.h.bf16 %v748_v32  ;;  %v749_v36 = vunpack.i.l.bf16 %v748_v32 }
 0x18c   :  { %620 = vst.msk [vmem:[%s1159_s5 + $0x8] sm:$0xf] %vm617_vm3, %v678_v27  ;;  %621 = vst.msk [vmem:[%s1159_s5 + $0xc] sm:$0xf] %vm617_vm3, %v679_v28 }
 0x18d   :  { %618 = vst.msk [vmem:[%s1159_s5] sm:$0xf] %vm617_vm3, %v676_v29  ;;  %619 = vst.msk [vmem:[%s1159_s5 + $0x4] sm:$0xf] %vm617_vm3, %v677_v30  ;;  %v543_v41 = vsel %vm536_vm2, %v236_v18, %v754_v34  ;;  %v544_v42 = vsel %vm536_vm2, %v237_v20, %v755_v33  ;;  %v541_v43 = vsel %vm536_vm2, %v234_v19, %v749_v36 }
 0x18e   :  { %v542_v44 = vsel %vm536_vm2, %v235_v21, %v750_v35  ;;  %v682_v45 = vpack.c.bf16 %v543_v41, %v543_v41  ;;  %v683_v46 = vpack.c.bf16 %v544_v42, %v544_v42  ;;  %v680_v47 = vpack.c.bf16 %v541_v43, %v541_v43  ;;  %v763_v49 = vpop.permute.xlu1 %762  ;;  %v758_v50 = vpop.permute.xlu0 %757 }
 0x18f   :  { %v681_v48 = vpack.c.bf16 %v542_v44, %v542_v44  ;;  %v765_v51 = vunpack.i.h.bf16 %v763_v49  ;;  %v764_v53 = vunpack.i.l.bf16 %v763_v49  ;;  %v760_v54 = vunpack.i.h.bf16 %v758_v50 }
 0x190   :  { %v759_v57 = vunpack.i.l.bf16 %v758_v50  ;;  %624 = vst.msk [vmem:[%s1159_s5 + $0x18] sm:$0xf] %vm617_vm3, %v682_v45  ;;  %625 = vst.msk [vmem:[%s1159_s5 + $0x1c] sm:$0xf] %vm617_vm3, %v683_v46 }
 0x191   :  { %622 = vst.msk [vmem:[%s1159_s5 + $0x10] sm:$0xf] %vm617_vm3, %v680_v47  ;;  %623 = vst.msk [vmem:[%s1159_s5 + $0x14] sm:$0xf] %vm617_vm3, %v681_v48  ;;  %v548_v62 = vsel %vm536_vm2, %v241_v10, %v765_v51  ;;  %v547_v63 = vsel %vm536_vm2, %v240_v5, %v764_v53  ;;  %v546_v0 = vsel %vm536_vm2, %v239_v11, %v760_v54 }
 0x192   :  { %v545_v1 = vsel %vm536_vm2, %v238_v6, %v759_v57  ;;  %v687_v59 = vpack.c.bf16 %v548_v62, %v548_v62  ;;  %v686_v2 = vpack.c.bf16 %v547_v63, %v547_v63  ;;  %v685_v3 = vpack.c.bf16 %v546_v0, %v546_v0  ;;  %v773_v7 = vpop.permute.xlu1 %772  ;;  %v768_v8 = vpop.permute.xlu0 %767 }
 0x193   :  { %v684_v4 = vpack.c.bf16 %v545_v1, %v545_v1  ;;  %v775_v9 = vunpack.i.h.bf16 %v773_v7  ;;  %v774_v12 = vunpack.i.l.bf16 %v773_v7  ;;  %v770_v13 = vunpack.i.h.bf16 %v768_v8 }
 0x194   :  { %v769_v10 = vunpack.i.l.bf16 %v768_v8  ;;  %629 = vst.msk [vmem:[%s1159_s5 + $0x2c] sm:$0xf] %vm617_vm3, %v687_v59  ;;  %628 = vst.msk [vmem:[%s1159_s5 + $0x28] sm:$0xf] %vm617_vm3, %v686_v2 }
 0x195   :  { %627 = vst.msk [vmem:[%s1159_s5 + $0x24] sm:$0xf] %vm617_vm3, %v685_v3  ;;  %626 = vst.msk [vmem:[%s1159_s5 + $0x20] sm:$0xf] %vm617_vm3, %v684_v4  ;;  %v552_v55 = vsel %vm536_vm2, %v245_v60, %v775_v9  ;;  %v551_v56 = vsel %vm536_vm2, %v244_v58, %v774_v12  ;;  %v550_v5 = vsel %vm536_vm2, %v243_v61, %v770_v13 }
 0x196   :  { %v549_v6 = vsel %vm536_vm2, %v242_v52, %v769_v10  ;;  %v691_v11 = vpack.c.bf16 %v552_v55, %v552_v55  ;;  %v690_v14 = vpack.c.bf16 %v551_v56, %v551_v56  ;;  %v689_v15 = vpack.c.bf16 %v550_v5, %v550_v5 }
 0x197   :  { %v688_v16 = vpack.c.bf16 %v549_v6, %v549_v6 }
 0x198   :  { %633 = vst.msk [vmem:[%s1159_s5 + $0x3c] sm:$0xf] %vm617_vm3, %v691_v11  ;;  %632 = vst.msk [vmem:[%s1159_s5 + $0x38] sm:$0xf] %vm617_vm3, %v690_v14 }
 0x199   :  { %631 = vst.msk [vmem:[%s1159_s5 + $0x34] sm:$0xf] %vm617_vm3, %v689_v15  ;;  %630 = vst.msk [vmem:[%s1159_s5 + $0x30] sm:$0xf] %vm617_vm3, %v688_v16 }

// kernel: _lambda_.17
= control target key start
LH: loop header
LB: loop body
LE: loop exit
PB: predicated region body
PF: predicated region fallthrough
CT: control target
= control target key end

     0   :  { %s386_s22 = smov 112   ;;  %v387_v4 = vmov 0   ;;  %vm122_vm0 = vcmask 130048   ;;  %vm202_vm1 = vcmask 916480   ;;  %s389_s21 = smov 64   ;;  %vm285_vm2 = vcmask 392192   ;;  %s526_s0 = inlined_call_operand.vmem [shape: bf16[32,144], index: 0, kind: input, shape index: {}]   ;;  %s527_s1 = inlined_call_operand.vmem [shape: bf16[144,48], index: 1, kind: input, shape index: {}]   ;;  %s528_s3 = inlined_call_operand.vmem [shape: f32[1,16], index: 3, kind: input, shape index: {}]   ;;  %s529_s4 = inlined_call_operand.vmem [shape: f32[1,16], index: 4, kind: input, shape index: {}]   ;;  %s530_s2 = inlined_call_operand.vmem [shape: f32[1,48], index: 2, kind: input, shape index: {}]   ;;  %s531_s5 = inlined_call_operand.vmem [shape: bf16[32,64], index: 5, kind: output, shape index: {}]  }
   0x1   :  { %v423_v0 = vld [vmem:[%s526_s0] sm:$0xff]  ;;  %v428_v1 = vld [vmem:[%s526_s0 + $0x10] sm:$0xff]  ;;  %v437_v2 = vld [vmem:[%s526_s0 + $0x8] sm:$0xff]  ;;  %129 = vmatprep.subr.bf16.mxu0 %v387_v4  ;;  %341 = vmatprep.subr.bf16.mxu1 %v387_v4  ;;  %vm306_vm3 = vcmask 519168  }
   0x2   :  { %182 = vrot.lane.b32.xlu0 %v423_v0, %s386_s22  ;;  %186 = vrot.lane.b32.xlu1 %v428_v1, %s386_s22  ;;  %v442_v3 = vld [vmem:[%s526_s0 + $0x18] sm:$0xff]  ;;  %v374_v6 = vld [vmem:[%s527_s1 + $0x30] sm:$0xff]   ;;  %v317_v7 = vcombine.high %v423_v0, %v437_v2  ;;  %v316_v16 = vcombine.low %v423_v0, %v437_v2 }
   0x3   :  { %v373_v5 = vld [vmem:[%s527_s1 + $0x38] sm:$0xff]   ;;  %v319_v8 = vcombine.high %v428_v1, %v442_v3  ;;  %v375_v9 = vld [vmem:[%s527_s1 + $0x28] sm:$0xff]   ;;  %v376_v10 = vld [vmem:[%s527_s1 + $0x20] sm:$0xff]   ;;  %v318_v17 = vcombine.low %v428_v1, %v442_v3 }
   0x4   :  { %130 = vmatpush1.bf16.msra.mxu0 %v373_v5  ;;  %350 = vmatpush1.bf16.msra.mxu1 %v373_v5  ;;  %v377_v11 = vld [vmem:[%s527_s1 + $0x18] sm:$0xff]   ;;  %v378_v12 = vld [vmem:[%s527_s1 + $0x10] sm:$0xff]   ;;  %v379_v13 = vld [vmem:[%s527_s1 + $0x8] sm:$0xff]  }
   0x5   :  { %131 = vmatprep.subr.bf16.mxu0 %v387_v4  ;;  %342 = vmatprep.subr.bf16.mxu1 %v387_v4  ;;  %v380_v14 = vld [vmem:[%s527_s1] sm:$0xff]  }
   0x6   :  { %184 = vrot.lane.b32.xlu0 %v437_v2, %s386_s22  ;;  %188 = vrot.lane.b32.xlu1 %v442_v3, %s386_s22  ;;  %v381_v15 = vld [vmem:[%s527_s1 + $0x40] sm:$0xff]   ;;  %s388_s1 = smov 80  }
   0x7   :  { %329 = vmatprep.mubr.msk.bf16.mxu0 %vm122_vm0, %v317_v7  ;;  %330 = vmatprep.mubr.msk.bf16.mxu1 %vm122_vm0, %v319_v8  ;;  %v331_v33 = vld [vmem:[%s528_s3] ss:$0 sm:$0xff] }
   0x8   :  { %132 = vmatpush1.bf16.msra.mxu0 %v374_v6  ;;  %351 = vmatpush1.bf16.msra.mxu1 %v374_v6  ;;  %v332_v35 = vld [vmem:[%s529_s4] ss:$0 sm:$0xff] }
   0x9   :  { %133 = vmatprep.subr.bf16.mxu0 %v387_v4  ;;  %343 = vmatprep.subr.bf16.mxu1 %v387_v4 }
   0xc   :  { %134 = vmatpush1.bf16.msra.mxu0 %v375_v9  ;;  %352 = vmatpush1.bf16.msra.mxu1 %v375_v9 }
   0xd   :  { %135 = vmatprep.subr.bf16.mxu0 %v387_v4  ;;  %344 = vmatprep.subr.bf16.mxu1 %v387_v4 }
  0x10   :  { %136 = vmatpush1.bf16.msra.mxu0 %v376_v10  ;;  %353 = vmatpush1.bf16.msra.mxu1 %v376_v10 }
  0x11   :  { %137 = vmatprep.subr.bf16.mxu0 %v387_v4  ;;  %345 = vmatprep.subr.bf16.mxu1 %v387_v4 }
  0x14   :  { %138 = vmatpush1.bf16.msra.mxu0 %v377_v11  ;;  %354 = vmatpush1.bf16.msra.mxu1 %v377_v11 }
  0x15   :  { %139 = vmatprep.subr.bf16.mxu0 %v387_v4  ;;  %346 = vmatprep.subr.bf16.mxu1 %v387_v4 }
  0x18   :  { %140 = vmatpush1.bf16.msra.mxu0 %v378_v12  ;;  %355 = vmatpush1.bf16.msra.mxu1 %v378_v12  ;;  %v315_v12 = vld [vmem:[%s530_s2] ss:$0 sm:$0xff] }
  0x19   :  { %141 = vmatprep.subr.bf16.mxu0 %v387_v4  ;;  %347 = vmatprep.subr.bf16.mxu1 %v387_v4 }
  0x1c   :  { %142 = vmatpush1.bf16.msra.mxu0 %v379_v13  ;;  %356 = vmatpush1.bf16.msra.mxu1 %v379_v13 }
  0x1d   :  { %143 = vmatprep.subr.bf16.mxu0 %v387_v4  ;;  %348 = vmatprep.subr.bf16.mxu1 %v387_v4 }
  0x20   :  { %144 = vmatpush1.bf16.msra.mxu0 %v380_v14  ;;  %357 = vmatpush1.bf16.msra.mxu1 %v380_v14 }
  0x21   :  { %159 = vmatprep.subr.bf16.mxu0 %v387_v4  ;;  %349 = vmatprep.subr.bf16.mxu1 %v387_v4 }
  0x24   :  { %160 = vmatpush2.bf16.msra.mxu0 %v381_v15  ;;  %358 = vmatpush2.bf16.msra.mxu1 %v381_v15 }
  0x27   :  { %162 = vmatmul.mubr.bf16.vlgmr.msra.gmra.mxu0 %v316_v16  ;;  %170 = vmatmul.mubr.bf16.vlgmr.msra.gmra.mxu1 %v318_v17 }
  0x74   :  { %v183_v18 = vpop.permute.xlu0 %182  ;;  %v187_v19 = vpop.permute.xlu1 %186 }
  0x75   :  { %v198_v20 = vrot.slane %v183_v18, 4  ;;  %v200_v21 = vrot.slane %v187_v19, 4  ;;  %v194_v44 = vmax.bf16 %v183_v18, %v423_v0  ;;  %v196_v46 = vmax.bf16 %v187_v19, %v428_v1 }
  0x77   :  { %v203_v22 = vsel %vm202_vm1, %v183_v18, %v198_v20  ;;  %v205_v26 = vsel %vm202_vm1, %v187_v19, %v200_v21 }
  0x78   :  { %v185_v23 = vpop.permute.xlu0 %184  ;;  %v189_v24 = vpop.permute.xlu1 %188  ;;  %v211_v25 = vmax.bf16 %v203_v22, %v423_v0  ;;  %v213_v30 = vmax.bf16 %v205_v26, %v428_v1 }
  0x79   :  { %v199_v27 = vrot.slane %v185_v23, 4  ;;  %v201_v28 = vrot.slane %v189_v24, 4  ;;  %v195_v45 = vmax.bf16 %v185_v23, %v437_v2  ;;  %v197_v55 = vmax.bf16 %v189_v24, %v442_v3 }
  0x7a   :  { %219 = vrot.lane.b32.xlu0 %v211_v25, %s388_s1 }
  0x7b   :  { %v204_v29 = vsel %vm202_vm1, %v185_v23, %v199_v27  ;;  %v206_v32 = vsel %vm202_vm1, %v189_v24, %v201_v28 }
  0x7c   :  { %v212_v31 = vmax.bf16 %v204_v29, %v437_v2  ;;  %v214_v34 = vmax.bf16 %v206_v32, %v442_v3 }
  0x7e   :  { %223 = vrot.lane.b32.xlu0 %v213_v30, %s388_s1  ;;  %221 = vrot.lane.b32.xlu1 %v212_v31, %s388_s1 }
  0x82   :  { %245 = vrot.lane.b32.xlu0 %v331_v33, %s389_s21  ;;  %225 = vrot.lane.b32.xlu1 %v214_v34, %s388_s1 }
  0x86   :  { %258 = vrot.lane.b32.xlu1 %v332_v35, %s389_s21 }
  0xe7   :  { %v163_v36 = vpop.f32.mrf.mxu0  ;;  %v171_v37 = vpop.f32.mrf.mxu1 }
  0xe8   :  { %v164_v13 = vadd.f32 %v315_v12, %v163_v36  ;;  %v172_v15 = vadd.f32 %v315_v12, %v171_v37 }
  0xe9   :  { %v165_v38 = vpop.f32.mrf.mxu0  ;;  %v173_v39 = vpop.f32.mrf.mxu1 }
  0xea   :  { %v178_v18 = vmax.f32 %v164_v13, 0.0  ;;  %v180_v22 = vmax.f32 %v172_v15, 0.0 }
  0xeb   :  { %v166_v41 = vpop.f32.mrf.mxu0  ;;  %v174_v42 = vpop.f32.mrf.mxu1 }
  0xec   :  { %v220_v40 = vpop.permute.xlu0 %219  ;;  %v167_v14 = vadd.f32 %v315_v12, %v166_v41  ;;  %v175_v16 = vadd.f32 %v315_v12, %v174_v42 }
  0xed   :  { %v168_v43 = vpop.f32.mrf.mxu0  ;;  %v176_v47 = vpop.f32.mrf.mxu1  ;;  %v231_v50 = vmax.bf16 %v220_v40, %v194_v44 }
  0xee   :  { %v179_v19 = vmax.f32 %v167_v14, 0.0  ;;  %v181_v23 = vmax.f32 %v175_v16, 0.0 }
  0xef   :  { %v235_v58 = vunpack.c.l.bf16 %v231_v50 }
  0xf0   :  { %v222_v48 = vpop.permute.xlu1 %221  ;;  %v224_v49 = vpop.permute.xlu0 %223 }
  0xf1   :  { %v232_v51 = vmax.bf16 %v222_v48, %v195_v45  ;;  %v233_v52 = vmax.bf16 %v224_v49, %v196_v46 }
  0xf3   :  { %v236_v53 = vunpack.c.l.bf16 %v232_v51  ;;  %v237_v54 = vunpack.c.l.bf16 %v233_v52 }
  0xf4   :  { %v226_v56 = vpop.permute.xlu1 %225  ;;  %v246_v57 = vpop.permute.xlu0 %245 }
  0xf5   :  { %v234_v59 = vmax.bf16 %v226_v56, %v197_v55  ;;  %v248_v61 = vmul.f32 %v246_v57, %v235_v58  ;;  %v249_v62 = vmul.f32 %v246_v57, %v236_v53  ;;  %v250_v63 = vmul.f32 %v246_v57, %v237_v54 }
  0xf7   :  { %v238_v60 = vunpack.c.l.bf16 %v234_v59 }
  0xf8   :  { %v259_v0 = vpop.permute.xlu1 %258 }
  0xf9   :  { %v251_v1 = vmul.f32 %v246_v57, %v238_v60  ;;  %v261_v2 = vadd.f32 %v259_v0, %v248_v61  ;;  %v262_v4 = vadd.f32 %v259_v0, %v249_v62  ;;  %v263_v5 = vadd.f32 %v259_v0, %v250_v63 }
  0xfb   :  { %v264_v6 = vadd.f32 %v259_v0, %v251_v1  ;;  %v265_v7 = vmax.f32 %v261_v2, 0.0  ;;  %v266_v8 = vmax.f32 %v262_v4, 0.0  ;;  %v267_v10 = vmax.f32 %v263_v5, 0.0 }
  0xfd   :  { %v363_v9 = vpack.i.bf16 %v266_v8, %v265_v7  ;;  %v268_v11 = vmax.f32 %v264_v6, 0.0 }
  0xff   :  { %364 = vrot.lane.b32.xlu0 %v363_v9, %s386_s22  ;;  %v368_v3 = vpack.i.bf16 %v268_v11, %v267_v10 }
 0x101   :  { %369 = vrot.lane.b32.xlu1 %v368_v3, %s386_s22 }
 0x171   :  { %v365_v17 = vpop.permute.xlu0 %364 }
 0x172   :  { %v367_v20 = vunpack.i.h.bf16 %v365_v17  ;;  %v366_v21 = vunpack.i.l.bf16 %v365_v17 }
 0x173   :  { %v370_v24 = vpop.permute.xlu1 %369 }
 0x174   :  { %v286_v25 = vsel %vm285_vm2, %v178_v18, %v366_v21  ;;  %v287_v26 = vsel %vm285_vm2, %v179_v19, %v367_v20  ;;  %v372_v27 = vunpack.i.h.bf16 %v370_v24  ;;  %v371_v28 = vunpack.i.l.bf16 %v370_v24 }
 0x175   :  { %v337_v29 = vpack.c.bf16 %v286_v25, %v286_v25  ;;  %v338_v30 = vpack.c.bf16 %v287_v26, %v287_v26 }
 0x176   :  { %v289_v31 = vsel %vm285_vm2, %v181_v23, %v372_v27  ;;  %v288_v32 = vsel %vm285_vm2, %v180_v22, %v371_v28 }
 0x177   :  { %307 = vst.msk [vmem:[%s531_s5] sm:$0xf] %vm306_vm3, %v337_v29  ;;  %308 = vst.msk [vmem:[%s531_s5 + $0x4] sm:$0xf] %vm306_vm3, %v338_v30  ;;  %v340_v33 = vpack.c.bf16 %v289_v31, %v289_v31  ;;  %v339_v34 = vpack.c.bf16 %v288_v32, %v288_v32 }
 0x179   :  { %310 = vst.msk [vmem:[%s531_s5 + $0xc] sm:$0xf] %vm306_vm3, %v340_v33  ;;  %309 = vst.msk [vmem:[%s531_s5 + $0x8] sm:$0xf] %vm306_vm3, %v339_v34 }

// kernel: _lambda_.18
= control target key start
LH: loop header
LB: loop body
LE: loop exit
PB: predicated region body
PF: predicated region fallthrough
CT: control target
= control target key end

     0   :  { %s1941_s30 = smov 0   ;;  %s2264_s0 = inlined_call_operand.vmem [shape: bf16[2,16,64], index: 0, kind: input, shape index: {}]   ;;  %s2265_s1 = inlined_call_operand.vmem [shape: bf16[3,64,64], index: 1, kind: input, shape index: {}]   ;;  %s2266_s2 = inlined_call_operand.vmem [shape: f32[1,64], index: 2, kind: input, shape index: {}]   ;;  %s2267_s3 = inlined_call_operand.vmem [shape: bf16[3,64,64], index: 3, kind: input, shape index: {}]   ;;  %s2268_s4 = inlined_call_operand.vmem [shape: f32[1,64], index: 4, kind: input, shape index: {}]   ;;  %s2269_s5 = inlined_call_operand.vmem [shape: bf16[3,64,64], index: 5, kind: input, shape index: {}]   ;;  %s2270_s6 = inlined_call_operand.vmem [shape: f32[1,64], index: 6, kind: input, shape index: {}]   ;;  %s2271_s7 = inlined_call_operand.vmem [shape: bf16[3,64,64], index: 7, kind: input, shape index: {}]   ;;  %s2272_s8 = inlined_call_operand.vmem [shape: f32[1,64], index: 8, kind: input, shape index: {}]   ;;  %s2273_s9 = inlined_call_operand.vmem [shape: bf16[2,16,64], index: 9, kind: output, shape index: {}]  }
   0x1 LB: > { %s1471_s10 = sadd.s32 4294967295, %s1887_s30   ;;  %p1475_p0 = scmp.ge.s32.totalorder %s1887_s30, 1  ;;  %s1887_s30 = sphi %s1941_s30, %s19_s30  }
   0x2   : > { %p287_p1 = scmp.lt.s32.totalorder %s1887_s30, 3 }
   0x4   : > { %p288_p2 = pnand %p1475_p0, %p287_p1 }
   0x5   : > { %p323_p3 = scmp.lt.s32.totalorder (!%p288_p2), %s1471_s10, 1 }
   0x6   : > { %291 = sbr.rel (%p288_p2) target bundleno = 926 (0x39e), region = 56 }
   0xb   : > { %v1831_v0 = vld [vmem:[%s2265_s1 + $0x18] sm:$0xff]   ;;  %v1889_v1 = vmov 0.0   ;;  %v1833_v3 = vld [vmem:[%s2265_s1 + $0x10] sm:$0xff]   ;;  %vm1890_vm0 = vmmov 0   ;;  %s2283_s10 = smov (!%p323_p3, %s1471_s10), 1  ;;  %v1835_v5 = vld [vmem:[%s2265_s1 + $0x8] sm:$0xff]   ;;  %v334_v39 = vlaneseq }
   0xc   : > { %1677 = vmatprep.subr.bf16.mxu0 %v1889_v1  ;;  %1689 = vmatprep.subr.bf16.mxu1 %v1889_v1  ;;  %v1832_v2 = vld [vmem:[%s2265_s1 + $0x38] sm:$0xff]   ;;  %v1834_v4 = vld [vmem:[%s2265_s1 + $0x30] sm:$0xff]   ;;  %s1613_s21 = sshll.u32 %s2283_s10, 3  ;;  %v1836_v6 = vld [vmem:[%s2265_s1 + $0x28] sm:$0xff]   ;;  %vm354_vm1 = vcmask 1043456   ;;  %vm396_vm2 = vcmask 523264  }
   0xd   : > { %1678 = vmatpush3.bf16.msra.mxu0 %v1831_v0  ;;  %1685 = vmatprep.mubr.msk.bf16.mxu0 %vm1890_vm0, %v1889_v1  ;;  %s327_s26 = scalar_lea.vmem %s2264_s0, %s1613_s21  ;;  %v1837_v10 = vld [vmem:[%s2265_s1] sm:$0xff]   ;;  %v1840_v14 = vld [vmem:[%s2265_s1 + $0x58] sm:$0xff]   ;;  %v1841_v19 = vld [vmem:[%s2265_s1 + $0x50] sm:$0xff]   ;;  %v335_v43 = vshrl.u32 %v334_v39, 7  ;;  %vm617_vm3 = vcmask 1040384   ;;  %vm624_vm6 = vcmask 1046528   ;;  %s332_s12 = scalar_lea.vmem %s2273_s9, %s1613_s21 }
   0xe   : > { %1690 = vmatpush3.bf16.msra.mxu1 %v1832_v2  ;;  %1679 = vmatprep.subr.bf16.mxu0 %v1889_v1  ;;  %v1985_v7 = vld [vmem:[%s327_s26] sm:$0xff]   ;;  %v1842_v20 = vld [vmem:[%s2265_s1 + $0x48] sm:$0xff]   ;;  %v1844_v23 = vld [vmem:[%s2267_s3 + $0x38] sm:$0xff]   ;;  %vm1413_vm9 = vcmask 519168  }
   0xf   : > { %1691 = vmatprep.subr.bf16.mxu1 %v1889_v1  ;;  %1697 = vmatprep.mubr.msk.bf16.mxu1 %vm1890_vm0, %v1889_v1  ;;  %v341_v8 = vunpack.c.l.bf16 %v1985_v7  ;;  %v342_v9 = vunpack.c.h.bf16 %v1985_v7  ;;  %v1838_v11 = vld [vmem:[%s2265_s1 + $0x20] sm:$0xff]   ;;  %v1845_v24 = vld [vmem:[%s2267_s3 + $0x18] sm:$0xff]   ;;  %v1846_v25 = vld [vmem:[%s2267_s3 + $0x30] sm:$0xff]   ;;  %v336_v48 = vadd.s32 8, %v335_v43  ;;  %v337_v52 = vand.u32 3, %v335_v43 }
  0x10   : > { %v1843_v21 = vld [vmem:[%s2265_s1 + $0x40] sm:$0xff]   ;;  %v1847_v26 = vld [vmem:[%s2267_s3 + $0x10] sm:$0xff]   ;;  %v1848_v27 = vld [vmem:[%s2267_s3 + $0x28] sm:$0xff]  }
  0x11   : > { %1680 = vmatpush3.bf16.msra.mxu0 %v1833_v3  ;;  %v355_v12 = vrot.slane %v341_v8, 4  ;;  %v356_v13 = vrot.slane %v342_v9, 4  ;;  %v1849_v28 = vld [vmem:[%s2267_s3 + $0x8] sm:$0xff]   ;;  %v1850_v29 = vld [vmem:[%s2267_s3 + $0x20] sm:$0xff]   ;;  %v338_v55 = vand.u32 3, %v336_v48  ;;  %vm2067_vm4 = vcmp.ge.s32.totalorder %v337_v52, 1 }
  0x12   : > { %1692 = vmatpush3.bf16.msra.mxu1 %v1834_v4  ;;  %1681 = vmatprep.subr.bf16.mxu0 %v1889_v1  ;;  %v1851_v30 = vld [vmem:[%s2267_s3] sm:$0xff]   ;;  %v1852_v3 = vld [vmem:[%s2267_s3 + $0x58] sm:$0xff]   ;;  %vm2100_vm7 = vcmp.lt.s32.totalorder %v337_v52, 3  ;;  %v1878_v62 = vld [vmem:[%s2271_s7 + $0x48] sm:$0xff]  }
  0x13   : > { %1693 = vmatprep.subr.bf16.mxu1 %v1889_v1  ;;  %v357_v15 = vsel %vm354_vm1, %v355_v12, %v356_v13  ;;  %v360_v16 = vsel %vm354_vm1, 0.0, %v355_v12  ;;  %v362_v17 = vsel %vm354_vm1, %v356_v13, 0.0  ;;  %v1512_v42 = vld [vmem:[%s2266_s2] ss:$0 sm:$0xff]  ;;  %vm2072_vm5 = vcmp.ge.s32.totalorder %v338_v55, 1 }
  0x14   : > { %v363_v18 = vpack.c.bf16 %v357_v15, %v360_v16  ;;  %v514_v22 = vpack.c.bf16 %v362_v17, %v357_v15  ;;  %vm2104_vm8 = vcmp.lt.s32.totalorder %v338_v55, 3  ;;  %v1855_v16 = vld [vmem:[%s2267_s3 + $0x40] sm:$0xff]  }
  0x15   : > { %1682 = vmatpush3.bf16.msra.mxu0 %v1835_v5  ;;  %v1853_v5 = vld [vmem:[%s2267_s3 + $0x50] sm:$0xff]  }
  0x16   : > { %1694 = vmatpush3.bf16.msra.mxu1 %v1836_v6  ;;  %1683 = vmatprep.subr.bf16.mxu0 %v1889_v1 }
  0x17   : > { %1695 = vmatprep.subr.bf16.mxu1 %v1889_v1 }
  0x19   : > { %1684 = vmatpush3.bf16.msra.mxu0 %v1837_v10  ;;  %v1854_v10 = vld [vmem:[%s2267_s3 + $0x48] sm:$0xff]  }
  0x1a   : > { %1696 = vmatpush3.bf16.msra.mxu1 %v1838_v11  ;;  %1701 = vmatprep.subr.bf16.mxu0 %v1889_v1 }
  0x1b   : > { %1713 = vmatprep.subr.bf16.mxu1 %v1889_v1 }
  0x1c   : > { %1686 = vmatmul.mubr.msk.bf16.vlgmr.msra.gmra.mxu0 %vm396_vm2, %v363_v18 }
  0x1d   : > { %1698 = vmatmul.mubr.msk.bf16.vlgmr.msra.gmra.mxu1 %vm396_vm2, %v1985_v7  ;;  %1702 = vmatpush3.bf16.msra.mxu0 %v1840_v14  ;;  %v1608_v14 = vld [vmem:[%s2272_s8] ss:$0 sm:$0xff] }
  0x1e   : > { %1703 = vmatprep.subr.bf16.mxu0 %v1889_v1  ;;  %1709 = vmatprep.mubr.msk.bf16.mxu0 %vm1890_vm0, %v1889_v1 }
  0x1f   : > { %1721 = vmatprep.mubr.msk.bf16.mxu1 %vm1890_vm0, %v1889_v1  ;;  %1714 = vmatpush3.bf16.msra.mxu1 %v1845_v24  ;;  %v1860_v24 = vld [vmem:[%s2269_s5 + $0x28] sm:$0xff]  }
  0x20   : > { %1715 = vmatprep.subr.bf16.mxu1 %v1889_v1 }
  0x21   : > { %1704 = vmatpush3.bf16.msra.mxu0 %v1841_v19 }
  0x22   : > { %1705 = vmatprep.subr.bf16.mxu0 %v1889_v1 }
  0x23   : > { %1716 = vmatpush3.bf16.msra.mxu1 %v1847_v26  ;;  %v1862_v26 = vld [vmem:[%s2269_s5 + $0x20] sm:$0xff]  }
  0x24   : > { %1717 = vmatprep.subr.bf16.mxu1 %v1889_v1 }
  0x25   : > { %1706 = vmatpush3.bf16.msra.mxu0 %v1842_v20  ;;  %v1856_v20 = vld [vmem:[%s2269_s5 + $0x38] sm:$0xff]  }
  0x26   : > { %1707 = vmatprep.subr.bf16.mxu0 %v1889_v1 }
  0x27   : > { %1718 = vmatpush3.bf16.msra.mxu1 %v1849_v28 }
  0x28   : > { %1719 = vmatprep.subr.bf16.mxu1 %v1889_v1 }
  0x29   : > { %1708 = vmatpush3.bf16.msra.mxu0 %v1843_v21  ;;  %v1857_v21 = vld [vmem:[%s2269_s5 + $0x18] sm:$0xff]  }
  0x2a   : > { %1725 = vmatprep.subr.bf16.mxu0 %v1889_v1 }
  0x2b   : > { %1720 = vmatpush3.bf16.msra.mxu1 %v1851_v30 }
  0x2c   : > { %1710 = vmatmul.mubr.msk.bf16.vlgmr.msra.gmra.mxu0 %vm396_vm2, %v514_v22  ;;  %1737 = vmatprep.subr.bf16.mxu1 %v1889_v1  ;;  %v1858_v22 = vld [vmem:[%s2269_s5 + $0x30] sm:$0xff]  }
  0x2d   : > { %1733 = vmatprep.mubr.msk.bf16.mxu0 %vm1890_vm0, %v1889_v1  ;;  %1726 = vmatpush3.bf16.msra.mxu0 %v1844_v23  ;;  %v1859_v23 = vld [vmem:[%s2269_s5 + $0x10] sm:$0xff]  }
  0x2e   : > { %1727 = vmatprep.subr.bf16.mxu0 %v1889_v1 }
  0x31   : > { %1728 = vmatpush3.bf16.msra.mxu0 %v1846_v25  ;;  %v1861_v25 = vld [vmem:[%s2269_s5 + $0x8] sm:$0xff]  }
  0x32   : > { %1729 = vmatprep.subr.bf16.mxu0 %v1889_v1 }
  0x35   : > { %1730 = vmatpush3.bf16.msra.mxu0 %v1848_v27  ;;  %v1863_v27 = vld [vmem:[%s2269_s5] sm:$0xff]  }
  0x36   : > { %1731 = vmatprep.subr.bf16.mxu0 %v1889_v1 }
  0x39   : > { %1732 = vmatpush3.bf16.msra.mxu0 %v1850_v29 }
  0x3a   : > { %1749 = vmatprep.subr.bf16.mxu0 %v1889_v1 }
  0xdc   : > { %v434_v31 = vpop.f32.mrf.mxu0 }
  0xdd   : > { %v507_v32 = vpop.f32.mrf.mxu1 }
  0xde   : > { %v1687_v33 = vpop.f32.mrf.mxu0  ;;  %v508_v40 = vadd.f32 %v507_v32, %v434_v31 }
  0xdf   : > { %v1699_v34 = vpop.f32.mrf.mxu1 }
  0xe0   : > { %v437_v35 = vpop.f32.mrf.mxu0 }
  0xe1   : > { %v510_v36 = vpop.f32.mrf.mxu1 }
  0xe2   : > { %v1688_v37 = vpop.f32.mrf.mxu0  ;;  %v511_v46 = vadd.f32 %v510_v36, %v437_v35 }
  0xe3   : > { %v1700_v38 = vpop.f32.mrf.mxu1 }
  0xe4   : > { %v1544_v38 = vld [vmem:[%s2268_s4] ss:$0 sm:$0xff] }
  0xec   : > { %v585_v41 = vpop.f32.mrf.mxu0 }
  0xed   : > { %v592_v44 = vadd.f32 %v585_v41, %v508_v40 }
  0xee   : > { %v1711_v45 = vpop.f32.mrf.mxu0 }
  0xef   : > { %v601_v47 = vadd.f32 %v1512_v42, %v592_v44 }
  0xf0   : > { %v588_v49 = vpop.f32.mrf.mxu0 }
  0xf1   : > { %v603_v50 = vmax.f32 %v601_v47, 0.0  ;;  %v593_v51 = vadd.f32 %v588_v49, %v511_v46 }
  0xf2   : > { %v1712_v53 = vpop.f32.mrf.mxu0 }
  0xf3   : > { %v618_v54 = vrot.slane %v603_v50, 7  ;;  %v602_v56 = vadd.f32 %v1512_v42, %v593_v51  ;;  %v625_v11 = vrot.slane %v603_v50, 1 }
  0xf5   : > { %v604_v57 = vmax.f32 %v602_v56, 0.0  ;;  %v623_v59 = vsel %vm617_vm3, 0.0, %v618_v54  ;;  %v1865_v56 = vld [vmem:[%s2269_s5 + $0x50] sm:$0xff]  }
  0xf6   : > { %v637_v0 = vsel %vm2067_vm4, %v623_v59, 0.0  ;;  %v1867_v59 = vld [vmem:[%s2269_s5 + $0x40] sm:$0xff]  }
  0xf7   : > { %v605_v60 = vpack.c.bf16 %v604_v57, %v603_v50  ;;  %v619_v61 = vrot.slane %v604_v57, 7  ;;  %v626_v6 = vrot.slane %v604_v57, 1  ;;  %v1866_v57 = vld [vmem:[%s2269_s5 + $0x48] sm:$0xff]  }
  0xf9   : > { %v620_v63 = vsel %vm617_vm3, %v618_v54, %v619_v61  ;;  %1734 = vmatmul.mubr.msk.bf16.vlgmr.msra.gmra.mxu0 %vm396_vm2, %v605_v60  ;;  %v627_v12 = vsel %vm624_vm6, %v625_v11, %v626_v6  ;;  %v630_v13 = vsel %vm624_vm6, %v626_v6, 0.0  ;;  %v1864_v54 = vld [vmem:[%s2269_s5 + $0x58] sm:$0xff]   ;;  %v1874_v6 = vld [vmem:[%s2271_s7 + $0x20] sm:$0xff]  }
  0xfa   : > { %v638_v2 = vsel %vm2072_vm5, %v620_v63, 0.0  ;;  %1757 = vmatprep.mubr.msk.bf16.mxu0 %vm1890_vm0, %v1889_v1  ;;  %v645_v17 = vsel %vm2100_vm7, %v627_v12, 0.0  ;;  %v646_v18 = vsel %vm2104_vm8, %v630_v13, 0.0  ;;  %1750 = vmatpush3.bf16.msra.mxu0 %v1857_v21  ;;  %v1868_v63 = vld [vmem:[%s2271_s7 + $0x38] sm:$0xff]  }
  0xfb   : > { %v647_v4 = vpack.c.bf16 %v638_v2, %v637_v0  ;;  %v792_v19 = vpack.c.bf16 %v646_v18, %v645_v17  ;;  %1751 = vmatprep.subr.bf16.mxu0 %v1889_v1  ;;  %v1869_v0 = vld [vmem:[%s2271_s7 + $0x18] sm:$0xff]   ;;  %v1870_v2 = vld [vmem:[%s2271_s7 + $0x30] sm:$0xff]  }
  0xfd   : > { %1722 = vmatmul.mubr.msk.bf16.vlgmr.msra.gmra.mxu1 %vm396_vm2, %v647_v4  ;;  %v1872_v4 = vld [vmem:[%s2271_s7 + $0x28] sm:$0xff]  }
  0xfe   : > { %1738 = vmatpush3.bf16.msra.mxu1 %v1852_v3  ;;  %1745 = vmatprep.mubr.msk.bf16.mxu1 %vm1890_vm0, %v1889_v1  ;;  %v1871_v3 = vld [vmem:[%s2271_s7 + $0x10] sm:$0xff]  }
  0xff   : > { %1739 = vmatprep.subr.bf16.mxu1 %v1889_v1  ;;  %1752 = vmatpush3.bf16.msra.mxu0 %v1859_v23  ;;  %v1576_v23 = vld [vmem:[%s2270_s6] ss:$0 sm:$0xff] }
 0x100   : > { %1753 = vmatprep.subr.bf16.mxu0 %v1889_v1 }
 0x102   : > { %1740 = vmatpush3.bf16.msra.mxu1 %v1853_v5  ;;  %v1873_v5 = vld [vmem:[%s2271_s7 + $0x8] sm:$0xff]  }
 0x103   : > { %1741 = vmatprep.subr.bf16.mxu1 %v1889_v1  ;;  %1754 = vmatpush3.bf16.msra.mxu0 %v1861_v25 }
 0x104   : > { %1755 = vmatprep.subr.bf16.mxu0 %v1889_v1 }
 0x106   : > { %1742 = vmatpush3.bf16.msra.mxu1 %v1854_v10  ;;  %v1875_v10 = vld [vmem:[%s2271_s7] sm:$0xff]  }
 0x107   : > { %1743 = vmatprep.subr.bf16.mxu1 %v1889_v1  ;;  %1756 = vmatpush3.bf16.msra.mxu0 %v1863_v27 }
 0x108   : > { %1773 = vmatprep.subr.bf16.mxu0 %v1889_v1 }
 0x10a   : > { %1744 = vmatpush3.bf16.msra.mxu1 %v1855_v16 }
 0x10b   : > { %1761 = vmatprep.subr.bf16.mxu1 %v1889_v1 }
 0x10d   : > { %1746 = vmatmul.mubr.msk.bf16.vlgmr.msra.gmra.mxu1 %vm396_vm2, %v792_v19 }
 0x10e   : > { %1769 = vmatprep.mubr.msk.bf16.mxu1 %vm1890_vm0, %v1889_v1  ;;  %1762 = vmatpush3.bf16.msra.mxu1 %v1856_v20 }
 0x10f   : > { %1763 = vmatprep.subr.bf16.mxu1 %v1889_v1 }
 0x112   : > { %1764 = vmatpush3.bf16.msra.mxu1 %v1858_v22 }
 0x113   : > { %1765 = vmatprep.subr.bf16.mxu1 %v1889_v1 }
 0x116   : > { %1766 = vmatpush3.bf16.msra.mxu1 %v1860_v24 }
 0x117   : > { %1767 = vmatprep.subr.bf16.mxu1 %v1889_v1 }
 0x11a   : > { %1768 = vmatpush3.bf16.msra.mxu1 %v1862_v26 }
 0x11b   : > { %1785 = vmatprep.subr.bf16.mxu1 %v1889_v1 }
 0x1b9   : > { %v785_v28 = vpop.f32.mrf.mxu0 }
 0x1bb   : > { %v1735_v29 = vpop.f32.mrf.mxu0 }
 0x1bd   : > { %v717_v30 = vpop.f32.mrf.mxu1  ;;  %v788_v31 = vpop.f32.mrf.mxu0 }
 0x1be   : > { %v786_v36 = vadd.f32 %v785_v28, %v717_v30 }
 0x1bf   : > { %v1723_v32 = vpop.f32.mrf.mxu1  ;;  %v1736_v33 = vpop.f32.mrf.mxu0 }
 0x1c1   : > { %v720_v34 = vpop.f32.mrf.mxu1 }
 0x1c2   : > { %v789_v41 = vadd.f32 %v788_v31, %v720_v34 }
 0x1c3   : > { %v1724_v35 = vpop.f32.mrf.mxu1 }
 0x1cd   : > { %v863_v37 = vpop.f32.mrf.mxu1 }
 0x1ce   : > { %v870_v39 = vadd.f32 %v863_v37, %v786_v36 }
 0x1cf   : > { %v1747_v40 = vpop.f32.mrf.mxu1 }
 0x1d0   : > { %v879_v42 = vadd.f32 %v1544_v38, %v870_v39 }
 0x1d1   : > { %v866_v43 = vpop.f32.mrf.mxu1 }
 0x1d2   : > { %v881_v44 = vmax.f32 %v879_v42, 0.0  ;;  %v871_v45 = vadd.f32 %v866_v43, %v789_v41  ;;  %v1876_v41 = vld [vmem:[%s2271_s7 + $0x58] sm:$0xff]   ;;  %v1877_v43 = vld [vmem:[%s2271_s7 + $0x50] sm:$0xff]  }
 0x1d3   : > { %v1748_v46 = vpop.f32.mrf.mxu1 }
 0x1d4   : > { %v880_v47 = vadd.f32 %v1544_v38, %v871_v45  ;;  %v895_v48 = vrot.slane %v881_v44, 4 }
 0x1d6   : > { %v882_v49 = vmax.f32 %v880_v47, 0.0  ;;  %v900_v52 = vsel %vm354_vm1, 0.0, %v895_v48  ;;  %v1879_v47 = vld [vmem:[%s2271_s7 + $0x40] sm:$0xff]  }
 0x1d8   : > { %v883_v50 = vpack.c.bf16 %v882_v49, %v881_v44  ;;  %v896_v51 = vrot.slane %v882_v49, 4 }
 0x1da   : > { %v897_v53 = vsel %vm354_vm1, %v895_v48, %v896_v51  ;;  %1770 = vmatmul.mubr.msk.bf16.vlgmr.msra.gmra.mxu1 %vm396_vm2, %v883_v50  ;;  %v902_v60 = vsel %vm354_vm1, %v896_v51, 0.0 }
 0x1db   : > { %v903_v55 = vpack.c.bf16 %v897_v53, %v900_v52  ;;  %1793 = vmatprep.mubr.msk.bf16.mxu1 %vm1890_vm0, %v1889_v1  ;;  %v1048_v61 = vpack.c.bf16 %v902_v60, %v897_v53  ;;  %1786 = vmatpush3.bf16.msra.mxu1 %v1869_v0 }
 0x1dc   : > { %1787 = vmatprep.subr.bf16.mxu1 %v1889_v1 }
 0x1dd   : > { %1758 = vmatmul.mubr.msk.bf16.vlgmr.msra.gmra.mxu0 %vm396_vm2, %v903_v55 }
 0x1de   : > { %1774 = vmatpush3.bf16.msra.mxu0 %v1864_v54  ;;  %1781 = vmatprep.mubr.msk.bf16.mxu0 %vm1890_vm0, %v1889_v1 }
 0x1df   : > { %1775 = vmatprep.subr.bf16.mxu0 %v1889_v1  ;;  %1788 = vmatpush3.bf16.msra.mxu1 %v1871_v3 }
 0x1e0   : > { %1789 = vmatprep.subr.bf16.mxu1 %v1889_v1 }
 0x1e2   : > { %1776 = vmatpush3.bf16.msra.mxu0 %v1865_v56 }
 0x1e3   : > { %1777 = vmatprep.subr.bf16.mxu0 %v1889_v1  ;;  %1790 = vmatpush3.bf16.msra.mxu1 %v1873_v5 }
 0x1e4   : > { %1791 = vmatprep.subr.bf16.mxu1 %v1889_v1 }
 0x1e6   : > { %1778 = vmatpush3.bf16.msra.mxu0 %v1866_v57 }
 0x1e7   : > { %1779 = vmatprep.subr.bf16.mxu0 %v1889_v1  ;;  %1792 = vmatpush3.bf16.msra.mxu1 %v1875_v10 }
 0x1e8   : > { %1809 = vmatprep.subr.bf16.mxu1 %v1889_v1 }
 0x1ea   : > { %1780 = vmatpush3.bf16.msra.mxu0 %v1867_v59 }
 0x1eb   : > { %1797 = vmatprep.subr.bf16.mxu0 %v1889_v1 }
 0x1ed   : > { %1782 = vmatmul.mubr.msk.bf16.vlgmr.msra.gmra.mxu0 %vm396_vm2, %v1048_v61 }
 0x1ee   : > { %1805 = vmatprep.mubr.msk.bf16.mxu0 %vm1890_vm0, %v1889_v1  ;;  %1798 = vmatpush3.bf16.msra.mxu0 %v1868_v63 }
 0x1ef   : > { %1799 = vmatprep.subr.bf16.mxu0 %v1889_v1 }
 0x1f2   : > { %1800 = vmatpush3.bf16.msra.mxu0 %v1870_v2 }
 0x1f3   : > { %1801 = vmatprep.subr.bf16.mxu0 %v1889_v1 }
 0x1f6   : > { %1802 = vmatpush3.bf16.msra.mxu0 %v1872_v4 }
 0x1f7   : > { %1803 = vmatprep.subr.bf16.mxu0 %v1889_v1 }
 0x1fa   : > { %1804 = vmatpush3.bf16.msra.mxu0 %v1874_v6 }
 0x29a   : > { %v1041_v11 = vpop.f32.mrf.mxu1 }
 0x29c   : > { %v1771_v12 = vpop.f32.mrf.mxu1 }
 0x29d   : > { %v973_v13 = vpop.f32.mrf.mxu0 }
 0x29e   : > { %v1044_v16 = vpop.f32.mrf.mxu1  ;;  %v1042_v21 = vadd.f32 %v1041_v11, %v973_v13 }
 0x29f   : > { %v1759_v17 = vpop.f32.mrf.mxu0 }
 0x2a0   : > { %v1772_v18 = vpop.f32.mrf.mxu1 }
 0x2a1   : > { %v976_v19 = vpop.f32.mrf.mxu0 }
 0x2a2   : > { %v1045_v26 = vadd.f32 %v1044_v16, %v976_v19 }
 0x2a3   : > { %v1760_v20 = vpop.f32.mrf.mxu0 }
 0x2ad   : > { %v1119_v22 = vpop.f32.mrf.mxu0 }
 0x2ae   : > { %v1126_v24 = vadd.f32 %v1119_v22, %v1042_v21 }
 0x2af   : > { %v1783_v25 = vpop.f32.mrf.mxu0 }
 0x2b0   : > { %v1135_v27 = vadd.f32 %v1576_v23, %v1126_v24 }
 0x2b1   : > { %v1122_v28 = vpop.f32.mrf.mxu0 }
 0x2b2   : > { %v1137_v29 = vmax.f32 %v1135_v27, 0.0  ;;  %v1127_v30 = vadd.f32 %v1122_v28, %v1045_v26 }
 0x2b3   : > { %v1784_v31 = vpop.f32.mrf.mxu0 }
 0x2b4   : > { %v1151_v32 = vrot.slane %v1137_v29, 7  ;;  %v1136_v33 = vadd.f32 %v1576_v23, %v1127_v30  ;;  %v1157_v44 = vrot.slane %v1137_v29, 1 }
 0x2b6   : > { %v1138_v34 = vmax.f32 %v1136_v33, 0.0  ;;  %v1156_v35 = vsel %vm617_vm3, 0.0, %v1151_v32 }
 0x2b7   : > { %v1163_v39 = vsel %vm2067_vm4, %v1156_v35, 0.0 }
 0x2b8   : > { %v1139_v36 = vpack.c.bf16 %v1138_v34, %v1137_v29  ;;  %v1152_v37 = vrot.slane %v1138_v34, 7  ;;  %v1158_v58 = vrot.slane %v1138_v34, 1 }
 0x2ba   : > { %v1153_v38 = vsel %vm617_vm3, %v1151_v32, %v1152_v37  ;;  %1806 = vmatmul.mubr.msk.bf16.vlgmr.msra.gmra.mxu0 %vm396_vm2, %v1139_v36  ;;  %v1159_v45 = vsel %vm624_vm6, %v1157_v44, %v1158_v58  ;;  %v1162_v46 = vsel %vm624_vm6, %v1158_v58, 0.0 }
 0x2bb   : > { %v1164_v40 = vsel %vm2072_vm5, %v1153_v38, 0.0  ;;  %v1165_v48 = vsel %vm2100_vm7, %v1159_v45, 0.0  ;;  %v1166_v49 = vsel %vm2104_vm8, %v1162_v46, 0.0 }
 0x2bc   : > { %v1167_v42 = vpack.c.bf16 %v1164_v40, %v1163_v39  ;;  %v1312_v50 = vpack.c.bf16 %v1166_v49, %v1165_v48 }
 0x2be   : > { %1794 = vmatmul.mubr.msk.bf16.vlgmr.msra.gmra.mxu1 %vm396_vm2, %v1167_v42 }
 0x2bf   : > { %1810 = vmatpush3.bf16.msra.mxu1 %v1876_v41  ;;  %1817 = vmatprep.mubr.msk.bf16.mxu1 %vm1890_vm0, %v1889_v1 }
 0x2c0   : > { %1811 = vmatprep.subr.bf16.mxu1 %v1889_v1 }
 0x2c3   : > { %1812 = vmatpush3.bf16.msra.mxu1 %v1877_v43 }
 0x2c4   : > { %1813 = vmatprep.subr.bf16.mxu1 %v1889_v1 }
 0x2c7   : > { %1814 = vmatpush3.bf16.msra.mxu1 %v1878_v62 }
 0x2c8   : > { %1815 = vmatprep.subr.bf16.mxu1 %v1889_v1 }
 0x2cb   : > { %1816 = vmatpush3.bf16.msra.mxu1 %v1879_v47 }
 0x2ce   : > { %1818 = vmatmul.mubr.msk.bf16.vlgmr.msra.gmra.mxu1 %vm396_vm2, %v1312_v50 }
 0x37a   : > { %v1305_v51 = vpop.f32.mrf.mxu0 }
 0x37c   : > { %v1807_v52 = vpop.f32.mrf.mxu0 }
 0x37e   : > { %v1237_v53 = vpop.f32.mrf.mxu1  ;;  %v1308_v54 = vpop.f32.mrf.mxu0 }
 0x37f   : > { %v1306_v1 = vadd.f32 %v1305_v51, %v1237_v53 }
 0x380   : > { %v1795_v55 = vpop.f32.mrf.mxu1  ;;  %v1808_v56 = vpop.f32.mrf.mxu0 }
 0x382   : > { %v1240_v57 = vpop.f32.mrf.mxu1 }
 0x383   : > { %v1309_v63 = vadd.f32 %v1308_v54, %v1240_v57 }
 0x384   : > { %v1796_v59 = vpop.f32.mrf.mxu1 }
 0x38e   : > { %v1383_v60 = vpop.f32.mrf.mxu1 }
 0x38f   : > { %v1390_v15 = vadd.f32 %v1383_v60, %v1306_v1 }
 0x390   : > { %v1819_v61 = vpop.f32.mrf.mxu1 }
 0x391   : > { %v1399_v0 = vadd.f32 %v1608_v14, %v1390_v15 }
 0x392   : > { %v1386_v2 = vpop.f32.mrf.mxu1 }
 0x393   : > { %v1401_v3 = vadd.f32 %v1399_v0, %v341_v8  ;;  %v1391_v4 = vadd.f32 %v1386_v2, %v1309_v63 }
 0x394   : > { %v1820_v5 = vpop.f32.mrf.mxu1 }
 0x395   : > { %v1403_v6 = vmax.f32 %v1401_v3, 0.0  ;;  %v1400_v10 = vadd.f32 %v1608_v14, %v1391_v4 }
 0x397   : > { %v1615_v11 = vpack.c.bf16 %v1403_v6, %v1403_v6  ;;  %v1402_v12 = vadd.f32 %v1400_v10, %v342_v9 }
 0x399   : > { %1414 = vst.msk [vmem:[%s332_s12] sm:$0xf] %vm1413_vm9, %v1615_v11  ;;  %v1404_v13 = vmax.f32 %v1402_v12, 0.0 }
 0x39b   : > { %v1616_v16 = vpack.c.bf16 %v1404_v13, %v1404_v13 }
 0x39d   : > { %1415 = vst.msk [vmem:[%s332_s12 + $0x4] sm:$0xf] %vm1413_vm9, %v1616_v16 }
 0x39e PF: > { %s19_s30 = sadd.s32 1, %s1887_s30  }
 0x39f   : > { %p16_p4 = scmp.ge.s32.totalorder %s19_s30, 4  }
 0x3a1   :  { %18 = sbr.rel (!%p16_p4) target bundleno = 1 (0x1), region = 94 }

// kernel: _lambda_.23
= control target key start
LH: loop header
LB: loop body
LE: loop exit
PB: predicated region body
PF: predicated region fallthrough
CT: control target
= control target key end

     0   :  { %s648_s20 = smov 64   ;;  %v649_v37 = vmov 0.0   ;;  %vm650_vm0 = vmmov 0   ;;  %vm336_vm1 = vcmask 523264   ;;  %s822_s0 = inlined_call_operand.vmem [shape: bf16[8,576], index: 0, kind: input, shape index: {}]   ;;  %s823_s1 = inlined_call_operand.vmem [shape: bf16[576,64], index: 1, kind: input, shape index: {}]   ;;  %s824_s3 = inlined_call_operand.vmem [shape: f32[1,64], index: 3, kind: input, shape index: {}]   ;;  %s825_s4 = inlined_call_operand.vmem [shape: f32[1,64], index: 4, kind: input, shape index: {}]   ;;  %s826_s2 = inlined_call_operand.vmem [shape: f32[1,64], index: 2, kind: input, shape index: {}]   ;;  %s827_s5 = inlined_call_operand.vmem [shape: bf16[8,128], index: 5, kind: output, shape index: {}]  }
   0x1   :  { %v684_v0 = vld [vmem:[%s822_s0 + $0x8] sm:$0xff]  ;;  %v608_v1 = vld [vmem:[%s823_s1 + $0x78] sm:$0xff]   ;;  %v612_v6 = vld [vmem:[%s823_s1 + $0x70] sm:$0xff]  }
   0x2   :  { %461 = vrot.lane.b32.xlu0 %v684_v0, %s648_s20  ;;  %v502_v2 = vcombine.high %v684_v0, %v684_v0  ;;  %v609_v3 = vld [vmem:[%s823_s1 + $0x38] sm:$0xff]   ;;  %543 = vmatprep.subr.bf16.mxu0 %v608_v1  ;;  %v613_v7 = vld [vmem:[%s823_s1 + $0x30] sm:$0xff]   ;;  %v616_v10 = vld [vmem:[%s823_s1 + $0x68] sm:$0xff]   ;;  %v501_v39 = vcombine.low %v684_v0, %v684_v0 }
   0x3   :  { %v610_v4 = vld [vmem:[%s823_s1 + $0xf8] sm:$0xff]   ;;  %544 = vmatpush3.bf16.msra.mxu0 %v609_v3  ;;  %v614_v8 = vld [vmem:[%s823_s1 + $0xf0] sm:$0xff]   ;;  %v617_v11 = vld [vmem:[%s823_s1 + $0x28] sm:$0xff]  }
   0x4   :  { %412 = vmatprep.mubr.bf16.mxu1 %v502_v2  ;;  %v611_v5 = vld [vmem:[%s823_s1 + $0xb8] sm:$0xff]   ;;  %565 = vmatprep.subr.bf16.mxu1 %v610_v4  ;;  %v615_v9 = vld [vmem:[%s823_s1 + $0xb0] sm:$0xff]   ;;  %v618_v12 = vld [vmem:[%s823_s1 + $0xe8] sm:$0xff]  }
   0x5   :  { %566 = vmatpush3.bf16.msra.mxu1 %v611_v5  ;;  %545 = vmatprep.subr.bf16.mxu0 %v612_v6  ;;  %v619_v13 = vld [vmem:[%s823_s1 + $0xa8] sm:$0xff]   ;;  %v620_v14 = vld [vmem:[%s823_s1 + $0x60] sm:$0xff]   ;;  %v624_v18 = vld [vmem:[%s823_s1 + $0x58] sm:$0xff]  }
   0x6   :  { %567 = vmatprep.subr.bf16.mxu1 %v614_v8  ;;  %v621_v15 = vld [vmem:[%s823_s1 + $0x20] sm:$0xff]   ;;  %v625_v19 = vld [vmem:[%s823_s1 + $0x18] sm:$0xff]   ;;  %v628_v22 = vld [vmem:[%s823_s1 + $0x50] sm:$0xff]  }
   0x7   :  { %546 = vmatpush3.bf16.msra.mxu0 %v613_v7  ;;  %v622_v16 = vld [vmem:[%s823_s1 + $0xe0] sm:$0xff]   ;;  %v626_v20 = vld [vmem:[%s823_s1 + $0xd8] sm:$0xff]   ;;  %v629_v23 = vld [vmem:[%s823_s1 + $0x10] sm:$0xff]  }
   0x8   :  { %547 = vmatprep.subr.bf16.mxu0 %v616_v10  ;;  %v623_v17 = vld [vmem:[%s823_s1 + $0xa0] sm:$0xff]   ;;  %v627_v21 = vld [vmem:[%s823_s1 + $0x98] sm:$0xff]   ;;  %v630_v24 = vld [vmem:[%s823_s1 + $0xd0] sm:$0xff]  }
   0x9   :  { %568 = vmatpush3.bf16.msra.mxu1 %v615_v9  ;;  %v631_v25 = vld [vmem:[%s823_s1 + $0x90] sm:$0xff]   ;;  %v632_v26 = vld [vmem:[%s823_s1 + $0x48] sm:$0xff]   ;;  %v636_v30 = vld [vmem:[%s823_s1 + $0x40] sm:$0xff]  }
   0xa   :  { %569 = vmatprep.subr.bf16.mxu1 %v618_v12  ;;  %v633_v27 = vld [vmem:[%s823_s1 + $0x8] sm:$0xff]   ;;  %v637_v31 = vld [vmem:[%s823_s1] sm:$0xff]   ;;  %v643_v38 = vld [vmem:[%s823_s1 + $0x118] sm:$0xff]  }
   0xb   :  { %548 = vmatpush3.bf16.msra.mxu0 %v617_v11  ;;  %v634_v28 = vld [vmem:[%s823_s1 + $0xc8] sm:$0xff]   ;;  %v638_v32 = vld [vmem:[%s823_s1 + $0xc0] sm:$0xff]   ;;  %v645_v40 = vld [vmem:[%s823_s1 + $0x110] sm:$0xff]  }
   0xc   :  { %549 = vmatprep.subr.bf16.mxu0 %v620_v14  ;;  %v635_v29 = vld [vmem:[%s823_s1 + $0x88] sm:$0xff]   ;;  %v21_v33 = vld [vmem:[%s822_s0] sm:$0xff]  ;;  %v23_v42 = vld [vmem:[%s822_s0 + $0x10] sm:$0xf] }
   0xd   :  { %570 = vmatpush3.bf16.msra.mxu1 %v619_v13  ;;  %v499_v34 = vcombine.low %v21_v33, %v21_v33  ;;  %v500_v35 = vcombine.high %v21_v33, %v21_v33  ;;  %v641_v36 = vld [vmem:[%s823_s1 + $0x80] sm:$0xff]   ;;  %v646_v41 = vld [vmem:[%s823_s1 + $0x108] sm:$0xff]   ;;  %v503_v44 = vcombine.low %v23_v42, %v23_v42 }
   0xe   :  { %571 = vmatprep.subr.bf16.mxu1 %v622_v16  ;;  %v647_v43 = vld [vmem:[%s823_s1 + $0x100] sm:$0xff]  }
   0xf   :  { %550 = vmatpush3.bf16.msra.mxu0 %v621_v15  ;;  %372 = vmatprep.mubr.bf16.mxu0 %v500_v35  ;;  %v541_v50 = vld [vmem:[%s824_s3] ss:$0 sm:$0xff] }
  0x10   :  { %551 = vmatprep.subr.bf16.mxu0 %v624_v18  ;;  %v542_v52 = vld [vmem:[%s825_s4] ss:$0 sm:$0xff] }
  0x11   :  { %572 = vmatpush3.bf16.msra.mxu1 %v623_v17 }
  0x12   :  { %573 = vmatprep.subr.bf16.mxu1 %v626_v20 }
  0x13   :  { %552 = vmatpush3.bf16.msra.mxu0 %v625_v19 }
  0x14   :  { %553 = vmatprep.subr.bf16.mxu0 %v628_v22 }
  0x15   :  { %574 = vmatpush3.bf16.msra.mxu1 %v627_v21 }
  0x16   :  { %575 = vmatprep.subr.bf16.mxu1 %v630_v24 }
  0x17   :  { %554 = vmatpush3.bf16.msra.mxu0 %v629_v23 }
  0x18   :  { %555 = vmatprep.subr.bf16.mxu0 %v632_v26 }
  0x19   :  { %576 = vmatpush3.bf16.msra.mxu1 %v631_v25 }
  0x1a   :  { %577 = vmatprep.subr.bf16.mxu1 %v634_v28 }
  0x1b   :  { %556 = vmatpush3.bf16.msra.mxu0 %v633_v27 }
  0x1c   :  { %557 = vmatprep.subr.bf16.mxu0 %v636_v30 }
  0x1d   :  { %578 = vmatpush3.bf16.msra.mxu1 %v635_v29 }
  0x1e   :  { %579 = vmatprep.subr.bf16.mxu1 %v638_v32 }
  0x1f   :  { %558 = vmatpush3.bf16.msra.mxu0 %v637_v31 }
  0x20   :  { %592 = vmatprep.subr.bf16.mxu0 %v649_v37 }
  0x21   :  { %580 = vmatpush3.bf16.msra.mxu1 %v641_v36 }
  0x22   :  { %373 = vmatmul.mubr.bf16.vlgmr.msra.gmra.mxu0 %v499_v34 }
  0x23   :  { %593 = vmatpush3.bf16.msra.mxu0 %v643_v38  ;;  %600 = vmatprep.mubr.msk.bf16.mxu0 %vm650_vm0, %v649_v37 }
  0x24   :  { %413 = vmatmul.mubr.bf16.vlgmr.msra.gmra.mxu1 %v501_v39  ;;  %594 = vmatprep.subr.bf16.mxu0 %v649_v37 }
  0x27   :  { %595 = vmatpush3.bf16.msra.mxu0 %v645_v40 }
  0x28   :  { %596 = vmatprep.subr.bf16.mxu0 %v649_v37 }
  0x2b   :  { %597 = vmatpush3.bf16.msra.mxu0 %v646_v41 }
  0x2c   :  { %598 = vmatprep.subr.bf16.mxu0 %v649_v37 }
  0x2f   :  { %599 = vmatpush3.bf16.msra.mxu0 %v647_v43 }
  0x32   :  { %601 = vmatmul.mubr.msk.bf16.vlgmr.msra.gmra.mxu0 %vm336_vm1, %v503_v44 }
  0x74   :  { %v462_v45 = vpop.permute.xlu0 %461 }
  0x75   :  { %v464_v46 = vmax.bf16 %v462_v45, %v684_v0  ;;  %v465_v47 = vrot.slane %v462_v45, 4  ;;  %v498_v0 = vld [vmem:[%s826_s2] ss:$0 sm:$0xff] }
  0x77   :  { %v467_v48 = vmax.bf16 %v465_v47, %v23_v42 }
  0x79   :  { %v468_v49 = vmax.bf16 %v467_v48, %v464_v46 }
  0x7b   :  { %v469_v51 = vunpack.c.l.bf16 %v468_v49 }
  0x7d   :  { %v477_v53 = vmul.f32 %v541_v50, %v469_v51 }
  0x7f   :  { %v485_v54 = vadd.f32 %v542_v52, %v477_v53 }
  0x81   :  { %v486_v55 = vmax.f32 %v485_v54, 0.0 }
  0x83   :  { %488 = vrot.lane.b32.xlu0 %v486_v55, %s648_s20 }
  0xe2   :  { %v559_v56 = vpop.f32.mrf.mxu0 }
  0xe4   :  { %v560_v57 = vpop.f32.mrf.mxu0  ;;  %v581_v58 = vpop.f32.mrf.mxu1 }
  0xe5   :  { %v561_v63 = vadd.f32 %v560_v57, %v559_v56 }
  0xe6   :  { %v562_v59 = vpop.f32.mrf.mxu0  ;;  %v582_v60 = vpop.f32.mrf.mxu1 }
  0xe7   :  { %v375_v2 = vadd.f32 %v561_v63, %v498_v0  ;;  %v583_v3 = vadd.f32 %v582_v60, %v581_v58 }
  0xe8   :  { %v563_v61 = vpop.f32.mrf.mxu0  ;;  %v584_v62 = vpop.f32.mrf.mxu1 }
  0xe9   :  { %v415_v4 = vadd.f32 %v583_v3, %v375_v2 }
  0xea   :  { %v585_v1 = vpop.f32.mrf.mxu1 }
  0xf2   :  { %v454_v5 = vpop.f32.mrf.mxu0 }
  0xf3   :  { %v455_v6 = vadd.f32 %v454_v5, %v415_v4 }
  0xf4   :  { %v602_v7 = vpop.f32.mrf.mxu0 }
  0xf5   :  { %v460_v8 = vmax.f32 %v455_v6, 0.0  ;;  %v489_v9 = vpop.permute.xlu0 %488 }
  0xf6   :  { %v457_v10 = vpop.f32.mrf.mxu0 }
  0xf7   :  { %v491_v11 = vsel %vm336_vm1, %v460_v8, %v489_v9 }
  0xf8   :  { %v492_v12 = vpack.c.bf16 %v491_v11, %v491_v11  ;;  %v603_v13 = vpop.f32.mrf.mxu0 }
  0xfa   :  { %493 = vst [vmem:[%s827_s5] sm:$0xf] %v492_v12 }

// kernel: _lambda_.24
= control target key start
LH: loop header
LB: loop body
LE: loop exit
PB: predicated region body
PF: predicated region fallthrough
CT: control target
= control target key end

     0   :  { %s1849_s30 = smov 0   ;;  %s2172_s0 = inlined_call_operand.vmem [shape: bf16[2,4,128], index: 0, kind: input, shape index: {}]   ;;  %s2173_s1 = inlined_call_operand.vmem [shape: bf16[3,128,128], index: 1, kind: input, shape index: {}]   ;;  %s2174_s2 = inlined_call_operand.vmem [shape: f32[1,128], index: 2, kind: input, shape index: {}]   ;;  %s2175_s3 = inlined_call_operand.vmem [shape: bf16[3,128,128], index: 3, kind: input, shape index: {}]   ;;  %s2176_s4 = inlined_call_operand.vmem [shape: f32[1,128], index: 4, kind: input, shape index: {}]   ;;  %s2177_s5 = inlined_call_operand.vmem [shape: bf16[3,128,128], index: 5, kind: input, shape index: {}]   ;;  %s2178_s6 = inlined_call_operand.vmem [shape: f32[1,128], index: 6, kind: input, shape index: {}]   ;;  %s2179_s7 = inlined_call_operand.vmem [shape: bf16[3,128,128], index: 7, kind: input, shape index: {}]   ;;  %s2180_s8 = inlined_call_operand.vmem [shape: f32[1,128], index: 8, kind: input, shape index: {}]   ;;  %s2181_s9 = inlined_call_operand.vmem [shape: bf16[2,4,128], index: 9, kind: output, shape index: {}]  }
   0x1 LB: > { %s1296_s10 = sadd.s32 4294967295, %s1795_s30   ;;  %p1300_p0 = scmp.ge.s32.totalorder %s1795_s30, 1  ;;  %s1795_s30 = sphi %s1849_s30, %s19_s30  }
   0x2   : > { %p286_p1 = scmp.lt.s32.totalorder %s1795_s30, 3 }
   0x4   : > { %p287_p2 = pnand %p1300_p0, %p286_p1 }
   0x5   : > { %p320_p3 = scmp.lt.s32.totalorder (!%p287_p2), %s1296_s10, 1 }
   0x6   : > { %290 = sbr.rel (%p287_p2) target bundleno = 914 (0x392), region = 56 }
   0xb   : > { %v1725_v0 = vld [vmem:[%s2173_s1 + $0x38] sm:$0xff]   ;;  %v1797_v1 = vmov 0.0   ;;  %v1727_v3 = vld [vmem:[%s2173_s1 + $0x30] sm:$0xff]   ;;  %vm1798_vm0 = vmmov 0   ;;  %v1729_v5 = vld [vmem:[%s2173_s1 + $0x28] sm:$0xff]   ;;  %s2185_s10 = smov (!%p320_p3, %s1296_s10), 1  ;;  %v329_v56 = vlaneseq }
   0xc   : > { %1555 = vmatprep.subr.bf16.mxu0 %v1797_v1  ;;  %1575 = vmatprep.subr.bf16.mxu1 %v1797_v1  ;;  %v1726_v2 = vld [vmem:[%s2173_s1 + $0x78] sm:$0xff]   ;;  %v1728_v4 = vld [vmem:[%s2173_s1 + $0x70] sm:$0xff]   ;;  %v1730_v6 = vld [vmem:[%s2173_s1 + $0x68] sm:$0xff]   ;;  %s1301_s27 = sshll.u32 %s2185_s10, 1  ;;  %vm354_vm1 = vcmask 1041408   ;;  %vm689_vm5 = vcmask 1040384  }
   0xd   : > { %1556 = vmatpush3.bf16.msra.mxu0 %v1725_v0  ;;  %1571 = vmatprep.mubr.msk.bf16.mxu0 %vm1798_vm0, %v1797_v1  ;;  %v1731_v7 = vld [vmem:[%s2173_s1 + $0x20] sm:$0xff]   ;;  %v1733_v9 = vld [vmem:[%s2173_s1 + $0x18] sm:$0xff]   ;;  %s323_s15 = scalar_lea.vmem %s2172_s0, %s1301_s27  ;;  %v1735_v11 = vld [vmem:[%s2173_s1 + $0x10] sm:$0xff]   ;;  %v330_v57 = vshrl.u32 %v329_v56, 7  ;;  %vm693_vm8 = vcmask 1042432   ;;  %s327_s26 = scalar_lea.vmem %s2181_s9, %s1301_s27 }
   0xe   : > { %1576 = vmatpush3.bf16.msra.mxu1 %v1726_v2  ;;  %1557 = vmatprep.subr.bf16.mxu0 %v1797_v1  ;;  %v1732_v8 = vld [vmem:[%s2173_s1 + $0x60] sm:$0xff]   ;;  %v1734_v10 = vld [vmem:[%s2173_s1 + $0x58] sm:$0xff]   ;;  %v1736_v13 = vld [vmem:[%s2173_s1 + $0x50] sm:$0xff]  }
   0xf   : > { %1577 = vmatprep.subr.bf16.mxu1 %v1797_v1  ;;  %1591 = vmatprep.mubr.msk.bf16.mxu1 %vm1798_vm0, %v1797_v1  ;;  %v332_v12 = vld [vmem:[%s323_s15] sm:$0x3]  ;;  %v1737_v14 = vld [vmem:[%s2173_s1 + $0x8] sm:$0xff]   ;;  %vm1923_vm2 = vmneg %vm354_vm1  ;;  %v331_v63 = vand.u32 1, %v330_v57 }
  0x10   : > { %v1920_v15 = vunpack.c.l.bf16 %v332_v12  ;;  %v1738_v17 = vld [vmem:[%s2173_s1 + $0x48] sm:$0xff]   ;;  %v1739_v18 = vld [vmem:[%s2173_s1] sm:$0xff]   ;;  %vm1329_vm3 = vmpackc.low %vm1923_vm2, %vm1923_vm2 }
  0x11   : > { %1558 = vmatpush3.bf16.msra.mxu0 %v1727_v3  ;;  %v1740_v19 = vld [vmem:[%s2173_s1 + $0x40] sm:$0xff]   ;;  %v1741_v21 = vld [vmem:[%s2173_s1 + $0xb8] sm:$0xff]   ;;  %v1742_v23 = vld [vmem:[%s2173_s1 + $0xb0] sm:$0xff]   ;;  %vm695_vm6 = vcmp.ge.s32.totalorder %v331_v63, 1  ;;  %vm699_vm9 = vcmp.lt.s32.totalorder %v331_v63, 1 }
  0x12   : > { %1578 = vmatpush3.bf16.msra.mxu1 %v1728_v4  ;;  %1559 = vmatprep.subr.bf16.mxu0 %v1797_v1  ;;  %v352_v20 = vrot.slane %v1920_v15, 6  ;;  %v1743_v24 = vld [vmem:[%s2173_s1 + $0xa8] sm:$0xff]   ;;  %v1744_v25 = vld [vmem:[%s2173_s1 + $0xa0] sm:$0xff]   ;;  %v1745_v26 = vld [vmem:[%s2173_s1 + $0x98] sm:$0xff]   ;;  %v356_v29 = vrot.slane %v1920_v15, 2 }
  0x13   : > { %1579 = vmatprep.subr.bf16.mxu1 %v1797_v1  ;;  %v1746_v27 = vld [vmem:[%s2173_s1 + $0x90] sm:$0xff]   ;;  %v1747_v28 = vld [vmem:[%s2173_s1 + $0x88] sm:$0xff]   ;;  %v1748_v30 = vld [vmem:[%s2173_s1 + $0x80] sm:$0xff]  }
  0x14   : > { %v1330_v22 = vpack.c.bf16 %v352_v20, %v352_v20  ;;  %v1365_v31 = vpack.c.bf16 %v356_v29, %v356_v29  ;;  %vm1364_vm4 = vmpackc.low %vm354_vm1, %vm354_vm1  ;;  %v1749_v32 = vld [vmem:[%s2175_s3 + $0x78] sm:$0xff]   ;;  %v1751_v34 = vld [vmem:[%s2175_s3 + $0x70] sm:$0xff]  }
  0x15   : > { %1560 = vmatpush3.bf16.msra.mxu0 %v1729_v5  ;;  %v1750_v33 = vld [vmem:[%s2175_s3 + $0x38] sm:$0xff]   ;;  %v1752_v35 = vld [vmem:[%s2175_s3 + $0x30] sm:$0xff]   ;;  %v1753_v36 = vld [vmem:[%s2175_s3 + $0x68] sm:$0xff]  }
  0x16   : > { %1580 = vmatpush3.bf16.msra.mxu1 %v1730_v6  ;;  %1561 = vmatprep.subr.bf16.mxu0 %v1797_v1  ;;  %v1754_v37 = vld [vmem:[%s2175_s3 + $0x28] sm:$0xff]   ;;  %v1755_v38 = vld [vmem:[%s2175_s3 + $0x60] sm:$0xff]   ;;  %v1757_v40 = vld [vmem:[%s2175_s3 + $0x58] sm:$0xff]  }
  0x17   : > { %1581 = vmatprep.subr.bf16.mxu1 %v1797_v1  ;;  %v1756_v39 = vld [vmem:[%s2175_s3 + $0x20] sm:$0xff]   ;;  %v1758_v41 = vld [vmem:[%s2175_s3 + $0x18] sm:$0xff]   ;;  %v1759_v42 = vld [vmem:[%s2175_s3 + $0x50] sm:$0xff]  }
  0x18   : > { %v1760_v43 = vld [vmem:[%s2175_s3 + $0x10] sm:$0xff]   ;;  %v1761_v44 = vld [vmem:[%s2175_s3 + $0x48] sm:$0xff]   ;;  %v1763_v46 = vld [vmem:[%s2175_s3 + $0x40] sm:$0xff]  }
  0x19   : > { %1562 = vmatpush3.bf16.msra.mxu0 %v1731_v7  ;;  %v1762_v45 = vld [vmem:[%s2175_s3 + $0x8] sm:$0xff]   ;;  %v1764_v47 = vld [vmem:[%s2175_s3] sm:$0xff]   ;;  %vm1392_vm7 = vmpackc.low %vm695_vm6, %vm695_vm6 }
  0x1a   : > { %1582 = vmatpush3.bf16.msra.mxu1 %v1732_v8  ;;  %1563 = vmatprep.subr.bf16.mxu0 %v1797_v1  ;;  %v1367_v60 = vld [vmem:[%s2174_s2] ss:$0 sm:$0xff]  ;;  %v1765_v8 = vld [vmem:[%s2175_s3 + $0xb8] sm:$0xff]   ;;  %v1771_v16 = vld [vmem:[%s2175_s3 + $0x88] sm:$0xff]  }
  0x1b   : > { %1583 = vmatprep.subr.bf16.mxu1 %v1797_v1  ;;  %vm1427_vm10 = vmpackc.low %vm699_vm9, %vm699_vm9  ;;  %v1781_v29 = vld [vmem:[%s2179_s7 + $0x78] sm:$0xff]  }
  0x1d   : > { %1564 = vmatpush3.bf16.msra.mxu0 %v1733_v9 }
  0x1e   : > { %1584 = vmatpush3.bf16.msra.mxu1 %v1734_v10  ;;  %1565 = vmatprep.subr.bf16.mxu0 %v1797_v1  ;;  %v1766_v10 = vld [vmem:[%s2175_s3 + $0xb0] sm:$0xff]  }
  0x1f   : > { %1585 = vmatprep.subr.bf16.mxu1 %v1797_v1 }
  0x21   : > { %1566 = vmatpush3.bf16.msra.mxu0 %v1735_v11  ;;  %v1767_v11 = vld [vmem:[%s2175_s3 + $0xa8] sm:$0xff]  }
  0x22   : > { %1586 = vmatpush3.bf16.msra.mxu1 %v1736_v13  ;;  %1567 = vmatprep.subr.bf16.mxu0 %v1797_v1  ;;  %v1769_v13 = vld [vmem:[%s2175_s3 + $0x98] sm:$0xff]  }
  0x23   : > { %1587 = vmatprep.subr.bf16.mxu1 %v1797_v1 }
  0x25   : > { %1568 = vmatpush3.bf16.msra.mxu0 %v1737_v14  ;;  %v1770_v14 = vld [vmem:[%s2175_s3 + $0x90] sm:$0xff]  }
  0x26   : > { %1588 = vmatpush3.bf16.msra.mxu1 %v1738_v17  ;;  %1569 = vmatprep.subr.bf16.mxu0 %v1797_v1 }
  0x27   : > { %1589 = vmatprep.subr.bf16.mxu1 %v1797_v1 }
  0x29   : > { %1570 = vmatpush3.bf16.msra.mxu0 %v1739_v18  ;;  %v1772_v18 = vld [vmem:[%s2175_s3 + $0x80] sm:$0xff]  }
  0x2a   : > { %1590 = vmatpush3.bf16.msra.mxu1 %v1740_v19  ;;  %1595 = vmatprep.subr.bf16.mxu0 %v1797_v1 }
  0x2b   : > { %1615 = vmatprep.subr.bf16.mxu1 %v1797_v1 }
  0x2c   : > { %1572 = vmatmul.mubr.msk.bf16.vlgmr.msra.gmra.mxu0 %vm1329_vm3, %v1330_v22  ;;  %v1774_v22 = vld [vmem:[%s2177_s5 + $0x70] sm:$0xff]  }
  0x2d   : > { %1592 = vmatmul.mubr.bf16.vlgmr.msra.gmra.mxu1 %v332_v12  ;;  %1596 = vmatpush3.bf16.msra.mxu0 %v1741_v21  ;;  %v1768_v12 = vld [vmem:[%s2175_s3 + $0xa0] sm:$0xff]   ;;  %v1773_v21 = vld [vmem:[%s2177_s5 + $0x78] sm:$0xff]  }
  0x2e   : > { %1597 = vmatprep.subr.bf16.mxu0 %v1797_v1  ;;  %1611 = vmatprep.mubr.msk.bf16.mxu0 %vm1798_vm0, %v1797_v1 }
  0x2f   : > { %1631 = vmatprep.mubr.msk.bf16.mxu1 %vm1798_vm0, %v1797_v1  ;;  %1616 = vmatpush3.bf16.msra.mxu1 %v1750_v33  ;;  %v1785_v33 = vld [vmem:[%s2179_s7 + $0x58] sm:$0xff]  }
  0x30   : > { %1617 = vmatprep.subr.bf16.mxu1 %v1797_v1 }
  0x31   : > { %1598 = vmatpush3.bf16.msra.mxu0 %v1742_v23  ;;  %v1775_v23 = vld [vmem:[%s2177_s5 + $0x68] sm:$0xff]  }
  0x32   : > { %1599 = vmatprep.subr.bf16.mxu0 %v1797_v1 }
  0x33   : > { %1618 = vmatpush3.bf16.msra.mxu1 %v1752_v35 }
  0x34   : > { %1619 = vmatprep.subr.bf16.mxu1 %v1797_v1 }
  0x35   : > { %1600 = vmatpush3.bf16.msra.mxu0 %v1743_v24  ;;  %v1776_v24 = vld [vmem:[%s2177_s5 + $0x60] sm:$0xff]  }
  0x36   : > { %1601 = vmatprep.subr.bf16.mxu0 %v1797_v1 }
  0x37   : > { %1620 = vmatpush3.bf16.msra.mxu1 %v1754_v37 }
  0x38   : > { %1621 = vmatprep.subr.bf16.mxu1 %v1797_v1 }
  0x39   : > { %1602 = vmatpush3.bf16.msra.mxu0 %v1744_v25  ;;  %v1777_v25 = vld [vmem:[%s2177_s5 + $0x58] sm:$0xff]  }
  0x3a   : > { %1603 = vmatprep.subr.bf16.mxu0 %v1797_v1 }
  0x3b   : > { %1622 = vmatpush3.bf16.msra.mxu1 %v1756_v39 }
  0x3c   : > { %1623 = vmatprep.subr.bf16.mxu1 %v1797_v1 }
  0x3d   : > { %1604 = vmatpush3.bf16.msra.mxu0 %v1745_v26  ;;  %v1778_v26 = vld [vmem:[%s2177_s5 + $0x50] sm:$0xff]  }
  0x3e   : > { %1605 = vmatprep.subr.bf16.mxu0 %v1797_v1 }
  0x3f   : > { %1624 = vmatpush3.bf16.msra.mxu1 %v1758_v41 }
  0x40   : > { %1625 = vmatprep.subr.bf16.mxu1 %v1797_v1 }
  0x41   : > { %1606 = vmatpush3.bf16.msra.mxu0 %v1746_v27  ;;  %v1779_v27 = vld [vmem:[%s2177_s5 + $0x48] sm:$0xff]  }
  0x42   : > { %1607 = vmatprep.subr.bf16.mxu0 %v1797_v1 }
  0x43   : > { %1626 = vmatpush3.bf16.msra.mxu1 %v1760_v43 }
  0x44   : > { %1627 = vmatprep.subr.bf16.mxu1 %v1797_v1 }
  0x45   : > { %1608 = vmatpush3.bf16.msra.mxu0 %v1747_v28  ;;  %v1780_v28 = vld [vmem:[%s2177_s5 + $0x40] sm:$0xff]  }
  0x46   : > { %1609 = vmatprep.subr.bf16.mxu0 %v1797_v1 }
  0x47   : > { %1628 = vmatpush3.bf16.msra.mxu1 %v1762_v45  ;;  %v1430_v45 = vld [vmem:[%s2176_s4] ss:$0 sm:$0xff] }
  0x48   : > { %1629 = vmatprep.subr.bf16.mxu1 %v1797_v1 }
  0x49   : > { %1610 = vmatpush3.bf16.msra.mxu0 %v1748_v30  ;;  %v1782_v30 = vld [vmem:[%s2179_s7 + $0x70] sm:$0xff]  }
  0x4a   : > { %1635 = vmatprep.subr.bf16.mxu0 %v1797_v1 }
  0x4b   : > { %1630 = vmatpush3.bf16.msra.mxu1 %v1764_v47 }
  0x4c   : > { %1612 = vmatmul.mubr.msk.bf16.vlgmr.msra.gmra.mxu0 %vm1364_vm4, %v1365_v31  ;;  %1655 = vmatprep.subr.bf16.mxu1 %v1797_v1  ;;  %v1783_v31 = vld [vmem:[%s2179_s7 + $0x68] sm:$0xff]  }
  0x4d   : > { %1651 = vmatprep.mubr.msk.bf16.mxu0 %vm1798_vm0, %v1797_v1  ;;  %1636 = vmatpush3.bf16.msra.mxu0 %v1749_v32  ;;  %v1784_v32 = vld [vmem:[%s2179_s7 + $0x60] sm:$0xff]  }
  0x4e   : > { %1637 = vmatprep.subr.bf16.mxu0 %v1797_v1 }
  0x51   : > { %1638 = vmatpush3.bf16.msra.mxu0 %v1751_v34  ;;  %v1786_v34 = vld [vmem:[%s2179_s7 + $0x50] sm:$0xff]  }
  0x52   : > { %1639 = vmatprep.subr.bf16.mxu0 %v1797_v1 }
  0x55   : > { %1640 = vmatpush3.bf16.msra.mxu0 %v1753_v36 }
  0x56   : > { %1641 = vmatprep.subr.bf16.mxu0 %v1797_v1 }
  0x59   : > { %1642 = vmatpush3.bf16.msra.mxu0 %v1755_v38 }
  0x5a   : > { %1643 = vmatprep.subr.bf16.mxu0 %v1797_v1 }
  0x5d   : > { %1644 = vmatpush3.bf16.msra.mxu0 %v1757_v40 }
  0x5e   : > { %1645 = vmatprep.subr.bf16.mxu0 %v1797_v1 }
  0x61   : > { %1646 = vmatpush3.bf16.msra.mxu0 %v1759_v42 }
  0x62   : > { %1647 = vmatprep.subr.bf16.mxu0 %v1797_v1 }
  0x65   : > { %1648 = vmatpush3.bf16.msra.mxu0 %v1761_v44 }
  0x66   : > { %1649 = vmatprep.subr.bf16.mxu0 %v1797_v1 }
  0x69   : > { %1650 = vmatpush3.bf16.msra.mxu0 %v1763_v46 }
  0x6a   : > { %1675 = vmatprep.subr.bf16.mxu0 %v1797_v1 }
  0xec   : > { %v458_v48 = vpop.f32.mrf.mxu0 }
  0xed   : > { %v546_v49 = vpop.f32.mrf.mxu1 }
  0xee   : > { %v1573_v50 = vpop.f32.mrf.mxu0  ;;  %v547_v58 = vadd.f32 %v546_v49, %v458_v48 }
  0xef   : > { %v1593_v51 = vpop.f32.mrf.mxu1 }
  0xf0   : > { %v461_v52 = vpop.f32.mrf.mxu0 }
  0xf1   : > { %v549_v53 = vpop.f32.mrf.mxu1 }
  0xf2   : > { %v1574_v54 = vpop.f32.mrf.mxu0  ;;  %v1787_v53 = vld [vmem:[%s2179_s7 + $0x48] sm:$0xff]  }
  0xf3   : > { %v1594_v55 = vpop.f32.mrf.mxu1  ;;  %v1788_v54 = vld [vmem:[%s2179_s7 + $0x40] sm:$0xff]  }
  0xf4   : > { %v1447_v55 = vld [vmem:[%s2178_s6] ss:$0 sm:$0xff] }
 0x10c   : > { %v652_v59 = vpop.f32.mrf.mxu0 }
 0x10d   : > { %v658_v61 = vadd.f32 %v652_v59, %v547_v58 }
 0x10e   : > { %v1613_v62 = vpop.f32.mrf.mxu0 }
 0x10f   : > { %v666_v0 = vadd.f32 %v1367_v60, %v658_v61 }
 0x110   : > { %v655_v2 = vpop.f32.mrf.mxu0 }
 0x111   : > { %v667_v3 = vmax.f32 %v666_v0, 0.0 }
 0x112   : > { %v1614_v4 = vpop.f32.mrf.mxu0 }
 0x113   : > { %v687_v5 = vrot.slane %v667_v3, 7  ;;  %v668_v6 = vpack.c.bf16 %v667_v3, %v667_v3  ;;  %v691_v17 = vrot.slane %v667_v3, 1 }
 0x115   : > { %v690_v7 = vsel %vm689_vm5, 0.0, %v687_v5  ;;  %1652 = vmatmul.mubr.bf16.vlgmr.msra.gmra.mxu0 %v668_v6  ;;  %v694_v19 = vsel %vm693_vm8, %v691_v17, 0.0 }
 0x116   : > { %v1393_v9 = vpack.c.bf16 %v690_v7, %v690_v7  ;;  %1691 = vmatprep.mubr.msk.bf16.mxu0 %vm1798_vm0, %v1797_v1  ;;  %v1428_v20 = vpack.c.bf16 %v694_v19, %v694_v19  ;;  %1676 = vmatpush3.bf16.msra.mxu0 %v1773_v21 }
 0x117   : > { %1677 = vmatprep.subr.bf16.mxu0 %v1797_v1 }
 0x118   : > { %1632 = vmatmul.mubr.msk.bf16.vlgmr.msra.gmra.mxu1 %vm1392_vm7, %v1393_v9 }
 0x119   : > { %1656 = vmatpush3.bf16.msra.mxu1 %v1765_v8  ;;  %1671 = vmatprep.mubr.msk.bf16.mxu1 %vm1798_vm0, %v1797_v1 }
 0x11a   : > { %1657 = vmatprep.subr.bf16.mxu1 %v1797_v1  ;;  %1678 = vmatpush3.bf16.msra.mxu0 %v1774_v22 }
 0x11b   : > { %1679 = vmatprep.subr.bf16.mxu0 %v1797_v1 }
 0x11d   : > { %1658 = vmatpush3.bf16.msra.mxu1 %v1766_v10 }
 0x11e   : > { %1659 = vmatprep.subr.bf16.mxu1 %v1797_v1  ;;  %1680 = vmatpush3.bf16.msra.mxu0 %v1775_v23 }
 0x11f   : > { %1681 = vmatprep.subr.bf16.mxu0 %v1797_v1 }
 0x121   : > { %1660 = vmatpush3.bf16.msra.mxu1 %v1767_v11 }
 0x122   : > { %1661 = vmatprep.subr.bf16.mxu1 %v1797_v1  ;;  %1682 = vmatpush3.bf16.msra.mxu0 %v1776_v24 }
 0x123   : > { %1683 = vmatprep.subr.bf16.mxu0 %v1797_v1 }
 0x125   : > { %1662 = vmatpush3.bf16.msra.mxu1 %v1768_v12 }
 0x126   : > { %1663 = vmatprep.subr.bf16.mxu1 %v1797_v1  ;;  %1684 = vmatpush3.bf16.msra.mxu0 %v1777_v25 }
 0x127   : > { %1685 = vmatprep.subr.bf16.mxu0 %v1797_v1 }
 0x129   : > { %1664 = vmatpush3.bf16.msra.mxu1 %v1769_v13 }
 0x12a   : > { %1665 = vmatprep.subr.bf16.mxu1 %v1797_v1  ;;  %1686 = vmatpush3.bf16.msra.mxu0 %v1778_v26 }
 0x12b   : > { %1687 = vmatprep.subr.bf16.mxu0 %v1797_v1 }
 0x12d   : > { %1666 = vmatpush3.bf16.msra.mxu1 %v1770_v14 }
 0x12e   : > { %1667 = vmatprep.subr.bf16.mxu1 %v1797_v1  ;;  %1688 = vmatpush3.bf16.msra.mxu0 %v1779_v27 }
 0x12f   : > { %1689 = vmatprep.subr.bf16.mxu0 %v1797_v1 }
 0x131   : > { %1668 = vmatpush3.bf16.msra.mxu1 %v1771_v16 }
 0x132   : > { %1669 = vmatprep.subr.bf16.mxu1 %v1797_v1  ;;  %1690 = vmatpush3.bf16.msra.mxu0 %v1780_v28 }
 0x135   : > { %1670 = vmatpush3.bf16.msra.mxu1 %v1772_v18 }
 0x136   : > { %1695 = vmatprep.subr.bf16.mxu1 %v1797_v1 }
 0x138   : > { %1672 = vmatmul.mubr.msk.bf16.vlgmr.msra.gmra.mxu1 %vm1427_vm10, %v1428_v20 }
 0x139   : > { %1711 = vmatprep.mubr.msk.bf16.mxu1 %vm1798_vm0, %v1797_v1  ;;  %1696 = vmatpush3.bf16.msra.mxu1 %v1781_v29 }
 0x13a   : > { %1697 = vmatprep.subr.bf16.mxu1 %v1797_v1 }
 0x13d   : > { %1698 = vmatpush3.bf16.msra.mxu1 %v1782_v30 }
 0x13e   : > { %1699 = vmatprep.subr.bf16.mxu1 %v1797_v1 }
 0x141   : > { %1700 = vmatpush3.bf16.msra.mxu1 %v1783_v31 }
 0x142   : > { %1701 = vmatprep.subr.bf16.mxu1 %v1797_v1 }
 0x145   : > { %1702 = vmatpush3.bf16.msra.mxu1 %v1784_v32 }
 0x146   : > { %1703 = vmatprep.subr.bf16.mxu1 %v1797_v1 }
 0x149   : > { %1704 = vmatpush3.bf16.msra.mxu1 %v1785_v33 }
 0x14a   : > { %1705 = vmatprep.subr.bf16.mxu1 %v1797_v1 }
 0x14d   : > { %1706 = vmatpush3.bf16.msra.mxu1 %v1786_v34 }
 0x14e   : > { %1707 = vmatprep.subr.bf16.mxu1 %v1797_v1 }
 0x151   : > { %1708 = vmatpush3.bf16.msra.mxu1 %v1787_v53 }
 0x152   : > { %1709 = vmatprep.subr.bf16.mxu1 %v1797_v1  ;;  %v1472_v1 = vld [vmem:[%s2180_s8] ss:$0 sm:$0xff] }
 0x155   : > { %1710 = vmatpush3.bf16.msra.mxu1 %v1788_v54 }
 0x1d5   : > { %v890_v35 = vpop.f32.mrf.mxu0 }
 0x1d7   : > { %v1653_v36 = vpop.f32.mrf.mxu0 }
 0x1d8   : > { %v802_v37 = vpop.f32.mrf.mxu1 }
 0x1d9   : > { %v893_v38 = vpop.f32.mrf.mxu0  ;;  %v891_v43 = vadd.f32 %v890_v35, %v802_v37 }
 0x1da   : > { %v1633_v39 = vpop.f32.mrf.mxu1 }
 0x1db   : > { %v1654_v40 = vpop.f32.mrf.mxu0 }
 0x1dc   : > { %v805_v41 = vpop.f32.mrf.mxu1 }
 0x1de   : > { %v1634_v42 = vpop.f32.mrf.mxu1 }
 0x1f8   : > { %v996_v44 = vpop.f32.mrf.mxu1 }
 0x1f9   : > { %v1002_v46 = vadd.f32 %v996_v44, %v891_v43 }
 0x1fa   : > { %v1673_v47 = vpop.f32.mrf.mxu1 }
 0x1fb   : > { %v1010_v48 = vadd.f32 %v1430_v45, %v1002_v46 }
 0x1fc   : > { %v999_v49 = vpop.f32.mrf.mxu1 }
 0x1fd   : > { %v1011_v50 = vmax.f32 %v1010_v48, 0.0 }
 0x1fe   : > { %v1674_v51 = vpop.f32.mrf.mxu1 }
 0x1ff   : > { %v1012_v52 = vpack.c.bf16 %v1011_v50, %v1011_v50 }
 0x201   : > { %1692 = vmatmul.mubr.bf16.vlgmr.msra.gmra.mxu0 %v1012_v52 }
 0x2c1   : > { %v1119_v56 = vpop.f32.mrf.mxu0 }
 0x2c2   : > { %v1120_v57 = vadd.f32 %v1447_v55, %v1119_v56 }
 0x2c3   : > { %v1693_v58 = vpop.f32.mrf.mxu0 }
 0x2c4   : > { %v1125_v59 = vmax.f32 %v1120_v57, 0.0 }
 0x2c5   : > { %v1122_v60 = vpop.f32.mrf.mxu0 }
 0x2c6   : > { %v1126_v61 = vpack.c.bf16 %v1125_v59, %v1125_v59 }
 0x2c7   : > { %v1694_v62 = vpop.f32.mrf.mxu0 }
 0x2c8   : > { %1712 = vmatmul.mubr.bf16.vlgmr.msra.gmra.mxu1 %v1126_v61 }
 0x388   : > { %v1233_v63 = vpop.f32.mrf.mxu1 }
 0x389   : > { %v1234_v0 = vadd.f32 %v1472_v1, %v1233_v63 }
 0x38a   : > { %v1713_v2 = vpop.f32.mrf.mxu1 }
 0x38b   : > { %v1239_v3 = vadd.f32 %v1234_v0, %v1920_v15 }
 0x38c   : > { %v1236_v4 = vpop.f32.mrf.mxu1 }
 0x38d   : > { %v1240_v5 = vmax.f32 %v1239_v3, 0.0 }
 0x38e   : > { %v1714_v6 = vpop.f32.mrf.mxu1 }
 0x38f   : > { %v1241_v7 = vpack.c.bf16 %v1240_v5, %v1240_v5 }
 0x391   : > { %1242 = vst [vmem:[%s327_s26] sm:$0x3] %v1241_v7 }
 0x392 PF: > { %s19_s30 = sadd.s32 1, %s1795_s30  }
 0x393   : > { %p16_p4 = scmp.ge.s32.totalorder %s19_s30, 4  }
 0x395   :  { %18 = sbr.rel (!%p16_p4) target bundleno = 1 (0x1), region = 92 }

</bundles_post_ra>
